<compile_context>
chip_gen: v5e
topology: v5e:2x2
jax: 0.10.0
libtpu: 0.0.40
codegen_flags: <defaults>
</compile_context>

<pallas_src>
import functools

import jax
import jax.numpy as jnp
from jax.experimental import pallas as pl
from jax.experimental.pallas import tpu as pltpu


# ----------------------------------------------------------------------------
# Fused kernel: all layers + linear head, no grid.
# ----------------------------------------------------------------------------
def _fused_lstm_kernel(num_layers, seq_len, batch, hidden, *refs):
    # refs layout:
    #   [0]                        x2d        (T*B, Din)
    #   [1+3l], [2+3l], [3+3l]     per-layer  w_ih_t (Din,4H), w_hh_t (H,4H), bias (1,4H)
    #   [1+3L]                     lin_w_t    (H, O)
    #   [2+3L]                     lin_b      (1, O)
    #   [3+3L]                     out_ref    (T*B, O)
    #   [4+3L]                     gx_scr     VMEM (T*B, 4H)
    #   [5+3L]                     hseq_scr   VMEM (T*B, H)
    x_ref = refs[0]
    lin_w_ref = refs[1 + 3 * num_layers]
    lin_b_ref = refs[2 + 3 * num_layers]
    out_ref = refs[3 + 3 * num_layers]
    gx_scr = refs[4 + 3 * num_layers]
    hseq_scr = refs[5 + 3 * num_layers]

    B = batch
    H = hidden

    # Lane mask selecting the tanh ("g") gate columns of the fused (B, 4H)
    # gate slab (PyTorch gate order [i, f, g, o]).  Hoisted out of all loops.
    lane = jax.lax.broadcasted_iota(jnp.int32, (B, 4 * H), 1)
    g_mask = (lane >= 2 * H) & (lane < 3 * H)

    for layer in range(num_layers):
        wih_ref = refs[1 + 3 * layer]
        whh_ref = refs[2 + 3 * layer]
        b_ref = refs[3 + 3 * layer]

        # Hoisted input projection, batched over all timesteps, bias folded in:
        #   gates_x = X_layer @ W_ih^T + (b_ih + b_hh)        -> (T*B, 4H)
        inp = x_ref[...] if layer == 0 else hseq_scr[...]
        gx_scr[...] = (
            jnp.dot(inp, wih_ref[...], preferred_element_type=jnp.float32)
            + b_ref[...]
        )

        whh = whh_ref[...]                                   # (H, 4H)
        h = jnp.zeros((B, H), jnp.float32)
        c = jnp.zeros((B, H), jnp.float32)

        # Fully unrolled in-kernel time loop (T is a static Python int); only
        # the small (B,H) @ (H,4H) recurrent matmul sits on the serial path.
        for t in range(seq_len):
            gates = gx_scr[t * B:(t + 1) * B, :] + jnp.dot(
                h, whh, preferred_element_type=jnp.float32)   # (B, 4H)

            # Full-slab activations + lane-mask blend (clean full-vreg VPU
            # select; EUP slot has plenty of slack here).
            act = jnp.where(g_mask, jnp.tanh(gates), jax.nn.sigmoid(gates))
            i_g = act[:, 0 * H:1 * H]
            f_g = act[:, 1 * H:2 * H]
            g_g = act[:, 2 * H:3 * H]
            o_g = act[:, 3 * H:4 * H]

            c = f_g * c + i_g * g_g
            h = o_g * jnp.tanh(c)
            hseq_scr[t * B:(t + 1) * B, :] = h

    # Linear head over the whole sequence at once.
    out_ref[...] = (
        jnp.dot(hseq_scr[...], lin_w_ref[...],
                preferred_element_type=jnp.float32)
        + lin_b_ref[...]
    )


# ----------------------------------------------------------------------------
# Wrapper: single pallas_call for the full model forward.
# ----------------------------------------------------------------------------
def lstm_model_forward(x, params):
    T, B, Din = x.shape
    num_layers = len(params["layers"])
    H = params["layers"][0]["w_hh_t"].shape[0]
    O = params["lin_w_t"].shape[1]

    x2d = x.reshape(T * B, Din)

    args = [x2d]
    in_specs = [pl.BlockSpec((T * B, Din), lambda: (0, 0))]
    for lp in params["layers"]:
        args += [lp["w_ih_t"], lp["w_hh_t"], lp["bias"]]
        in_specs += [
            pl.BlockSpec(lp["w_ih_t"].shape, lambda: (0, 0)),
            pl.BlockSpec(lp["w_hh_t"].shape, lambda: (0, 0)),
            pl.BlockSpec(lp["bias"].shape, lambda: (0, 0)),
        ]
    args += [params["lin_w_t"], params["lin_b"]]
    in_specs += [
        pl.BlockSpec(params["lin_w_t"].shape, lambda: (0, 0)),
        pl.BlockSpec(params["lin_b"].shape, lambda: (0, 0)),
    ]

    kernel = functools.partial(_fused_lstm_kernel, num_layers, T, B, H)

    out2d = pl.pallas_call(
        kernel,
        out_shape=jax.ShapeDtypeStruct((T * B, O), jnp.float32),
        grid=(),                               # no grid: one fused invocation
        in_specs=in_specs,
        out_specs=pl.BlockSpec((T * B, O), lambda: (0, 0)),
        scratch_shapes=[
            pltpu.VMEM((T * B, 4 * H), jnp.float32),   # gates_x buffer
            pltpu.VMEM((T * B, H), jnp.float32),       # per-layer h sequence
        ],
    )(*args)
    return out2d.reshape(T, B, O)


lstm_model_forward_jit = jax.jit(lstm_model_forward)


# ----------------------------------------------------------------------------
# Deterministic parameter init (PyTorch-style U(-1/sqrt(H), 1/sqrt(H)))
# ----------------------------------------------------------------------------
def init_params(key, input_size, hidden_size, output_size, num_layers):
    bound = 1.0 / jnp.sqrt(hidden_size)
    layers = []
    for l in range(num_layers):
        d_in = input_size if l == 0 else hidden_size
        key, k1, k2, k3, k4 = jax.random.split(key, 5)
        w_ih = jax.random.uniform(k1, (4 * hidden_size, d_in), jnp.float32,
                                  -bound, bound)
        w_hh = jax.random.uniform(k2, (4 * hidden_size, hidden_size),
                                  jnp.float32, -bound, bound)
        b_ih = jax.random.uniform(k3, (4 * hidden_size,), jnp.float32,
                                  -bound, bound)
        b_hh = jax.random.uniform(k4, (4 * hidden_size,), jnp.float32,
                                  -bound, bound)
        layers.append({
            "w_ih_t": w_ih.T,                           # (d_in, 4H)
            "w_hh_t": w_hh.T,                           # (H, 4H)
            "bias": (b_ih + b_hh).reshape(1, -1),       # (1, 4H)
        })
    key, k5, k6 = jax.random.split(key, 3)
    lb = 1.0 / jnp.sqrt(hidden_size)
    lin_w = jax.random.uniform(k5, (output_size, hidden_size), jnp.float32,
                               -lb, lb)
    lin_b = jax.random.uniform(k6, (output_size,), jnp.float32, -lb, lb)
    return {
        "layers": layers,
        "lin_w_t": lin_w.T,                 # (H, O)
        "lin_b": lin_b.reshape(1, -1),      # (1, O)
    }


# ----------------------------------------------------------------------------
# Pure-JAX reference (lax.scan) for correctness checking
# ----------------------------------------------------------------------------
def reference_forward(x, params):
    h = x

    def layer_ref(h_seq, lp):
        H = lp["w_hh_t"].shape[0]
        B = h_seq.shape[1]

        def step(carry, x_t):
            hp, cp = carry
            gates = x_t @ lp["w_ih_t"] + hp @ lp["w_hh_t"] + lp["bias"]
            i_g = jax.nn.sigmoid(gates[:, 0 * H:1 * H])
            f_g = jax.nn.sigmoid(gates[:, 1 * H:2 * H])
            g_g = jnp.tanh(gates[:, 2 * H:3 * H])
            o_g = jax.nn.sigmoid(gates[:, 3 * H:4 * H])
            c_n = f_g * cp + i_g * g_g
            h_n = o_g * jnp.tanh(c_n)
            return (h_n, c_n), h_n

        init = (jnp.zeros((B, H), jnp.float32), jnp.zeros((B, H), jnp.float32))
        _, out = jax.lax.scan(step, init, h_seq)
        return out

    for lp in params["layers"]:
        h = layer_ref(h, lp)
    return h @ params["lin_w_t"] + params["lin_b"]


if __name__ == "__main__":
    input_size, hidden_size, output_size, num_layers = 49, 64, 8, 3
    seq_len, batch = 8, 2

    key = jax.random.PRNGKey(0)
    key, kx = jax.random.split(key)
    x = jax.random.normal(kx, (seq_len, batch, input_size), jnp.float32)

    params = init_params(key, input_size, hidden_size, output_size, num_layers)

    out = lstm_model_forward_jit(x, params)
    out = jax.block_until_ready(out)

    assert out.shape == (seq_len, batch, output_size)

    ref = reference_forward(x, params)
    # Slightly looser than 1e-5: bias is folded into the batched pre-projection
    # (different FP summation order than the per-step reference).
    assert jnp.allclose(out, ref, atol=1e-4, rtol=1e-4), \
        float(jnp.max(jnp.abs(out - ref)))

    print("KERNEL_OK")
</pallas_src>

<mosaic_0001>
module attributes {stable_mosaic.version = 11 : i64} {
  func.func @_fused_lstm_kernel(%arg0: memref<16x49xf32, #tpu.memory_space<vmem>>, %arg1: memref<49x256xf32, #tpu.memory_space<vmem>>, %arg2: memref<64x256xf32, #tpu.memory_space<vmem>>, %arg3: memref<1x256xf32, #tpu.memory_space<vmem>>, %arg4: memref<64x256xf32, #tpu.memory_space<vmem>>, %arg5: memref<64x256xf32, #tpu.memory_space<vmem>>, %arg6: memref<1x256xf32, #tpu.memory_space<vmem>>, %arg7: memref<64x256xf32, #tpu.memory_space<vmem>>, %arg8: memref<64x256xf32, #tpu.memory_space<vmem>>, %arg9: memref<1x256xf32, #tpu.memory_space<vmem>>, %arg10: memref<64x8xf32, #tpu.memory_space<vmem>>, %arg11: memref<1x8xf32, #tpu.memory_space<vmem>>, %arg12: memref<16x8xf32, #tpu.memory_space<vmem>>, %arg13: memref<16x256xf32, #tpu.memory_space<vmem>>, %arg14: memref<16x64xf32, #tpu.memory_space<vmem>>) attributes {dimension_semantics = [], scalar_prefetch = 0 : i64, scratch_operands = 2 : i64, tpu.core_type = #tpu.core_type<tc>} {
    %0 = tpu.iota {dimensions = array<i32: 1>} : vector<2x256xi32>
    %c128_i32 = arith.constant 128 : i32
    %1 = vector.broadcast %c128_i32 : i32 to vector<2x256xi32>
    %2 = arith.cmpi sge, %0, %1 : vector<2x256xi32>
    %c192_i32 = arith.constant 192 : i32
    %3 = vector.broadcast %c192_i32 : i32 to vector<2x256xi32>
    %4 = arith.cmpi slt, %0, %3 : vector<2x256xi32>
    %5 = arith.andi %2, %4 : vector<2x256xi1>
    %c0 = arith.constant 0 : index
    %c0_0 = arith.constant 0 : index
    %6 = vector.load %arg0[%c0, %c0_0] : memref<16x49xf32, #tpu.memory_space<vmem>>, vector<16x49xf32>
    %c0_1 = arith.constant 0 : index
    %c0_2 = arith.constant 0 : index
    %7 = vector.load %arg1[%c0_1, %c0_2] : memref<49x256xf32, #tpu.memory_space<vmem>>, vector<49x256xf32>
    %cst = arith.constant dense<0.000000e+00> : vector<16x256xf32>
    %8 = tpu.matmul %6, %7, %cst {dimension_numbers = #tpu.dot_dimension_numbers<[1], [0], [0], [1], [0, 0, 1, 1], [], []>} : vector<16x49xf32>, vector<49x256xf32>, vector<16x256xf32> -> vector<16x256xf32>
    %c0_3 = arith.constant 0 : index
    %c0_4 = arith.constant 0 : index
    %9 = vector.load %arg3[%c0_3, %c0_4] : memref<1x256xf32, #tpu.memory_space<vmem>>, vector<1x256xf32>
    %10 = vector.broadcast %9 : vector<1x256xf32> to vector<16x256xf32>
    %11 = arith.addf %8, %10 : vector<16x256xf32>
    %c0_5 = arith.constant 0 : index
    %c0_6 = arith.constant 0 : index
    %12 = vector.load %arg13[%c0_5, %c0_6] : memref<16x256xf32, #tpu.memory_space<vmem>>, vector<16x256xf32>
    tpu.vector_store %arg13[%c0_5, %c0_6], %11 {strides = array<i32>} : memref<16x256xf32, #tpu.memory_space<vmem>>, vector<16x256xf32>,
    %c0_7 = arith.constant 0 : index
    %c0_8 = arith.constant 0 : index
    %13 = vector.load %arg2[%c0_7, %c0_8] : memref<64x256xf32, #tpu.memory_space<vmem>>, vector<64x256xf32>
    %cst_9 = arith.constant 0.000000e+00 : f32
    %14 = vector.broadcast %cst_9 : f32 to vector<2x64xf32>
    %cst_10 = arith.constant 0.000000e+00 : f32
    %15 = vector.broadcast %cst_10 : f32 to vector<2x64xf32>
    %c0_11 = arith.constant 0 : index
    %c0_12 = arith.constant 0 : index
    %16 = vector.load %arg13[%c0_11, %c0_12] : memref<16x256xf32, #tpu.memory_space<vmem>>, vector<2x256xf32>
    %cst_13 = arith.constant dense<0.000000e+00> : vector<2x256xf32>
    %17 = tpu.matmul %14, %13, %cst_13 {dimension_numbers = #tpu.dot_dimension_numbers<[1], [0], [0], [1], [0, 0, 1, 1], [], []>} : vector<2x64xf32>, vector<64x256xf32>, vector<2x256xf32> -> vector<2x256xf32>
    %18 = arith.addf %16, %17 : vector<2x256xf32>
    %19 = math.tanh %18 : vector<2x256xf32>
    %20 = arith.negf %18 : vector<2x256xf32>
    %21 = math.exp %20 : vector<2x256xf32>
    %cst_14 = arith.constant 1.000000e+00 : f32
    %22 = vector.broadcast %cst_14 : f32 to vector<2x256xf32>
    %23 = arith.addf %22, %21 : vector<2x256xf32>
    %24 = arith.divf %22, %23 : vector<2x256xf32>
    %25 = arith.select %5, %19, %24 : vector<2x256xi1>, vector<2x256xf32>
    %26 = vector.extract_strided_slice %25 {offsets = [0, 0], sizes = [2, 64], strides = [1, 1]} : vector<2x256xf32> to vector<2x64xf32>
    %27 = vector.extract_strided_slice %25 {offsets = [0, 64], sizes = [2, 64], strides = [1, 1]} : vector<2x256xf32> to vector<2x64xf32>
    %28 = vector.extract_strided_slice %25 {offsets = [0, 128], sizes = [2, 64], strides = [1, 1]} : vector<2x256xf32> to vector<2x64xf32>
    %29 = vector.extract_strided_slice %25 {offsets = [0, 192], sizes = [2, 64], strides = [1, 1]} : vector<2x256xf32> to vector<2x64xf32>
    %30 = arith.mulf %27, %15 : vector<2x64xf32>
    %31 = arith.mulf %26, %28 : vector<2x64xf32>
    %32 = arith.addf %30, %31 : vector<2x64xf32>
    %33 = math.tanh %32 : vector<2x64xf32>
    %34 = arith.mulf %29, %33 : vector<2x64xf32>
    %c0_15 = arith.constant 0 : index
    %c0_16 = arith.constant 0 : index
    %35 = vector.load %arg14[%c0_15, %c0_16] : memref<16x64xf32, #tpu.memory_space<vmem>>, vector<2x64xf32>
    tpu.vector_store %arg14[%c0_15, %c0_16], %34 {strides = array<i32>} : memref<16x64xf32, #tpu.memory_space<vmem>>, vector<2x64xf32>,
    %c2 = arith.constant 2 : index
    %c0_17 = arith.constant 0 : index
    %36 = vector.load %arg13[%c2, %c0_17] : memref<16x256xf32, #tpu.memory_space<vmem>>, vector<2x256xf32>
    %cst_18 = arith.constant dense<0.000000e+00> : vector<2x256xf32>
    %37 = tpu.matmul %34, %13, %cst_18 {dimension_numbers = #tpu.dot_dimension_numbers<[1], [0], [0], [1], [0, 0, 1, 1], [], []>} : vector<2x64xf32>, vector<64x256xf32>, vector<2x256xf32> -> vector<2x256xf32>
    %38 = arith.addf %36, %37 : vector<2x256xf32>
    %39 = math.tanh %38 : vector<2x256xf32>
    %40 = arith.negf %38 : vector<2x256xf32>
    %41 = math.exp %40 : vector<2x256xf32>
    %cst_19 = arith.constant 1.000000e+00 : f32
    %42 = vector.broadcast %cst_19 : f32 to vector<2x256xf32>
    %43 = arith.addf %42, %41 : vector<2x256xf32>
    %44 = arith.divf %42, %43 : vector<2x256xf32>
    %45 = arith.select %5, %39, %44 : vector<2x256xi1>, vector<2x256xf32>
    %46 = vector.extract_strided_slice %45 {offsets = [0, 0], sizes = [2, 64], strides = [1, 1]} : vector<2x256xf32> to vector<2x64xf32>
    %47 = vector.extract_strided_slice %45 {offsets = [0, 64], sizes = [2, 64], strides = [1, 1]} : vector<2x256xf32> to vector<2x64xf32>
    %48 = vector.extract_strided_slice %45 {offsets = [0, 128], sizes = [2, 64], strides = [1, 1]} : vector<2x256xf32> to vector<2x64xf32>
    %49 = vector.extract_strided_slice %45 {offsets = [0, 192], sizes = [2, 64], strides = [1, 1]} : vector<2x256xf32> to vector<2x64xf32>
    %50 = arith.mulf %47, %32 : vector<2x64xf32>
    %51 = arith.mulf %46, %48 : vector<2x64xf32>
    %52 = arith.addf %50, %51 : vector<2x64xf32>
    %53 = math.tanh %52 : vector<2x64xf32>
    %54 = arith.mulf %49, %53 : vector<2x64xf32>
    %c2_20 = arith.constant 2 : index
    %c0_21 = arith.constant 0 : index
    %55 = vector.load %arg14[%c2_20, %c0_21] : memref<16x64xf32, #tpu.memory_space<vmem>>, vector<2x64xf32>
    tpu.vector_store %arg14[%c2_20, %c0_21], %54 {strides = array<i32>} : memref<16x64xf32, #tpu.memory_space<vmem>>, vector<2x64xf32>,
    %c4 = arith.constant 4 : index
    %c0_22 = arith.constant 0 : index
    %56 = vector.load %arg13[%c4, %c0_22] : memref<16x256xf32, #tpu.memory_space<vmem>>, vector<2x256xf32>
    %cst_23 = arith.constant dense<0.000000e+00> : vector<2x256xf32>
    %57 = tpu.matmul %54, %13, %cst_23 {dimension_numbers = #tpu.dot_dimension_numbers<[1], [0], [0], [1], [0, 0, 1, 1], [], []>} : vector<2x64xf32>, vector<64x256xf32>, vector<2x256xf32> -> vector<2x256xf32>
    %58 = arith.addf %56, %57 : vector<2x256xf32>
    %59 = math.tanh %58 : vector<2x256xf32>
    %60 = arith.negf %58 : vector<2x256xf32>
    %61 = math.exp %60 : vector<2x256xf32>
    %cst_24 = arith.constant 1.000000e+00 : f32
    %62 = vector.broadcast %cst_24 : f32 to vector<2x256xf32>
    %63 = arith.addf %62, %61 : vector<2x256xf32>
    %64 = arith.divf %62, %63 : vector<2x256xf32>
    %65 = arith.select %5, %59, %64 : vector<2x256xi1>, vector<2x256xf32>
    %66 = vector.extract_strided_slice %65 {offsets = [0, 0], sizes = [2, 64], strides = [1, 1]} : vector<2x256xf32> to vector<2x64xf32>
    %67 = vector.extract_strided_slice %65 {offsets = [0, 64], sizes = [2, 64], strides = [1, 1]} : vector<2x256xf32> to vector<2x64xf32>
    %68 = vector.extract_strided_slice %65 {offsets = [0, 128], sizes = [2, 64], strides = [1, 1]} : vector<2x256xf32> to vector<2x64xf32>
    %69 = vector.extract_strided_slice %65 {offsets = [0, 192], sizes = [2, 64], strides = [1, 1]} : vector<2x256xf32> to vector<2x64xf32>
    %70 = arith.mulf %67, %52 : vector<2x64xf32>
    %71 = arith.mulf %66, %68 : vector<2x64xf32>
    %72 = arith.addf %70, %71 : vector<2x64xf32>
    %73 = math.tanh %72 : vector<2x64xf32>
    %74 = arith.mulf %69, %73 : vector<2x64xf32>
    %c4_25 = arith.constant 4 : index
    %c0_26 = arith.constant 0 : index
    %75 = vector.load %arg14[%c4_25, %c0_26] : memref<16x64xf32, #tpu.memory_space<vmem>>, vector<2x64xf32>
    tpu.vector_store %arg14[%c4_25, %c0_26], %74 {strides = array<i32>} : memref<16x64xf32, #tpu.memory_space<vmem>>, vector<2x64xf32>,
    %c6 = arith.constant 6 : index
    %c0_27 = arith.constant 0 : index
    %76 = vector.load %arg13[%c6, %c0_27] : memref<16x256xf32, #tpu.memory_space<vmem>>, vector<2x256xf32>
    %cst_28 = arith.constant dense<0.000000e+00> : vector<2x256xf32>
    %77 = tpu.matmul %74, %13, %cst_28 {dimension_numbers = #tpu.dot_dimension_numbers<[1], [0], [0], [1], [0, 0, 1, 1], [], []>} : vector<2x64xf32>, vector<64x256xf32>, vector<2x256xf32> -> vector<2x256xf32>
    %78 = arith.addf %76, %77 : vector<2x256xf32>
    %79 = math.tanh %78 : vector<2x256xf32>
    %80 = arith.negf %78 : vector<2x256xf32>
    %81 = math.exp %80 : vector<2x256xf32>
    %cst_29 = arith.constant 1.000000e+00 : f32
    %82 = vector.broadcast %cst_29 : f32 to vector<2x256xf32>
    %83 = arith.addf %82, %81 : vector<2x256xf32>
    %84 = arith.divf %82, %83 : vector<2x256xf32>
    %85 = arith.select %5, %79, %84 : vector<2x256xi1>, vector<2x256xf32>
    %86 = vector.extract_strided_slice %85 {offsets = [0, 0], sizes = [2, 64], strides = [1, 1]} : vector<2x256xf32> to vector<2x64xf32>
    %87 = vector.extract_strided_slice %85 {offsets = [0, 64], sizes = [2, 64], strides = [1, 1]} : vector<2x256xf32> to vector<2x64xf32>
    %88 = vector.extract_strided_slice %85 {offsets = [0, 128], sizes = [2, 64], strides = [1, 1]} : vector<2x256xf32> to vector<2x64xf32>
    %89 = vector.extract_strided_slice %85 {offsets = [0, 192], sizes = [2, 64], strides = [1, 1]} : vector<2x256xf32> to vector<2x64xf32>
    %90 = arith.mulf %87, %72 : vector<2x64xf32>
    %91 = arith.mulf %86, %88 : vector<2x64xf32>
    %92 = arith.addf %90, %91 : vector<2x64xf32>
    %93 = math.tanh %92 : vector<2x64xf32>
    %94 = arith.mulf %89, %93 : vector<2x64xf32>
    %c6_30 = arith.constant 6 : index
    %c0_31 = arith.constant 0 : index
    %95 = vector.load %arg14[%c6_30, %c0_31] : memref<16x64xf32, #tpu.memory_space<vmem>>, vector<2x64xf32>
    tpu.vector_store %arg14[%c6_30, %c0_31], %94 {strides = array<i32>} : memref<16x64xf32, #tpu.memory_space<vmem>>, vector<2x64xf32>,
    %c8 = arith.constant 8 : index
    %c0_32 = arith.constant 0 : index
    %96 = vector.load %arg13[%c8, %c0_32] : memref<16x256xf32, #tpu.memory_space<vmem>>, vector<2x256xf32>
    %cst_33 = arith.constant dense<0.000000e+00> : vector<2x256xf32>
    %97 = tpu.matmul %94, %13, %cst_33 {dimension_numbers = #tpu.dot_dimension_numbers<[1], [0], [0], [1], [0, 0, 1, 1], [], []>} : vector<2x64xf32>, vector<64x256xf32>, vector<2x256xf32> -> vector<2x256xf32>
    %98 = arith.addf %96, %97 : vector<2x256xf32>
    %99 = math.tanh %98 : vector<2x256xf32>
    %100 = arith.negf %98 : vector<2x256xf32>
    %101 = math.exp %100 : vector<2x256xf32>
    %cst_34 = arith.constant 1.000000e+00 : f32
    %102 = vector.broadcast %cst_34 : f32 to vector<2x256xf32>
    %103 = arith.addf %102, %101 : vector<2x256xf32>
    %104 = arith.divf %102, %103 : vector<2x256xf32>
    %105 = arith.select %5, %99, %104 : vector<2x256xi1>, vector<2x256xf32>
    %106 = vector.extract_strided_slice %105 {offsets = [0, 0], sizes = [2, 64], strides = [1, 1]} : vector<2x256xf32> to vector<2x64xf32>
    %107 = vector.extract_strided_slice %105 {offsets = [0, 64], sizes = [2, 64], strides = [1, 1]} : vector<2x256xf32> to vector<2x64xf32>
    %108 = vector.extract_strided_slice %105 {offsets = [0, 128], sizes = [2, 64], strides = [1, 1]} : vector<2x256xf32> to vector<2x64xf32>
    %109 = vector.extract_strided_slice %105 {offsets = [0, 192], sizes = [2, 64], strides = [1, 1]} : vector<2x256xf32> to vector<2x64xf32>
    %110 = arith.mulf %107, %92 : vector<2x64xf32>
    %111 = arith.mulf %106, %108 : vector<2x64xf32>
    %112 = arith.addf %110, %111 : vector<2x64xf32>
    %113 = math.tanh %112 : vector<2x64xf32>
    %114 = arith.mulf %109, %113 : vector<2x64xf32>
    %c8_35 = arith.constant 8 : index
    %c0_36 = arith.constant 0 : index
    %115 = vector.load %arg14[%c8_35, %c0_36] : memref<16x64xf32, #tpu.memory_space<vmem>>, vector<2x64xf32>
    tpu.vector_store %arg14[%c8_35, %c0_36], %114 {strides = array<i32>} : memref<16x64xf32, #tpu.memory_space<vmem>>, vector<2x64xf32>,
    %c10 = arith.constant 10 : index
    %c0_37 = arith.constant 0 : index
    %116 = vector.load %arg13[%c10, %c0_37] : memref<16x256xf32, #tpu.memory_space<vmem>>, vector<2x256xf32>
    %cst_38 = arith.constant dense<0.000000e+00> : vector<2x256xf32>
    %117 = tpu.matmul %114, %13, %cst_38 {dimension_numbers = #tpu.dot_dimension_numbers<[1], [0], [0], [1], [0, 0, 1, 1], [], []>} : vector<2x64xf32>, vector<64x256xf32>, vector<2x256xf32> -> vector<2x256xf32>
    %118 = arith.addf %116, %117 : vector<2x256xf32>
    %119 = math.tanh %118 : vector<2x256xf32>
    %120 = arith.negf %118 : vector<2x256xf32>
    %121 = math.exp %120 : vector<2x256xf32>
    %cst_39 = arith.constant 1.000000e+00 : f32
    %122 = vector.broadcast %cst_39 : f32 to vector<2x256xf32>
    %123 = arith.addf %122, %121 : vector<2x256xf32>
    %124 = arith.divf %122, %123 : vector<2x256xf32>
    %125 = arith.select %5, %119, %124 : vector<2x256xi1>, vector<2x256xf32>
    %126 = vector.extract_strided_slice %125 {offsets = [0, 0], sizes = [2, 64], strides = [1, 1]} : vector<2x256xf32> to vector<2x64xf32>
    %127 = vector.extract_strided_slice %125 {offsets = [0, 64], sizes = [2, 64], strides = [1, 1]} : vector<2x256xf32> to vector<2x64xf32>
    %128 = vector.extract_strided_slice %125 {offsets = [0, 128], sizes = [2, 64], strides = [1, 1]} : vector<2x256xf32> to vector<2x64xf32>
    %129 = vector.extract_strided_slice %125 {offsets = [0, 192], sizes = [2, 64], strides = [1, 1]} : vector<2x256xf32> to vector<2x64xf32>
    %130 = arith.mulf %127, %112 : vector<2x64xf32>
    %131 = arith.mulf %126, %128 : vector<2x64xf32>
    %132 = arith.addf %130, %131 : vector<2x64xf32>
    %133 = math.tanh %132 : vector<2x64xf32>
    %134 = arith.mulf %129, %133 : vector<2x64xf32>
    %c10_40 = arith.constant 10 : index
    %c0_41 = arith.constant 0 : index
    %135 = vector.load %arg14[%c10_40, %c0_41] : memref<16x64xf32, #tpu.memory_space<vmem>>, vector<2x64xf32>
    tpu.vector_store %arg14[%c10_40, %c0_41], %134 {strides = array<i32>} : memref<16x64xf32, #tpu.memory_space<vmem>>, vector<2x64xf32>,
    %c12 = arith.constant 12 : index
    %c0_42 = arith.constant 0 : index
    %136 = vector.load %arg13[%c12, %c0_42] : memref<16x256xf32, #tpu.memory_space<vmem>>, vector<2x256xf32>
    %cst_43 = arith.constant dense<0.000000e+00> : vector<2x256xf32>
    %137 = tpu.matmul %134, %13, %cst_43 {dimension_numbers = #tpu.dot_dimension_numbers<[1], [0], [0], [1], [0, 0, 1, 1], [], []>} : vector<2x64xf32>, vector<64x256xf32>, vector<2x256xf32> -> vector<2x256xf32>
    %138 = arith.addf %136, %137 : vector<2x256xf32>
    %139 = math.tanh %138 : vector<2x256xf32>
    %140 = arith.negf %138 : vector<2x256xf32>
    %141 = math.exp %140 : vector<2x256xf32>
    %cst_44 = arith.constant 1.000000e+00 : f32
    %142 = vector.broadcast %cst_44 : f32 to vector<2x256xf32>
    %143 = arith.addf %142, %141 : vector<2x256xf32>
    %144 = arith.divf %142, %143 : vector<2x256xf32>
    %145 = arith.select %5, %139, %144 : vector<2x256xi1>, vector<2x256xf32>
    %146 = vector.extract_strided_slice %145 {offsets = [0, 0], sizes = [2, 64], strides = [1, 1]} : vector<2x256xf32> to vector<2x64xf32>
    %147 = vector.extract_strided_slice %145 {offsets = [0, 64], sizes = [2, 64], strides = [1, 1]} : vector<2x256xf32> to vector<2x64xf32>
    %148 = vector.extract_strided_slice %145 {offsets = [0, 128], sizes = [2, 64], strides = [1, 1]} : vector<2x256xf32> to vector<2x64xf32>
    %149 = vector.extract_strided_slice %145 {offsets = [0, 192], sizes = [2, 64], strides = [1, 1]} : vector<2x256xf32> to vector<2x64xf32>
    %150 = arith.mulf %147, %132 : vector<2x64xf32>
    %151 = arith.mulf %146, %148 : vector<2x64xf32>
    %152 = arith.addf %150, %151 : vector<2x64xf32>
    %153 = math.tanh %152 : vector<2x64xf32>
    %154 = arith.mulf %149, %153 : vector<2x64xf32>
    %c12_45 = arith.constant 12 : index
    %c0_46 = arith.constant 0 : index
    %155 = vector.load %arg14[%c12_45, %c0_46] : memref<16x64xf32, #tpu.memory_space<vmem>>, vector<2x64xf32>
    tpu.vector_store %arg14[%c12_45, %c0_46], %154 {strides = array<i32>} : memref<16x64xf32, #tpu.memory_space<vmem>>, vector<2x64xf32>,
    %c14 = arith.constant 14 : index
    %c0_47 = arith.constant 0 : index
    %156 = vector.load %arg13[%c14, %c0_47] : memref<16x256xf32, #tpu.memory_space<vmem>>, vector<2x256xf32>
    %cst_48 = arith.constant dense<0.000000e+00> : vector<2x256xf32>
    %157 = tpu.matmul %154, %13, %cst_48 {dimension_numbers = #tpu.dot_dimension_numbers<[1], [0], [0], [1], [0, 0, 1, 1], [], []>} : vector<2x64xf32>, vector<64x256xf32>, vector<2x256xf32> -> vector<2x256xf32>
    %158 = arith.addf %156, %157 : vector<2x256xf32>
    %159 = math.tanh %158 : vector<2x256xf32>
    %160 = arith.negf %158 : vector<2x256xf32>
    %161 = math.exp %160 : vector<2x256xf32>
    %cst_49 = arith.constant 1.000000e+00 : f32
    %162 = vector.broadcast %cst_49 : f32 to vector<2x256xf32>
    %163 = arith.addf %162, %161 : vector<2x256xf32>
    %164 = arith.divf %162, %163 : vector<2x256xf32>
    %165 = arith.select %5, %159, %164 : vector<2x256xi1>, vector<2x256xf32>
    %166 = vector.extract_strided_slice %165 {offsets = [0, 0], sizes = [2, 64], strides = [1, 1]} : vector<2x256xf32> to vector<2x64xf32>
    %167 = vector.extract_strided_slice %165 {offsets = [0, 64], sizes = [2, 64], strides = [1, 1]} : vector<2x256xf32> to vector<2x64xf32>
    %168 = vector.extract_strided_slice %165 {offsets = [0, 128], sizes = [2, 64], strides = [1, 1]} : vector<2x256xf32> to vector<2x64xf32>
    %169 = vector.extract_strided_slice %165 {offsets = [0, 192], sizes = [2, 64], strides = [1, 1]} : vector<2x256xf32> to vector<2x64xf32>
    %170 = arith.mulf %167, %152 : vector<2x64xf32>
    %171 = arith.mulf %166, %168 : vector<2x64xf32>
    %172 = arith.addf %170, %171 : vector<2x64xf32>
    %173 = math.tanh %172 : vector<2x64xf32>
    %174 = arith.mulf %169, %173 : vector<2x64xf32>
    %c14_50 = arith.constant 14 : index
    %c0_51 = arith.constant 0 : index
    %175 = vector.load %arg14[%c14_50, %c0_51] : memref<16x64xf32, #tpu.memory_space<vmem>>, vector<2x64xf32>
    tpu.vector_store %arg14[%c14_50, %c0_51], %174 {strides = array<i32>} : memref<16x64xf32, #tpu.memory_space<vmem>>, vector<2x64xf32>,
    %c0_52 = arith.constant 0 : index
    %c0_53 = arith.constant 0 : index
    %176 = vector.load %arg14[%c0_52, %c0_53] : memref<16x64xf32, #tpu.memory_space<vmem>>, vector<16x64xf32>
    %c0_54 = arith.constant 0 : index
    %c0_55 = arith.constant 0 : index
    %177 = vector.load %arg4[%c0_54, %c0_55] : memref<64x256xf32, #tpu.memory_space<vmem>>, vector<64x256xf32>
    %cst_56 = arith.constant dense<0.000000e+00> : vector<16x256xf32>
    %178 = tpu.matmul %176, %177, %cst_56 {dimension_numbers = #tpu.dot_dimension_numbers<[1], [0], [0], [1], [0, 0, 1, 1], [], []>} : vector<16x64xf32>, vector<64x256xf32>, vector<16x256xf32> -> vector<16x256xf32>
    %c0_57 = arith.constant 0 : index
    %c0_58 = arith.constant 0 : index
    %179 = vector.load %arg6[%c0_57, %c0_58] : memref<1x256xf32, #tpu.memory_space<vmem>>, vector<1x256xf32>
    %180 = vector.broadcast %179 : vector<1x256xf32> to vector<16x256xf32>
    %181 = arith.addf %178, %180 : vector<16x256xf32>
    %c0_59 = arith.constant 0 : index
    %c0_60 = arith.constant 0 : index
    %182 = vector.load %arg13[%c0_59, %c0_60] : memref<16x256xf32, #tpu.memory_space<vmem>>, vector<16x256xf32>
    tpu.vector_store %arg13[%c0_59, %c0_60], %181 {strides = array<i32>} : memref<16x256xf32, #tpu.memory_space<vmem>>, vector<16x256xf32>,
    %c0_61 = arith.constant 0 : index
    %c0_62 = arith.constant 0 : index
    %183 = vector.load %arg5[%c0_61, %c0_62] : memref<64x256xf32, #tpu.memory_space<vmem>>, vector<64x256xf32>
    %cst_63 = arith.constant 0.000000e+00 : f32
    %184 = vector.broadcast %cst_63 : f32 to vector<2x64xf32>
    %cst_64 = arith.constant 0.000000e+00 : f32
    %185 = vector.broadcast %cst_64 : f32 to vector<2x64xf32>
    %c0_65 = arith.constant 0 : index
    %c0_66 = arith.constant 0 : index
    %186 = vector.load %arg13[%c0_65, %c0_66] : memref<16x256xf32, #tpu.memory_space<vmem>>, vector<2x256xf32>
    %cst_67 = arith.constant dense<0.000000e+00> : vector<2x256xf32>
    %187 = tpu.matmul %184, %183, %cst_67 {dimension_numbers = #tpu.dot_dimension_numbers<[1], [0], [0], [1], [0, 0, 1, 1], [], []>} : vector<2x64xf32>, vector<64x256xf32>, vector<2x256xf32> -> vector<2x256xf32>
    %188 = arith.addf %186, %187 : vector<2x256xf32>
    %189 = math.tanh %188 : vector<2x256xf32>
    %190 = arith.negf %188 : vector<2x256xf32>
    %191 = math.exp %190 : vector<2x256xf32>
    %cst_68 = arith.constant 1.000000e+00 : f32
    %192 = vector.broadcast %cst_68 : f32 to vector<2x256xf32>
    %193 = arith.addf %192, %191 : vector<2x256xf32>
    %194 = arith.divf %192, %193 : vector<2x256xf32>
    %195 = arith.select %5, %189, %194 : vector<2x256xi1>, vector<2x256xf32>
    %196 = vector.extract_strided_slice %195 {offsets = [0, 0], sizes = [2, 64], strides = [1, 1]} : vector<2x256xf32> to vector<2x64xf32>
    %197 = vector.extract_strided_slice %195 {offsets = [0, 64], sizes = [2, 64], strides = [1, 1]} : vector<2x256xf32> to vector<2x64xf32>
    %198 = vector.extract_strided_slice %195 {offsets = [0, 128], sizes = [2, 64], strides = [1, 1]} : vector<2x256xf32> to vector<2x64xf32>
    %199 = vector.extract_strided_slice %195 {offsets = [0, 192], sizes = [2, 64], strides = [1, 1]} : vector<2x256xf32> to vector<2x64xf32>
    %200 = arith.mulf %197, %185 : vector<2x64xf32>
    %201 = arith.mulf %196, %198 : vector<2x64xf32>
    %202 = arith.addf %200, %201 : vector<2x64xf32>
    %203 = math.tanh %202 : vector<2x64xf32>
    %204 = arith.mulf %199, %203 : vector<2x64xf32>
    %c0_69 = arith.constant 0 : index
    %c0_70 = arith.constant 0 : index
    %205 = vector.load %arg14[%c0_69, %c0_70] : memref<16x64xf32, #tpu.memory_space<vmem>>, vector<2x64xf32>
    tpu.vector_store %arg14[%c0_69, %c0_70], %204 {strides = array<i32>} : memref<16x64xf32, #tpu.memory_space<vmem>>, vector<2x64xf32>,
    %c2_71 = arith.constant 2 : index
    %c0_72 = arith.constant 0 : index
    %206 = vector.load %arg13[%c2_71, %c0_72] : memref<16x256xf32, #tpu.memory_space<vmem>>, vector<2x256xf32>
    %cst_73 = arith.constant dense<0.000000e+00> : vector<2x256xf32>
    %207 = tpu.matmul %204, %183, %cst_73 {dimension_numbers = #tpu.dot_dimension_numbers<[1], [0], [0], [1], [0, 0, 1, 1], [], []>} : vector<2x64xf32>, vector<64x256xf32>, vector<2x256xf32> -> vector<2x256xf32>
    %208 = arith.addf %206, %207 : vector<2x256xf32>
    %209 = math.tanh %208 : vector<2x256xf32>
    %210 = arith.negf %208 : vector<2x256xf32>
    %211 = math.exp %210 : vector<2x256xf32>
    %cst_74 = arith.constant 1.000000e+00 : f32
    %212 = vector.broadcast %cst_74 : f32 to vector<2x256xf32>
    %213 = arith.addf %212, %211 : vector<2x256xf32>
    %214 = arith.divf %212, %213 : vector<2x256xf32>
    %215 = arith.select %5, %209, %214 : vector<2x256xi1>, vector<2x256xf32>
    %216 = vector.extract_strided_slice %215 {offsets = [0, 0], sizes = [2, 64], strides = [1, 1]} : vector<2x256xf32> to vector<2x64xf32>
    %217 = vector.extract_strided_slice %215 {offsets = [0, 64], sizes = [2, 64], strides = [1, 1]} : vector<2x256xf32> to vector<2x64xf32>
    %218 = vector.extract_strided_slice %215 {offsets = [0, 128], sizes = [2, 64], strides = [1, 1]} : vector<2x256xf32> to vector<2x64xf32>
    %219 = vector.extract_strided_slice %215 {offsets = [0, 192], sizes = [2, 64], strides = [1, 1]} : vector<2x256xf32> to vector<2x64xf32>
    %220 = arith.mulf %217, %202 : vector<2x64xf32>
    %221 = arith.mulf %216, %218 : vector<2x64xf32>
    %222 = arith.addf %220, %221 : vector<2x64xf32>
    %223 = math.tanh %222 : vector<2x64xf32>
    %224 = arith.mulf %219, %223 : vector<2x64xf32>
    %c2_75 = arith.constant 2 : index
    %c0_76 = arith.constant 0 : index
    %225 = vector.load %arg14[%c2_75, %c0_76] : memref<16x64xf32, #tpu.memory_space<vmem>>, vector<2x64xf32>
    tpu.vector_store %arg14[%c2_75, %c0_76], %224 {strides = array<i32>} : memref<16x64xf32, #tpu.memory_space<vmem>>, vector<2x64xf32>,
    %c4_77 = arith.constant 4 : index
    %c0_78 = arith.constant 0 : index
    %226 = vector.load %arg13[%c4_77, %c0_78] : memref<16x256xf32, #tpu.memory_space<vmem>>, vector<2x256xf32>
    %cst_79 = arith.constant dense<0.000000e+00> : vector<2x256xf32>
    %227 = tpu.matmul %224, %183, %cst_79 {dimension_numbers = #tpu.dot_dimension_numbers<[1], [0], [0], [1], [0, 0, 1, 1], [], []>} : vector<2x64xf32>, vector<64x256xf32>, vector<2x256xf32> -> vector<2x256xf32>
    %228 = arith.addf %226, %227 : vector<2x256xf32>
    %229 = math.tanh %228 : vector<2x256xf32>
    %230 = arith.negf %228 : vector<2x256xf32>
    %231 = math.exp %230 : vector<2x256xf32>
    %cst_80 = arith.constant 1.000000e+00 : f32
    %232 = vector.broadcast %cst_80 : f32 to vector<2x256xf32>
    %233 = arith.addf %232, %231 : vector<2x256xf32>
    %234 = arith.divf %232, %233 : vector<2x256xf32>
    %235 = arith.select %5, %229, %234 : vector<2x256xi1>, vector<2x256xf32>
    %236 = vector.extract_strided_slice %235 {offsets = [0, 0], sizes = [2, 64], strides = [1, 1]} : vector<2x256xf32> to vector<2x64xf32>
    %237 = vector.extract_strided_slice %235 {offsets = [0, 64], sizes = [2, 64], strides = [1, 1]} : vector<2x256xf32> to vector<2x64xf32>
    %238 = vector.extract_strided_slice %235 {offsets = [0, 128], sizes = [2, 64], strides = [1, 1]} : vector<2x256xf32> to vector<2x64xf32>
    %239 = vector.extract_strided_slice %235 {offsets = [0, 192], sizes = [2, 64], strides = [1, 1]} : vector<2x256xf32> to vector<2x64xf32>
    %240 = arith.mulf %237, %222 : vector<2x64xf32>
    %241 = arith.mulf %236, %238 : vector<2x64xf32>
    %242 = arith.addf %240, %241 : vector<2x64xf32>
    %243 = math.tanh %242 : vector<2x64xf32>
    %244 = arith.mulf %239, %243 : vector<2x64xf32>
    %c4_81 = arith.constant 4 : index
    %c0_82 = arith.constant 0 : index
    %245 = vector.load %arg14[%c4_81, %c0_82] : memref<16x64xf32, #tpu.memory_space<vmem>>, vector<2x64xf32>
    tpu.vector_store %arg14[%c4_81, %c0_82], %244 {strides = array<i32>} : memref<16x64xf32, #tpu.memory_space<vmem>>, vector<2x64xf32>,
    %c6_83 = arith.constant 6 : index
    %c0_84 = arith.constant 0 : index
    %246 = vector.load %arg13[%c6_83, %c0_84] : memref<16x256xf32, #tpu.memory_space<vmem>>, vector<2x256xf32>
    %cst_85 = arith.constant dense<0.000000e+00> : vector<2x256xf32>
    %247 = tpu.matmul %244, %183, %cst_85 {dimension_numbers = #tpu.dot_dimension_numbers<[1], [0], [0], [1], [0, 0, 1, 1], [], []>} : vector<2x64xf32>, vector<64x256xf32>, vector<2x256xf32> -> vector<2x256xf32>
    %248 = arith.addf %246, %247 : vector<2x256xf32>
    %249 = math.tanh %248 : vector<2x256xf32>
    %250 = arith.negf %248 : vector<2x256xf32>
    %251 = math.exp %250 : vector<2x256xf32>
    %cst_86 = arith.constant 1.000000e+00 : f32
    %252 = vector.broadcast %cst_86 : f32 to vector<2x256xf32>
    %253 = arith.addf %252, %251 : vector<2x256xf32>
    %254 = arith.divf %252, %253 : vector<2x256xf32>
    %255 = arith.select %5, %249, %254 : vector<2x256xi1>, vector<2x256xf32>
    %256 = vector.extract_strided_slice %255 {offsets = [0, 0], sizes = [2, 64], strides = [1, 1]} : vector<2x256xf32> to vector<2x64xf32>
    %257 = vector.extract_strided_slice %255 {offsets = [0, 64], sizes = [2, 64], strides = [1, 1]} : vector<2x256xf32> to vector<2x64xf32>
    %258 = vector.extract_strided_slice %255 {offsets = [0, 128], sizes = [2, 64], strides = [1, 1]} : vector<2x256xf32> to vector<2x64xf32>
    %259 = vector.extract_strided_slice %255 {offsets = [0, 192], sizes = [2, 64], strides = [1, 1]} : vector<2x256xf32> to vector<2x64xf32>
    %260 = arith.mulf %257, %242 : vector<2x64xf32>
    %261 = arith.mulf %256, %258 : vector<2x64xf32>
    %262 = arith.addf %260, %261 : vector<2x64xf32>
    %263 = math.tanh %262 : vector<2x64xf32>
    %264 = arith.mulf %259, %263 : vector<2x64xf32>
    %c6_87 = arith.constant 6 : index
    %c0_88 = arith.constant 0 : index
    %265 = vector.load %arg14[%c6_87, %c0_88] : memref<16x64xf32, #tpu.memory_space<vmem>>, vector<2x64xf32>
    tpu.vector_store %arg14[%c6_87, %c0_88], %264 {strides = array<i32>} : memref<16x64xf32, #tpu.memory_space<vmem>>, vector<2x64xf32>,
    %c8_89 = arith.constant 8 : index
    %c0_90 = arith.constant 0 : index
    %266 = vector.load %arg13[%c8_89, %c0_90] : memref<16x256xf32, #tpu.memory_space<vmem>>, vector<2x256xf32>
    %cst_91 = arith.constant dense<0.000000e+00> : vector<2x256xf32>
    %267 = tpu.matmul %264, %183, %cst_91 {dimension_numbers = #tpu.dot_dimension_numbers<[1], [0], [0], [1], [0, 0, 1, 1], [], []>} : vector<2x64xf32>, vector<64x256xf32>, vector<2x256xf32> -> vector<2x256xf32>
    %268 = arith.addf %266, %267 : vector<2x256xf32>
    %269 = math.tanh %268 : vector<2x256xf32>
    %270 = arith.negf %268 : vector<2x256xf32>
    %271 = math.exp %270 : vector<2x256xf32>
    %cst_92 = arith.constant 1.000000e+00 : f32
    %272 = vector.broadcast %cst_92 : f32 to vector<2x256xf32>
    %273 = arith.addf %272, %271 : vector<2x256xf32>
    %274 = arith.divf %272, %273 : vector<2x256xf32>
    %275 = arith.select %5, %269, %274 : vector<2x256xi1>, vector<2x256xf32>
    %276 = vector.extract_strided_slice %275 {offsets = [0, 0], sizes = [2, 64], strides = [1, 1]} : vector<2x256xf32> to vector<2x64xf32>
    %277 = vector.extract_strided_slice %275 {offsets = [0, 64], sizes = [2, 64], strides = [1, 1]} : vector<2x256xf32> to vector<2x64xf32>
    %278 = vector.extract_strided_slice %275 {offsets = [0, 128], sizes = [2, 64], strides = [1, 1]} : vector<2x256xf32> to vector<2x64xf32>
    %279 = vector.extract_strided_slice %275 {offsets = [0, 192], sizes = [2, 64], strides = [1, 1]} : vector<2x256xf32> to vector<2x64xf32>
    %280 = arith.mulf %277, %262 : vector<2x64xf32>
    %281 = arith.mulf %276, %278 : vector<2x64xf32>
    %282 = arith.addf %280, %281 : vector<2x64xf32>
    %283 = math.tanh %282 : vector<2x64xf32>
    %284 = arith.mulf %279, %283 : vector<2x64xf32>
    %c8_93 = arith.constant 8 : index
    %c0_94 = arith.constant 0 : index
    %285 = vector.load %arg14[%c8_93, %c0_94] : memref<16x64xf32, #tpu.memory_space<vmem>>, vector<2x64xf32>
    tpu.vector_store %arg14[%c8_93, %c0_94], %284 {strides = array<i32>} : memref<16x64xf32, #tpu.memory_space<vmem>>, vector<2x64xf32>,
    %c10_95 = arith.constant 10 : index
    %c0_96 = arith.constant 0 : index
    %286 = vector.load %arg13[%c10_95, %c0_96] : memref<16x256xf32, #tpu.memory_space<vmem>>, vector<2x256xf32>
    %cst_97 = arith.constant dense<0.000000e+00> : vector<2x256xf32>
    %287 = tpu.matmul %284, %183, %cst_97 {dimension_numbers = #tpu.dot_dimension_numbers<[1], [0], [0], [1], [0, 0, 1, 1], [], []>} : vector<2x64xf32>, vector<64x256xf32>, vector<2x256xf32> -> vector<2x256xf32>
    %288 = arith.addf %286, %287 : vector<2x256xf32>
    %289 = math.tanh %288 : vector<2x256xf32>
    %290 = arith.negf %288 : vector<2x256xf32>
    %291 = math.exp %290 : vector<2x256xf32>
    %cst_98 = arith.constant 1.000000e+00 : f32
    %292 = vector.broadcast %cst_98 : f32 to vector<2x256xf32>
    %293 = arith.addf %292, %291 : vector<2x256xf32>
    %294 = arith.divf %292, %293 : vector<2x256xf32>
    %295 = arith.select %5, %289, %294 : vector<2x256xi1>, vector<2x256xf32>
    %296 = vector.extract_strided_slice %295 {offsets = [0, 0], sizes = [2, 64], strides = [1, 1]} : vector<2x256xf32> to vector<2x64xf32>
    %297 = vector.extract_strided_slice %295 {offsets = [0, 64], sizes = [2, 64], strides = [1, 1]} : vector<2x256xf32> to vector<2x64xf32>
    %298 = vector.extract_strided_slice %295 {offsets = [0, 128], sizes = [2, 64], strides = [1, 1]} : vector<2x256xf32> to vector<2x64xf32>
    %299 = vector.extract_strided_slice %295 {offsets = [0, 192], sizes = [2, 64], strides = [1, 1]} : vector<2x256xf32> to vector<2x64xf32>
    %300 = arith.mulf %297, %282 : vector<2x64xf32>
    %301 = arith.mulf %296, %298 : vector<2x64xf32>
    %302 = arith.addf %300, %301 : vector<2x64xf32>
    %303 = math.tanh %302 : vector<2x64xf32>
    %304 = arith.mulf %299, %303 : vector<2x64xf32>
    %c10_99 = arith.constant 10 : index
    %c0_100 = arith.constant 0 : index
    %305 = vector.load %arg14[%c10_99, %c0_100] : memref<16x64xf32, #tpu.memory_space<vmem>>, vector<2x64xf32>
    tpu.vector_store %arg14[%c10_99, %c0_100], %304 {strides = array<i32>} : memref<16x64xf32, #tpu.memory_space<vmem>>, vector<2x64xf32>,
    %c12_101 = arith.constant 12 : index
    %c0_102 = arith.constant 0 : index
    %306 = vector.load %arg13[%c12_101, %c0_102] : memref<16x256xf32, #tpu.memory_space<vmem>>, vector<2x256xf32>
    %cst_103 = arith.constant dense<0.000000e+00> : vector<2x256xf32>
    %307 = tpu.matmul %304, %183, %cst_103 {dimension_numbers = #tpu.dot_dimension_numbers<[1], [0], [0], [1], [0, 0, 1, 1], [], []>} : vector<2x64xf32>, vector<64x256xf32>, vector<2x256xf32> -> vector<2x256xf32>
    %308 = arith.addf %306, %307 : vector<2x256xf32>
    %309 = math.tanh %308 : vector<2x256xf32>
    %310 = arith.negf %308 : vector<2x256xf32>
    %311 = math.exp %310 : vector<2x256xf32>
    %cst_104 = arith.constant 1.000000e+00 : f32
    %312 = vector.broadcast %cst_104 : f32 to vector<2x256xf32>
    %313 = arith.addf %312, %311 : vector<2x256xf32>
    %314 = arith.divf %312, %313 : vector<2x256xf32>
    %315 = arith.select %5, %309, %314 : vector<2x256xi1>, vector<2x256xf32>
    %316 = vector.extract_strided_slice %315 {offsets = [0, 0], sizes = [2, 64], strides = [1, 1]} : vector<2x256xf32> to vector<2x64xf32>
    %317 = vector.extract_strided_slice %315 {offsets = [0, 64], sizes = [2, 64], strides = [1, 1]} : vector<2x256xf32> to vector<2x64xf32>
    %318 = vector.extract_strided_slice %315 {offsets = [0, 128], sizes = [2, 64], strides = [1, 1]} : vector<2x256xf32> to vector<2x64xf32>
    %319 = vector.extract_strided_slice %315 {offsets = [0, 192], sizes = [2, 64], strides = [1, 1]} : vector<2x256xf32> to vector<2x64xf32>
    %320 = arith.mulf %317, %302 : vector<2x64xf32>
    %321 = arith.mulf %316, %318 : vector<2x64xf32>
    %322 = arith.addf %320, %321 : vector<2x64xf32>
    %323 = math.tanh %322 : vector<2x64xf32>
    %324 = arith.mulf %319, %323 : vector<2x64xf32>
    %c12_105 = arith.constant 12 : index
    %c0_106 = arith.constant 0 : index
    %325 = vector.load %arg14[%c12_105, %c0_106] : memref<16x64xf32, #tpu.memory_space<vmem>>, vector<2x64xf32>
    tpu.vector_store %arg14[%c12_105, %c0_106], %324 {strides = array<i32>} : memref<16x64xf32, #tpu.memory_space<vmem>>, vector<2x64xf32>,
    %c14_107 = arith.constant 14 : index
    %c0_108 = arith.constant 0 : index
    %326 = vector.load %arg13[%c14_107, %c0_108] : memref<16x256xf32, #tpu.memory_space<vmem>>, vector<2x256xf32>
    %cst_109 = arith.constant dense<0.000000e+00> : vector<2x256xf32>
    %327 = tpu.matmul %324, %183, %cst_109 {dimension_numbers = #tpu.dot_dimension_numbers<[1], [0], [0], [1], [0, 0, 1, 1], [], []>} : vector<2x64xf32>, vector<64x256xf32>, vector<2x256xf32> -> vector<2x256xf32>
    %328 = arith.addf %326, %327 : vector<2x256xf32>
    %329 = math.tanh %328 : vector<2x256xf32>
    %330 = arith.negf %328 : vector<2x256xf32>
    %331 = math.exp %330 : vector<2x256xf32>
    %cst_110 = arith.constant 1.000000e+00 : f32
    %332 = vector.broadcast %cst_110 : f32 to vector<2x256xf32>
    %333 = arith.addf %332, %331 : vector<2x256xf32>
    %334 = arith.divf %332, %333 : vector<2x256xf32>
    %335 = arith.select %5, %329, %334 : vector<2x256xi1>, vector<2x256xf32>
    %336 = vector.extract_strided_slice %335 {offsets = [0, 0], sizes = [2, 64], strides = [1, 1]} : vector<2x256xf32> to vector<2x64xf32>
    %337 = vector.extract_strided_slice %335 {offsets = [0, 64], sizes = [2, 64], strides = [1, 1]} : vector<2x256xf32> to vector<2x64xf32>
    %338 = vector.extract_strided_slice %335 {offsets = [0, 128], sizes = [2, 64], strides = [1, 1]} : vector<2x256xf32> to vector<2x64xf32>
    %339 = vector.extract_strided_slice %335 {offsets = [0, 192], sizes = [2, 64], strides = [1, 1]} : vector<2x256xf32> to vector<2x64xf32>
    %340 = arith.mulf %337, %322 : vector<2x64xf32>
    %341 = arith.mulf %336, %338 : vector<2x64xf32>
    %342 = arith.addf %340, %341 : vector<2x64xf32>
    %343 = math.tanh %342 : vector<2x64xf32>
    %344 = arith.mulf %339, %343 : vector<2x64xf32>
    %c14_111 = arith.constant 14 : index
    %c0_112 = arith.constant 0 : index
    %345 = vector.load %arg14[%c14_111, %c0_112] : memref<16x64xf32, #tpu.memory_space<vmem>>, vector<2x64xf32>
    tpu.vector_store %arg14[%c14_111, %c0_112], %344 {strides = array<i32>} : memref<16x64xf32, #tpu.memory_space<vmem>>, vector<2x64xf32>,
    %c0_113 = arith.constant 0 : index
    %c0_114 = arith.constant 0 : index
    %346 = vector.load %arg14[%c0_113, %c0_114] : memref<16x64xf32, #tpu.memory_space<vmem>>, vector<16x64xf32>
    %c0_115 = arith.constant 0 : index
    %c0_116 = arith.constant 0 : index
    %347 = vector.load %arg7[%c0_115, %c0_116] : memref<64x256xf32, #tpu.memory_space<vmem>>, vector<64x256xf32>
    %cst_117 = arith.constant dense<0.000000e+00> : vector<16x256xf32>
    %348 = tpu.matmul %346, %347, %cst_117 {dimension_numbers = #tpu.dot_dimension_numbers<[1], [0], [0], [1], [0, 0, 1, 1], [], []>} : vector<16x64xf32>, vector<64x256xf32>, vector<16x256xf32> -> vector<16x256xf32>
    %c0_118 = arith.constant 0 : index
    %c0_119 = arith.constant 0 : index
    %349 = vector.load %arg9[%c0_118, %c0_119] : memref<1x256xf32, #tpu.memory_space<vmem>>, vector<1x256xf32>
    %350 = vector.broadcast %349 : vector<1x256xf32> to vector<16x256xf32>
    %351 = arith.addf %348, %350 : vector<16x256xf32>
    %c0_120 = arith.constant 0 : index
    %c0_121 = arith.constant 0 : index
    %352 = vector.load %arg13[%c0_120, %c0_121] : memref<16x256xf32, #tpu.memory_space<vmem>>, vector<16x256xf32>
    tpu.vector_store %arg13[%c0_120, %c0_121], %351 {strides = array<i32>} : memref<16x256xf32, #tpu.memory_space<vmem>>, vector<16x256xf32>,
    %c0_122 = arith.constant 0 : index
    %c0_123 = arith.constant 0 : index
    %353 = vector.load %arg8[%c0_122, %c0_123] : memref<64x256xf32, #tpu.memory_space<vmem>>, vector<64x256xf32>
    %cst_124 = arith.constant 0.000000e+00 : f32
    %354 = vector.broadcast %cst_124 : f32 to vector<2x64xf32>
    %cst_125 = arith.constant 0.000000e+00 : f32
    %355 = vector.broadcast %cst_125 : f32 to vector<2x64xf32>
    %c0_126 = arith.constant 0 : index
    %c0_127 = arith.constant 0 : index
    %356 = vector.load %arg13[%c0_126, %c0_127] : memref<16x256xf32, #tpu.memory_space<vmem>>, vector<2x256xf32>
    %cst_128 = arith.constant dense<0.000000e+00> : vector<2x256xf32>
    %357 = tpu.matmul %354, %353, %cst_128 {dimension_numbers = #tpu.dot_dimension_numbers<[1], [0], [0], [1], [0, 0, 1, 1], [], []>} : vector<2x64xf32>, vector<64x256xf32>, vector<2x256xf32> -> vector<2x256xf32>
    %358 = arith.addf %356, %357 : vector<2x256xf32>
    %359 = math.tanh %358 : vector<2x256xf32>
    %360 = arith.negf %358 : vector<2x256xf32>
    %361 = math.exp %360 : vector<2x256xf32>
    %cst_129 = arith.constant 1.000000e+00 : f32
    %362 = vector.broadcast %cst_129 : f32 to vector<2x256xf32>
    %363 = arith.addf %362, %361 : vector<2x256xf32>
    %364 = arith.divf %362, %363 : vector<2x256xf32>
    %365 = arith.select %5, %359, %364 : vector<2x256xi1>, vector<2x256xf32>
    %366 = vector.extract_strided_slice %365 {offsets = [0, 0], sizes = [2, 64], strides = [1, 1]} : vector<2x256xf32> to vector<2x64xf32>
    %367 = vector.extract_strided_slice %365 {offsets = [0, 64], sizes = [2, 64], strides = [1, 1]} : vector<2x256xf32> to vector<2x64xf32>
    %368 = vector.extract_strided_slice %365 {offsets = [0, 128], sizes = [2, 64], strides = [1, 1]} : vector<2x256xf32> to vector<2x64xf32>
    %369 = vector.extract_strided_slice %365 {offsets = [0, 192], sizes = [2, 64], strides = [1, 1]} : vector<2x256xf32> to vector<2x64xf32>
    %370 = arith.mulf %367, %355 : vector<2x64xf32>
    %371 = arith.mulf %366, %368 : vector<2x64xf32>
    %372 = arith.addf %370, %371 : vector<2x64xf32>
    %373 = math.tanh %372 : vector<2x64xf32>
    %374 = arith.mulf %369, %373 : vector<2x64xf32>
    %c0_130 = arith.constant 0 : index
    %c0_131 = arith.constant 0 : index
    %375 = vector.load %arg14[%c0_130, %c0_131] : memref<16x64xf32, #tpu.memory_space<vmem>>, vector<2x64xf32>
    tpu.vector_store %arg14[%c0_130, %c0_131], %374 {strides = array<i32>} : memref<16x64xf32, #tpu.memory_space<vmem>>, vector<2x64xf32>,
    %c2_132 = arith.constant 2 : index
    %c0_133 = arith.constant 0 : index
    %376 = vector.load %arg13[%c2_132, %c0_133] : memref<16x256xf32, #tpu.memory_space<vmem>>, vector<2x256xf32>
    %cst_134 = arith.constant dense<0.000000e+00> : vector<2x256xf32>
    %377 = tpu.matmul %374, %353, %cst_134 {dimension_numbers = #tpu.dot_dimension_numbers<[1], [0], [0], [1], [0, 0, 1, 1], [], []>} : vector<2x64xf32>, vector<64x256xf32>, vector<2x256xf32> -> vector<2x256xf32>
    %378 = arith.addf %376, %377 : vector<2x256xf32>
    %379 = math.tanh %378 : vector<2x256xf32>
    %380 = arith.negf %378 : vector<2x256xf32>
    %381 = math.exp %380 : vector<2x256xf32>
    %cst_135 = arith.constant 1.000000e+00 : f32
    %382 = vector.broadcast %cst_135 : f32 to vector<2x256xf32>
    %383 = arith.addf %382, %381 : vector<2x256xf32>
    %384 = arith.divf %382, %383 : vector<2x256xf32>
    %385 = arith.select %5, %379, %384 : vector<2x256xi1>, vector<2x256xf32>
    %386 = vector.extract_strided_slice %385 {offsets = [0, 0], sizes = [2, 64], strides = [1, 1]} : vector<2x256xf32> to vector<2x64xf32>
    %387 = vector.extract_strided_slice %385 {offsets = [0, 64], sizes = [2, 64], strides = [1, 1]} : vector<2x256xf32> to vector<2x64xf32>
    %388 = vector.extract_strided_slice %385 {offsets = [0, 128], sizes = [2, 64], strides = [1, 1]} : vector<2x256xf32> to vector<2x64xf32>
    %389 = vector.extract_strided_slice %385 {offsets = [0, 192], sizes = [2, 64], strides = [1, 1]} : vector<2x256xf32> to vector<2x64xf32>
    %390 = arith.mulf %387, %372 : vector<2x64xf32>
    %391 = arith.mulf %386, %388 : vector<2x64xf32>
    %392 = arith.addf %390, %391 : vector<2x64xf32>
    %393 = math.tanh %392 : vector<2x64xf32>
    %394 = arith.mulf %389, %393 : vector<2x64xf32>
    %c2_136 = arith.constant 2 : index
    %c0_137 = arith.constant 0 : index
    %395 = vector.load %arg14[%c2_136, %c0_137] : memref<16x64xf32, #tpu.memory_space<vmem>>, vector<2x64xf32>
    tpu.vector_store %arg14[%c2_136, %c0_137], %394 {strides = array<i32>} : memref<16x64xf32, #tpu.memory_space<vmem>>, vector<2x64xf32>,
    %c4_138 = arith.constant 4 : index
    %c0_139 = arith.constant 0 : index
    %396 = vector.load %arg13[%c4_138, %c0_139] : memref<16x256xf32, #tpu.memory_space<vmem>>, vector<2x256xf32>
    %cst_140 = arith.constant dense<0.000000e+00> : vector<2x256xf32>
    %397 = tpu.matmul %394, %353, %cst_140 {dimension_numbers = #tpu.dot_dimension_numbers<[1], [0], [0], [1], [0, 0, 1, 1], [], []>} : vector<2x64xf32>, vector<64x256xf32>, vector<2x256xf32> -> vector<2x256xf32>
    %398 = arith.addf %396, %397 : vector<2x256xf32>
    %399 = math.tanh %398 : vector<2x256xf32>
    %400 = arith.negf %398 : vector<2x256xf32>
    %401 = math.exp %400 : vector<2x256xf32>
    %cst_141 = arith.constant 1.000000e+00 : f32
    %402 = vector.broadcast %cst_141 : f32 to vector<2x256xf32>
    %403 = arith.addf %402, %401 : vector<2x256xf32>
    %404 = arith.divf %402, %403 : vector<2x256xf32>
    %405 = arith.select %5, %399, %404 : vector<2x256xi1>, vector<2x256xf32>
    %406 = vector.extract_strided_slice %405 {offsets = [0, 0], sizes = [2, 64], strides = [1, 1]} : vector<2x256xf32> to vector<2x64xf32>
    %407 = vector.extract_strided_slice %405 {offsets = [0, 64], sizes = [2, 64], strides = [1, 1]} : vector<2x256xf32> to vector<2x64xf32>
    %408 = vector.extract_strided_slice %405 {offsets = [0, 128], sizes = [2, 64], strides = [1, 1]} : vector<2x256xf32> to vector<2x64xf32>
    %409 = vector.extract_strided_slice %405 {offsets = [0, 192], sizes = [2, 64], strides = [1, 1]} : vector<2x256xf32> to vector<2x64xf32>
    %410 = arith.mulf %407, %392 : vector<2x64xf32>
    %411 = arith.mulf %406, %408 : vector<2x64xf32>
    %412 = arith.addf %410, %411 : vector<2x64xf32>
    %413 = math.tanh %412 : vector<2x64xf32>
    %414 = arith.mulf %409, %413 : vector<2x64xf32>
    %c4_142 = arith.constant 4 : index
    %c0_143 = arith.constant 0 : index
    %415 = vector.load %arg14[%c4_142, %c0_143] : memref<16x64xf32, #tpu.memory_space<vmem>>, vector<2x64xf32>
    tpu.vector_store %arg14[%c4_142, %c0_143], %414 {strides = array<i32>} : memref<16x64xf32, #tpu.memory_space<vmem>>, vector<2x64xf32>,
    %c6_144 = arith.constant 6 : index
    %c0_145 = arith.constant 0 : index
    %416 = vector.load %arg13[%c6_144, %c0_145] : memref<16x256xf32, #tpu.memory_space<vmem>>, vector<2x256xf32>
    %cst_146 = arith.constant dense<0.000000e+00> : vector<2x256xf32>
    %417 = tpu.matmul %414, %353, %cst_146 {dimension_numbers = #tpu.dot_dimension_numbers<[1], [0], [0], [1], [0, 0, 1, 1], [], []>} : vector<2x64xf32>, vector<64x256xf32>, vector<2x256xf32> -> vector<2x256xf32>
    %418 = arith.addf %416, %417 : vector<2x256xf32>
    %419 = math.tanh %418 : vector<2x256xf32>
    %420 = arith.negf %418 : vector<2x256xf32>
    %421 = math.exp %420 : vector<2x256xf32>
    %cst_147 = arith.constant 1.000000e+00 : f32
    %422 = vector.broadcast %cst_147 : f32 to vector<2x256xf32>
    %423 = arith.addf %422, %421 : vector<2x256xf32>
    %424 = arith.divf %422, %423 : vector<2x256xf32>
    %425 = arith.select %5, %419, %424 : vector<2x256xi1>, vector<2x256xf32>
    %426 = vector.extract_strided_slice %425 {offsets = [0, 0], sizes = [2, 64], strides = [1, 1]} : vector<2x256xf32> to vector<2x64xf32>
    %427 = vector.extract_strided_slice %425 {offsets = [0, 64], sizes = [2, 64], strides = [1, 1]} : vector<2x256xf32> to vector<2x64xf32>
    %428 = vector.extract_strided_slice %425 {offsets = [0, 128], sizes = [2, 64], strides = [1, 1]} : vector<2x256xf32> to vector<2x64xf32>
    %429 = vector.extract_strided_slice %425 {offsets = [0, 192], sizes = [2, 64], strides = [1, 1]} : vector<2x256xf32> to vector<2x64xf32>
    %430 = arith.mulf %427, %412 : vector<2x64xf32>
    %431 = arith.mulf %426, %428 : vector<2x64xf32>
    %432 = arith.addf %430, %431 : vector<2x64xf32>
    %433 = math.tanh %432 : vector<2x64xf32>
    %434 = arith.mulf %429, %433 : vector<2x64xf32>
    %c6_148 = arith.constant 6 : index
    %c0_149 = arith.constant 0 : index
    %435 = vector.load %arg14[%c6_148, %c0_149] : memref<16x64xf32, #tpu.memory_space<vmem>>, vector<2x64xf32>
    tpu.vector_store %arg14[%c6_148, %c0_149], %434 {strides = array<i32>} : memref<16x64xf32, #tpu.memory_space<vmem>>, vector<2x64xf32>,
    %c8_150 = arith.constant 8 : index
    %c0_151 = arith.constant 0 : index
    %436 = vector.load %arg13[%c8_150, %c0_151] : memref<16x256xf32, #tpu.memory_space<vmem>>, vector<2x256xf32>
    %cst_152 = arith.constant dense<0.000000e+00> : vector<2x256xf32>
    %437 = tpu.matmul %434, %353, %cst_152 {dimension_numbers = #tpu.dot_dimension_numbers<[1], [0], [0], [1], [0, 0, 1, 1], [], []>} : vector<2x64xf32>, vector<64x256xf32>, vector<2x256xf32> -> vector<2x256xf32>
    %438 = arith.addf %436, %437 : vector<2x256xf32>
    %439 = math.tanh %438 : vector<2x256xf32>
    %440 = arith.negf %438 : vector<2x256xf32>
    %441 = math.exp %440 : vector<2x256xf32>
    %cst_153 = arith.constant 1.000000e+00 : f32
    %442 = vector.broadcast %cst_153 : f32 to vector<2x256xf32>
    %443 = arith.addf %442, %441 : vector<2x256xf32>
    %444 = arith.divf %442, %443 : vector<2x256xf32>
    %445 = arith.select %5, %439, %444 : vector<2x256xi1>, vector<2x256xf32>
    %446 = vector.extract_strided_slice %445 {offsets = [0, 0], sizes = [2, 64], strides = [1, 1]} : vector<2x256xf32> to vector<2x64xf32>
    %447 = vector.extract_strided_slice %445 {offsets = [0, 64], sizes = [2, 64], strides = [1, 1]} : vector<2x256xf32> to vector<2x64xf32>
    %448 = vector.extract_strided_slice %445 {offsets = [0, 128], sizes = [2, 64], strides = [1, 1]} : vector<2x256xf32> to vector<2x64xf32>
    %449 = vector.extract_strided_slice %445 {offsets = [0, 192], sizes = [2, 64], strides = [1, 1]} : vector<2x256xf32> to vector<2x64xf32>
    %450 = arith.mulf %447, %432 : vector<2x64xf32>
    %451 = arith.mulf %446, %448 : vector<2x64xf32>
    %452 = arith.addf %450, %451 : vector<2x64xf32>
    %453 = math.tanh %452 : vector<2x64xf32>
    %454 = arith.mulf %449, %453 : vector<2x64xf32>
    %c8_154 = arith.constant 8 : index
    %c0_155 = arith.constant 0 : index
    %455 = vector.load %arg14[%c8_154, %c0_155] : memref<16x64xf32, #tpu.memory_space<vmem>>, vector<2x64xf32>
    tpu.vector_store %arg14[%c8_154, %c0_155], %454 {strides = array<i32>} : memref<16x64xf32, #tpu.memory_space<vmem>>, vector<2x64xf32>,
    %c10_156 = arith.constant 10 : index
    %c0_157 = arith.constant 0 : index
    %456 = vector.load %arg13[%c10_156, %c0_157] : memref<16x256xf32, #tpu.memory_space<vmem>>, vector<2x256xf32>
    %cst_158 = arith.constant dense<0.000000e+00> : vector<2x256xf32>
    %457 = tpu.matmul %454, %353, %cst_158 {dimension_numbers = #tpu.dot_dimension_numbers<[1], [0], [0], [1], [0, 0, 1, 1], [], []>} : vector<2x64xf32>, vector<64x256xf32>, vector<2x256xf32> -> vector<2x256xf32>
    %458 = arith.addf %456, %457 : vector<2x256xf32>
    %459 = math.tanh %458 : vector<2x256xf32>
    %460 = arith.negf %458 : vector<2x256xf32>
    %461 = math.exp %460 : vector<2x256xf32>
    %cst_159 = arith.constant 1.000000e+00 : f32
    %462 = vector.broadcast %cst_159 : f32 to vector<2x256xf32>
    %463 = arith.addf %462, %461 : vector<2x256xf32>
    %464 = arith.divf %462, %463 : vector<2x256xf32>
    %465 = arith.select %5, %459, %464 : vector<2x256xi1>, vector<2x256xf32>
    %466 = vector.extract_strided_slice %465 {offsets = [0, 0], sizes = [2, 64], strides = [1, 1]} : vector<2x256xf32> to vector<2x64xf32>
    %467 = vector.extract_strided_slice %465 {offsets = [0, 64], sizes = [2, 64], strides = [1, 1]} : vector<2x256xf32> to vector<2x64xf32>
    %468 = vector.extract_strided_slice %465 {offsets = [0, 128], sizes = [2, 64], strides = [1, 1]} : vector<2x256xf32> to vector<2x64xf32>
    %469 = vector.extract_strided_slice %465 {offsets = [0, 192], sizes = [2, 64], strides = [1, 1]} : vector<2x256xf32> to vector<2x64xf32>
    %470 = arith.mulf %467, %452 : vector<2x64xf32>
    %471 = arith.mulf %466, %468 : vector<2x64xf32>
    %472 = arith.addf %470, %471 : vector<2x64xf32>
    %473 = math.tanh %472 : vector<2x64xf32>
    %474 = arith.mulf %469, %473 : vector<2x64xf32>
    %c10_160 = arith.constant 10 : index
    %c0_161 = arith.constant 0 : index
    %475 = vector.load %arg14[%c10_160, %c0_161] : memref<16x64xf32, #tpu.memory_space<vmem>>, vector<2x64xf32>
    tpu.vector_store %arg14[%c10_160, %c0_161], %474 {strides = array<i32>} : memref<16x64xf32, #tpu.memory_space<vmem>>, vector<2x64xf32>,
    %c12_162 = arith.constant 12 : index
    %c0_163 = arith.constant 0 : index
    %476 = vector.load %arg13[%c12_162, %c0_163] : memref<16x256xf32, #tpu.memory_space<vmem>>, vector<2x256xf32>
    %cst_164 = arith.constant dense<0.000000e+00> : vector<2x256xf32>
    %477 = tpu.matmul %474, %353, %cst_164 {dimension_numbers = #tpu.dot_dimension_numbers<[1], [0], [0], [1], [0, 0, 1, 1], [], []>} : vector<2x64xf32>, vector<64x256xf32>, vector<2x256xf32> -> vector<2x256xf32>
    %478 = arith.addf %476, %477 : vector<2x256xf32>
    %479 = math.tanh %478 : vector<2x256xf32>
    %480 = arith.negf %478 : vector<2x256xf32>
    %481 = math.exp %480 : vector<2x256xf32>
    %cst_165 = arith.constant 1.000000e+00 : f32
    %482 = vector.broadcast %cst_165 : f32 to vector<2x256xf32>
    %483 = arith.addf %482, %481 : vector<2x256xf32>
    %484 = arith.divf %482, %483 : vector<2x256xf32>
    %485 = arith.select %5, %479, %484 : vector<2x256xi1>, vector<2x256xf32>
    %486 = vector.extract_strided_slice %485 {offsets = [0, 0], sizes = [2, 64], strides = [1, 1]} : vector<2x256xf32> to vector<2x64xf32>
    %487 = vector.extract_strided_slice %485 {offsets = [0, 64], sizes = [2, 64], strides = [1, 1]} : vector<2x256xf32> to vector<2x64xf32>
    %488 = vector.extract_strided_slice %485 {offsets = [0, 128], sizes = [2, 64], strides = [1, 1]} : vector<2x256xf32> to vector<2x64xf32>
    %489 = vector.extract_strided_slice %485 {offsets = [0, 192], sizes = [2, 64], strides = [1, 1]} : vector<2x256xf32> to vector<2x64xf32>
    %490 = arith.mulf %487, %472 : vector<2x64xf32>
    %491 = arith.mulf %486, %488 : vector<2x64xf32>
    %492 = arith.addf %490, %491 : vector<2x64xf32>
    %493 = math.tanh %492 : vector<2x64xf32>
    %494 = arith.mulf %489, %493 : vector<2x64xf32>
    %c12_166 = arith.constant 12 : index
    %c0_167 = arith.constant 0 : index
    %495 = vector.load %arg14[%c12_166, %c0_167] : memref<16x64xf32, #tpu.memory_space<vmem>>, vector<2x64xf32>
    tpu.vector_store %arg14[%c12_166, %c0_167], %494 {strides = array<i32>} : memref<16x64xf32, #tpu.memory_space<vmem>>, vector<2x64xf32>,
    %c14_168 = arith.constant 14 : index
    %c0_169 = arith.constant 0 : index
    %496 = vector.load %arg13[%c14_168, %c0_169] : memref<16x256xf32, #tpu.memory_space<vmem>>, vector<2x256xf32>
    %cst_170 = arith.constant dense<0.000000e+00> : vector<2x256xf32>
    %497 = tpu.matmul %494, %353, %cst_170 {dimension_numbers = #tpu.dot_dimension_numbers<[1], [0], [0], [1], [0, 0, 1, 1], [], []>} : vector<2x64xf32>, vector<64x256xf32>, vector<2x256xf32> -> vector<2x256xf32>
    %498 = arith.addf %496, %497 : vector<2x256xf32>
    %499 = math.tanh %498 : vector<2x256xf32>
    %500 = arith.negf %498 : vector<2x256xf32>
    %501 = math.exp %500 : vector<2x256xf32>
    %cst_171 = arith.constant 1.000000e+00 : f32
    %502 = vector.broadcast %cst_171 : f32 to vector<2x256xf32>
    %503 = arith.addf %502, %501 : vector<2x256xf32>
    %504 = arith.divf %502, %503 : vector<2x256xf32>
    %505 = arith.select %5, %499, %504 : vector<2x256xi1>, vector<2x256xf32>
    %506 = vector.extract_strided_slice %505 {offsets = [0, 0], sizes = [2, 64], strides = [1, 1]} : vector<2x256xf32> to vector<2x64xf32>
    %507 = vector.extract_strided_slice %505 {offsets = [0, 64], sizes = [2, 64], strides = [1, 1]} : vector<2x256xf32> to vector<2x64xf32>
    %508 = vector.extract_strided_slice %505 {offsets = [0, 128], sizes = [2, 64], strides = [1, 1]} : vector<2x256xf32> to vector<2x64xf32>
    %509 = vector.extract_strided_slice %505 {offsets = [0, 192], sizes = [2, 64], strides = [1, 1]} : vector<2x256xf32> to vector<2x64xf32>
    %510 = arith.mulf %507, %492 : vector<2x64xf32>
    %511 = arith.mulf %506, %508 : vector<2x64xf32>
    %512 = arith.addf %510, %511 : vector<2x64xf32>
    %513 = math.tanh %512 : vector<2x64xf32>
    %514 = arith.mulf %509, %513 : vector<2x64xf32>
    %c14_172 = arith.constant 14 : index
    %c0_173 = arith.constant 0 : index
    %515 = vector.load %arg14[%c14_172, %c0_173] : memref<16x64xf32, #tpu.memory_space<vmem>>, vector<2x64xf32>
    tpu.vector_store %arg14[%c14_172, %c0_173], %514 {strides = array<i32>} : memref<16x64xf32, #tpu.memory_space<vmem>>, vector<2x64xf32>,
    %c0_174 = arith.constant 0 : index
    %c0_175 = arith.constant 0 : index
    %516 = vector.load %arg14[%c0_174, %c0_175] : memref<16x64xf32, #tpu.memory_space<vmem>>, vector<16x64xf32>
    %c0_176 = arith.constant 0 : index
    %c0_177 = arith.constant 0 : index
    %517 = vector.load %arg10[%c0_176, %c0_177] : memref<64x8xf32, #tpu.memory_space<vmem>>, vector<64x8xf32>
    %cst_178 = arith.constant dense<0.000000e+00> : vector<16x8xf32>
    %518 = tpu.matmul %516, %517, %cst_178 {dimension_numbers = #tpu.dot_dimension_numbers<[1], [0], [0], [1], [0, 0, 1, 1], [], []>} : vector<16x64xf32>, vector<64x8xf32>, vector<16x8xf32> -> vector<16x8xf32>
    %c0_179 = arith.constant 0 : index
    %c0_180 = arith.constant 0 : index
    %519 = vector.load %arg11[%c0_179, %c0_180] : memref<1x8xf32, #tpu.memory_space<vmem>>, vector<1x8xf32>
    %520 = vector.broadcast %519 : vector<1x8xf32> to vector<16x8xf32>
    %521 = arith.addf %518, %520 : vector<16x8xf32>
    %c0_181 = arith.constant 0 : index
    %c0_182 = arith.constant 0 : index
    %522 = vector.load %arg12[%c0_181, %c0_182] : memref<16x8xf32, #tpu.memory_space<vmem>>, vector<16x8xf32>
    tpu.vector_store %arg12[%c0_181, %c0_182], %521 {strides = array<i32>} : memref<16x8xf32, #tpu.memory_space<vmem>>, vector<16x8xf32>,
    return
  }
}

</mosaic_0001>

<bundles_post_ra>
// kernel: lstm_model_forward.1
= control target key start
LH: loop header
LB: loop body
LE: loop exit
PB: predicated region body
PF: predicated region fallthrough
CT: control target
= control target key end

     0   :  { %17 = vsyncpa [#allocation5], 0  ;;  %s4758_s0 = inlined_call_operand.vmem [shape: f32[16,49], index: 0, kind: input, shape index: {}]   ;;  %s4759_s1 = inlined_call_operand.hbm [shape: f32[49,256], index: 1, kind: input, shape index: {}]   ;;  %s4760_s2 = inlined_call_operand.hbm [shape: f32[64,256], index: 2, kind: input, shape index: {}]   ;;  %s4761_s3 = inlined_call_operand.vmem [shape: f32[1,256], index: 3, kind: input, shape index: {}]   ;;  %s4762_s4 = inlined_call_operand.hbm [shape: f32[64,256], index: 4, kind: input, shape index: {}]   ;;  %s4763_s5 = inlined_call_operand.hbm [shape: f32[64,256], index: 5, kind: input, shape index: {}]   ;;  %s4764_s6 = inlined_call_operand.vmem [shape: f32[1,256], index: 6, kind: input, shape index: {}]   ;;  %s4765_s7 = inlined_call_operand.hbm [shape: f32[64,256], index: 7, kind: input, shape index: {}]   ;;  %s4766_s8 = inlined_call_operand.hbm [shape: f32[64,256], index: 8, kind: input, shape index: {}]   ;;  %s4767_s9 = inlined_call_operand.vmem [shape: f32[1,256], index: 9, kind: input, shape index: {}]   ;;  %s4768_s10 = inlined_call_operand.vmem [shape: f32[64,8], index: 10, kind: input, shape index: {}]   ;;  %s4769_s11 = inlined_call_operand.vmem [shape: f32[1,8], index: 11, kind: input, shape index: {}]   ;;  %s4770_s12 = inlined_call_operand.hbm [shape: f32[16,8], index: 12, kind: output, shape index: {}]  }
   0x1   :  { %18 = vsyncpa [#allocation8], 0 }
   0x2   :  { %19 = vsyncpa [#allocation11], 0 }
   0x3   :  { %20 = vsyncpa [#allocation14], 0 }
   0x4   :  { %21 = vsyncpa [#allocation6], 0  ;;  %s41_s23 = sshll.u32 %s4760_s2, 4  ;;  %s3759_s24 = smov [#allocation7]   ;;  %s42_s23 = int_to_ptr.hbm [resolvable:$true] %s41_s23 }
   0x5   :  { %s43_s25 = sshll.u32 %s3759_s24, 4  ;;  %s69_s28 = sshll.u32 %s4763_s5, 4  ;;  %s44_s25 = int_to_ptr.vmem [resolvable:$true] %s43_s25  ;;  %s70_s28 = int_to_ptr.hbm [resolvable:$true] %s69_s28 }
   0x6   :  { %s3760_s29 = smov 256   ;;  %s3761_s30 = smov 16  }
   0x7   :  { %49 = dma.hbm_to_vmem [thread:$0]  %s42_s23, 2048, %s44_s25, [#allocation8], %s3760_s29, %s3760_s29, %s3761_s30  }
   0x8   :  { %s3762_s13 = smov [#allocation10]   ;;  %s28_s2 = sshll.u32 %s4759_s1, 4  ;;  %s29_s2 = int_to_ptr.hbm [resolvable:$true] %s28_s2 }
   0x9   :  { %s71_s14 = sshll.u32 %s3762_s13, 4  ;;  %s56_s18 = sshll.u32 %s4762_s4, 4  ;;  %s72_s14 = int_to_ptr.vmem [resolvable:$true] %s71_s14  ;;  %s57_s18 = int_to_ptr.hbm [resolvable:$true] %s56_s18 }
   0xa   :  { %77 = dma.hbm_to_vmem [thread:$0]  %s70_s28, 2048, %s72_s14, [#allocation11], %s3760_s29, %s3760_s29, %s3761_s30  }
   0xb   :  { %s3763_s19 = smov [#allocation4]   ;;  %s3764_s21 = smov [#allocation9]  }
   0xc   :  { %s30_s20 = sshll.u32 %s3763_s19, 4  ;;  %s58_s1 = sshll.u32 %s3764_s21, 4  ;;  %s31_s20 = int_to_ptr.vmem [resolvable:$true] %s30_s20  ;;  %s59_s1 = int_to_ptr.vmem [resolvable:$true] %s58_s1 }
   0xd   :  { %36 = dma.hbm_to_vmem [thread:$0]  %s29_s2, 1792, %s31_s20, [#allocation5], %s3760_s29, %s3760_s29, %s3761_s30  }
   0xe   :  { %s84_s24 = sshll.u32 %s4765_s7, 4  ;;  %s97_s26 = sshll.u32 %s4766_s8, 4  ;;  %s85_s24 = int_to_ptr.hbm [resolvable:$true] %s84_s24  ;;  %s98_s26 = int_to_ptr.hbm [resolvable:$true] %s97_s26 }
   0xf   :  { %64 = dma.hbm_to_vmem [thread:$0]  %s57_s18, 2048, %s59_s1, [#allocation8], %s3760_s29, %s3760_s29, %s3761_s30  }
  0x10   :  { %s3765_s27 = smov [#allocation12]   ;;  %s3766_s13 = smov [#allocation13]  }
  0x11   :  { %s86_s28 = sshll.u32 %s3765_s27, 4  ;;  %s99_s7 = sshll.u32 %s3766_s13, 4  ;;  %s87_s28 = int_to_ptr.vmem [resolvable:$true] %s86_s28  ;;  %s100_s7 = int_to_ptr.vmem [resolvable:$true] %s99_s7 }
  0x12   :  { %92 = dma.hbm_to_vmem [thread:$0]  %s85_s24, 2048, %s87_s28, [#allocation11], %s3760_s29, %s3760_s29, %s3761_s30  }
  0x13   :  { %105 = dma.hbm_to_vmem [thread:$0]  %s98_s26, 2048, %s100_s7, [#allocation14], %s3760_s29, %s3760_s29, %s3761_s30  }
  0x14   :  { %3749 = dma.done.wait [#allocation5], 1792  }
  0x15   :  { %3750 = vsyncadd [#allocation5], 4294965504 }
  0x16   :  { %3751 = dma.done.wait [#allocation8], 4096  }
  0x17   :  { %3752 = vsyncadd [#allocation8], 4294963200 }
  0x18   :  { %3753 = dma.done.wait [#allocation11], 4096  }
  0x19   :  { %3754 = vsyncadd [#allocation11], 4294963200 }
  0x1a   :  { %3755 = dma.done.wait [#allocation14], 2048  }
  0x1b   :  { %3756 = vsyncadd [#allocation14], 4294965248  ;;  %vm174_vm0 = vcmask 1040384   ;;  %v159_v0 = vld [vmem:[#allocation4 + $0x60] sm:$0x1]  ;;  %v157_v2 = vld [vmem:[#allocation4 + $0x50] sm:$0xff]  ;;  %v136_v53 = vlaneseq }
  0x1c   :  { %v3873_v1 = vld [vmem:[#allocation7 + $0x70] sm:$0xff]  ;;  %3173 = vmatpush.msk.msra.mxu0 %vm174_vm0, %v159_v0  ;;  %v3877_v3 = vld [vmem:[#allocation7 + $0x60] sm:$0xff]  ;;  %v160_v8 = vld [vmem:[#allocation4 + $0x68] sm:$0x1]  ;;  %vm167_vm1 = vcmask 400384   ;;  %v3767_v25 = vmov 0.0  }
  0x1d   :  { %261 = vmatpush.msra.mxu3 %v3873_v1  ;;  %v155_v4 = vld [vmem:[#allocation4 + $0x40] sm:$0xff]  ;;  %479 = vmatpush.msra.mxu2 %v3873_v1  ;;  %v153_v6 = vld [vmem:[#allocation4 + $0x30] sm:$0xff]  ;;  %v158_v9 = vld [vmem:[#allocation4 + $0x58] sm:$0xff]  ;;  %v137_v55 = vand.u32 127, %v136_v53  ;;  %vm350_vm11 = vcmask 517120   ;;  %vm249_vm12 = vcmask 523264  }
  0x1e   :  { %v3879_v5 = vld [vmem:[#allocation7 + $0x50] sm:$0xff]  ;;  %191 = vmatpush.msra.mxu0 %v157_v2  ;;  %v3883_v7 = vld [vmem:[#allocation7 + $0x40] sm:$0xff]  ;;  %3176 = vmatpush.msk.msra.mxu1 %vm174_vm0, %v160_v8  ;;  %v156_v12 = vld [vmem:[#allocation4 + $0x48] sm:$0xff]  ;;  %s3769_s8 = smov [#allocation15]   ;;  %s3770_s15 = smov 128  }
  0x1f   :  { %262 = vmatpush.msra.mxu3 %v3877_v3  ;;  %480 = vmatpush.msra.mxu2 %v3877_v3  ;;  %v151_v10 = vld [vmem:[#allocation4 + $0x20] sm:$0xff]  ;;  %v149_v13 = vld [vmem:[#allocation4 + $0x10] sm:$0xff]  ;;  %v154_v15 = vld [vmem:[#allocation4 + $0x38] sm:$0xff]  ;;  %v4005_v59 = vadd.s32 128, %v137_v55  ;;  %s3155_s29 = sshll.u32 %s3769_s8, 4  ;;  %s3771_s16 = smov 8   ;;  %s3156_s29 = int_to_ptr.vmem [resolvable:$true] %s3155_s29 }
  0x20   :  { %192 = vmatpush.msra.mxu0 %v155_v4  ;;  %v3887_v11 = vld [vmem:[#allocation7 + $0x30] sm:$0xff]  ;;  %v3892_v14 = vld [vmem:[#allocation7 + $0x20] sm:$0xff]  ;;  %214 = vmatpush.msra.mxu1 %v158_v9  ;;  %v152_v19 = vld [vmem:[#allocation4 + $0x28] sm:$0xff] }
  0x21   :  { %263 = vmatpush.msra.mxu3 %v3879_v5  ;;  %481 = vmatpush.msra.mxu2 %v3879_v5  ;;  %v147_v16 = vld [vmem:[#allocation4] sm:$0xff]  ;;  %v145_v18 = vld [vmem:[%s4758_s0] sm:$0xff]  ;;  %v3907_v21 = vld [vmem:[#allocation7 + $0x78] sm:$0xff]  ;;  %vm142_vm7 = vcmp.lt.s32.totalorder %v4005_v59, 192 }
  0x22   :  { %193 = vmatpush.msra.mxu0 %v153_v6  ;;  %v3896_v17 = vld [vmem:[#allocation7 + $0x10] sm:$0xff]  ;;  %215 = vmatpush.msra.mxu1 %v156_v12  ;;  %v3903_v20 = vld [vmem:[#allocation7] sm:$0xff]  ;;  %v150_v22 = vld [vmem:[#allocation4 + $0x18] sm:$0xff] }
  0x23   :  { %264 = vmatpush.msra.mxu3 %v3883_v7  ;;  %482 = vmatpush.msra.mxu2 %v3883_v7  ;;  %v3911_v23 = vld [vmem:[#allocation7 + $0x68] sm:$0xff]  ;;  %v148_v24 = vld [vmem:[#allocation4 + $0x8] sm:$0xff]  ;;  %v3997_v32 = vld [vmem:[%s4761_s3] sm:$0x3]  ;;  %s3768_s3 = smov 64  }
  0x24   :  { %194 = vmatpush.msra.mxu0 %v151_v10  ;;  %216 = vmatpush.msra.mxu1 %v154_v15  ;;  %v3916_v26 = vld [vmem:[#allocation7 + $0x58] sm:$0xff]  ;;  %v3920_v27 = vld [vmem:[#allocation7 + $0x48] sm:$0xff]  ;;  %v163_v33 = vperm.slane %v3997_v32, 0  ;;  %v164_v36 = vperm.slane %v3997_v32, 1 }
  0x25   :  { %265 = vmatpush.msra.mxu3 %v3887_v11  ;;  %483 = vmatpush.msra.mxu2 %v3887_v11  ;;  %v3926_v28 = vld [vmem:[#allocation7 + $0x38] sm:$0xff]  ;;  %v3932_v29 = vld [vmem:[#allocation7 + $0x28] sm:$0xff] }
  0x26   :  { %195 = vmatpush.msra.mxu0 %v149_v13  ;;  %217 = vmatpush.msra.mxu1 %v152_v19  ;;  %v3938_v30 = vld [vmem:[#allocation7 + $0x18] sm:$0xff]  ;;  %v3944_v31 = vld [vmem:[#allocation7 + $0x8] sm:$0xff] }
  0x27   :  { %266 = vmatpush.msra.mxu3 %v3892_v14  ;;  %484 = vmatpush.msra.mxu2 %v3892_v14  ;;  %v3112_v59 = vld [vmem:[%s4768_s10 + $0x28] sm:$0xff] }
  0x28   :  { %196 = vmatpush.msra.mxu0 %v147_v16  ;;  %218 = vmatpush.msra.mxu1 %v150_v22  ;;  %v146_v22 = vld [vmem:[%s4758_s0 + $0x8] sm:$0xff] }
  0x29   :  { %267 = vmatpush.msra.mxu3 %v3896_v17  ;;  %3174 = vmatmul.msk.f32.vlgmr.msra.gmra.mxu0 %vm167_vm1, %v145_v18 }
  0x2a   :  { %364 = vmatpush.msrb.mxu0 %v3873_v1  ;;  %219 = vmatpush.msra.mxu1 %v148_v24 }
  0x2b   :  { %268 = vmatpush.msra.mxu3 %v3903_v20  ;;  %3177 = vmatmul.msk.f32.vlgmr.msra.gmra.mxu1 %vm167_vm1, %v145_v18 }
  0x2c   :  { %269 = vmatmul.f32.vlgmr.msra.gmra.mxu3 %v3767_v25  ;;  %365 = vmatpush.msrb.mxu0 %v3877_v3 }
  0x2d   :  { %281 = vmatpush.msrb.mxu3 %v3907_v21  ;;  %384 = vmatpush.msrb.mxu1 %v3907_v21 }
  0x2e   :  { %366 = vmatpush.msrb.mxu0 %v3879_v5  ;;  %485 = vmatpush.msra.mxu2 %v3896_v17 }
  0x2f   :  { %282 = vmatpush.msrb.mxu3 %v3911_v23  ;;  %385 = vmatpush.msrb.mxu1 %v3911_v23 }
  0x30   :  { %367 = vmatpush.msrb.mxu0 %v3883_v7  ;;  %486 = vmatpush.msra.mxu2 %v3903_v20 }
  0x31   :  { %283 = vmatpush.msrb.mxu3 %v3916_v26  ;;  %386 = vmatpush.msrb.mxu1 %v3916_v26 }
  0x32   :  { %368 = vmatpush.msrb.mxu0 %v3887_v11  ;;  %709 = vmatpush.msrb.mxu2 %v3873_v1 }
  0x33   :  { %284 = vmatpush.msrb.mxu3 %v3920_v27  ;;  %387 = vmatpush.msrb.mxu1 %v3920_v27 }
  0x34   :  { %369 = vmatpush.msrb.mxu0 %v3892_v14  ;;  %710 = vmatpush.msrb.mxu2 %v3877_v3 }
  0x35   :  { %285 = vmatpush.msrb.mxu3 %v3926_v28  ;;  %388 = vmatpush.msrb.mxu1 %v3926_v28 }
  0x36   :  { %370 = vmatpush.msrb.mxu0 %v3896_v17  ;;  %711 = vmatpush.msrb.mxu2 %v3879_v5 }
  0x37   :  { %286 = vmatpush.msrb.mxu3 %v3932_v29  ;;  %389 = vmatpush.msrb.mxu1 %v3932_v29 }
  0x38   :  { %371 = vmatpush.msrb.mxu0 %v3903_v20  ;;  %712 = vmatpush.msrb.mxu2 %v3883_v7 }
  0x39   :  { %287 = vmatpush.msrb.mxu3 %v3938_v30  ;;  %390 = vmatpush.msrb.mxu1 %v3938_v30 }
  0x3a   :  { %594 = vmatpush.msra.mxu0 %v3873_v1  ;;  %713 = vmatpush.msrb.mxu2 %v3887_v11 }
  0x3b   :  { %288 = vmatpush.msrb.mxu3 %v3944_v31  ;;  %391 = vmatpush.msrb.mxu1 %v3944_v31 }
  0x3c   :  { %289 = vmatmul.f32.vlgmr.msrb.gmra.mxu3 %v3767_v25  ;;  %595 = vmatpush.msra.mxu0 %v3877_v3 }
  0x3d   :  { %499 = vmatpush.msra.mxu3 %v3907_v21  ;;  %614 = vmatpush.msra.mxu1 %v3907_v21 }
  0x3e   :  { %596 = vmatpush.msra.mxu0 %v3879_v5  ;;  %714 = vmatpush.msrb.mxu2 %v3892_v14 }
  0x3f   :  { %500 = vmatpush.msra.mxu3 %v3911_v23  ;;  %615 = vmatpush.msra.mxu1 %v3911_v23 }
  0x40   :  { %597 = vmatpush.msra.mxu0 %v3883_v7  ;;  %715 = vmatpush.msrb.mxu2 %v3896_v17 }
  0x41   :  { %501 = vmatpush.msra.mxu3 %v3916_v26  ;;  %616 = vmatpush.msra.mxu1 %v3916_v26 }
  0x42   :  { %598 = vmatpush.msra.mxu0 %v3887_v11  ;;  %716 = vmatpush.msrb.mxu2 %v3903_v20 }
  0x43   :  { %502 = vmatpush.msra.mxu3 %v3920_v27  ;;  %617 = vmatpush.msra.mxu1 %v3920_v27 }
  0x44   :  { %599 = vmatpush.msra.mxu0 %v3892_v14  ;;  %3178 = vmatmul.msk.f32.gmra.mxu1 %vm167_vm1, %v146_v22 }
  0x45   :  { %503 = vmatpush.msra.mxu3 %v3926_v28  ;;  %618 = vmatpush.msra.mxu1 %v3926_v28 }
  0x46   :  { %600 = vmatpush.msra.mxu0 %v3896_v17 }
  0x47   :  { %504 = vmatpush.msra.mxu3 %v3932_v29  ;;  %619 = vmatpush.msra.mxu1 %v3932_v29 }
  0x48   :  { %601 = vmatpush.msra.mxu0 %v3903_v20 }
  0x49   :  { %505 = vmatpush.msra.mxu3 %v3938_v30  ;;  %620 = vmatpush.msra.mxu1 %v3938_v30 }
  0x4a   :  { %3175 = vmatmul.msk.f32.gmra.mxu0 %vm167_vm1, %v146_v22 }
  0x4b   :  { %506 = vmatpush.msra.mxu3 %v3944_v31  ;;  %621 = vmatpush.msra.mxu1 %v3944_v31 }
  0x4d   :  { %729 = vmatpush.msrb.mxu3 %v3907_v21 }
  0x4f   :  { %730 = vmatpush.msrb.mxu3 %v3911_v23 }
  0x51   :  { %731 = vmatpush.msrb.mxu3 %v3916_v26 }
  0x53   :  { %732 = vmatpush.msrb.mxu3 %v3920_v27 }
  0x55   :  { %733 = vmatpush.msrb.mxu3 %v3926_v28 }
  0x57   :  { %734 = vmatpush.msrb.mxu3 %v3932_v29 }
  0x59   :  { %735 = vmatpush.msrb.mxu3 %v3938_v30 }
  0x5b   :  { %736 = vmatpush.msrb.mxu3 %v3944_v31 }
  0xa6   :  { %v198_v34 = vpop.f32.mrf.mxu0 }
  0xa7   :  { %v199_v35 = vadd.f32 %v198_v34, %v163_v33 }
  0xa8   :  { %v221_v37 = vpop.f32.mrf.mxu1 }
  0xa9   :  { %227 = vst [vmem:[#allocation2 + $0x10] sm:$0xff] %v199_v35  ;;  %v222_v38 = vadd.f32 %v221_v37, %v164_v36 }
  0xab   :  { %228 = vst [vmem:[#allocation2] sm:$0xff] %v222_v38 }
  0xaf   :  { %v270_v39 = vpop.f32.mrf.mxu3 }
  0xb0   :  { %v247_v40 = vld [vmem:[#allocation2 + $0x10] sm:$0x3] }
  0xb1   :  { %v293_v41 = vadd.f32 %v270_v39, %v247_v40 }
  0xb2   :  { %v248_v44 = vld [vmem:[#allocation2] sm:$0x3] }
  0xb3   :  { %v3179_v42 = vmul.f32 -1.442695, %v293_v41 }
  0xb5   :  { %3293 = vpow2.f32 %v3179_v42 }
  0xbb   :  { %v3294_v43 = vpop.eup %3293 }
  0xbc   :  { %v303_v45 = vadd.f32 1.0, %v3294_v43 }
  0xbe   :  { %3295 = vrcp.f32 %v303_v45  ;;  %v316_v63 = vand.u32 2147483648, %v303_v45  ;;  %vm310_vm4 = vweird.f32 %v303_v45  ;;  %v314_v4 = vand.u32 2147483647, %v303_v45 }
  0xbf   :  { %v290_v46 = vpop.f32.mrf.mxu3 }
  0xc0   :  { %v294_v47 = vadd.f32 %v290_v46, %v248_v44  ;;  %v317_v10 = vor.u32 1.1754944e-38, %v316_v63  ;;  %vm315_vm10 = vcmp.eq.f32.partialorder %v314_v4, 8.507059e+37  ;;  %v353_v46 = vld [vmem:[#allocation2] sm:$0xc] }
  0xc1   :  { %v224_v40 = vpop.f32.mrf.mxu1 }
  0xc2   :  { %v3180_v48 = vmul.f32 -1.442695, %v294_v47  ;;  %v225_v42 = vadd.f32 %v224_v40, %v164_v36 }
  0xc4   :  { %3297 = vpow2.f32 %v3180_v48  ;;  %v3296_v49 = vpop.eup %3295  ;;  %230 = vst [vmem:[#allocation2 + $0x8] sm:$0xff] %v225_v42 }
  0xc5   :  { %v306_v52 = vmul.f32 %v3296_v49, %v303_v45  ;;  %vm311_vm2 = vweird.f32 %v3296_v49  ;;  %v352_v45 = vld [vmem:[#allocation2 + $0x10] sm:$0xc] }
  0xc6   :  { %vm312_vm5 = vmor %vm310_vm4, %vm311_vm2 }
  0xc7   :  { %v307_v54 = vsub.f32 1.0, %v306_v52  ;;  %v201_v39 = vpop.f32.mrf.mxu0 }
  0xc8   :  { %v202_v41 = vadd.f32 %v201_v39, %v163_v33 }
  0xc9   :  { %v308_v57 = vmul.f32 %v3296_v49, %v307_v54 }
  0xca   :  { %v3298_v50 = vpop.eup %3297  ;;  %229 = vst [vmem:[#allocation2 + $0x18] sm:$0xff] %v202_v41 }
  0xcb   :  { %v304_v51 = vadd.f32 1.0, %v3298_v50  ;;  %v309_v61 = vadd.f32 %v3296_v49, %v308_v57 }
  0xcd   :  { %3299 = vrcp.f32 %v304_v51  ;;  %v331_v62 = vand.u32 2147483648, %v304_v51  ;;  %v329_v2 = vand.u32 2147483647, %v304_v51  ;;  %vm325_vm6 = vweird.f32 %v304_v51 }
  0xce   :  { %3301 = vtanh.f32 %v294_v47  ;;  %v313_v8 = vsel %vm312_vm5, %v3296_v49, %v309_v61 }
  0xcf   :  { %v332_v9 = vor.u32 1.1754944e-38, %v331_v62  ;;  %vm330_vm9 = vcmp.eq.f32.partialorder %v329_v2, 8.507059e+37  ;;  %v318_v16 = vsel %vm315_vm10, %v317_v10, %v313_v8 }
  0xd0   :  { %v337_v24 = vmul.f32 0.0, %v318_v16 }
  0xd3   :  { %v3300_v56 = vpop.eup %3299 }
  0xd4   :  { %v321_v58 = vmul.f32 %v3300_v56, %v304_v51  ;;  %vm326_vm3 = vweird.f32 %v3300_v56  ;;  %v3302_v13 = vpop.eup %3301 }
  0xd5   :  { %vm327_vm8 = vmor %vm325_vm6, %vm326_vm3 }
  0xd6   :  { %v322_v60 = vsub.f32 1.0, %v321_v58 }
  0xd8   :  { %v323_v0 = vmul.f32 %v3300_v56, %v322_v60 }
  0xda   :  { %v324_v6 = vadd.f32 %v3300_v56, %v323_v0 }
  0xdc   :  { %v328_v12 = vsel %vm327_vm8, %v3300_v56, %v324_v6 }
  0xdd   :  { %v333_v15 = vsel %vm330_vm9, %v332_v9, %v328_v12 }
  0xde   :  { %v336_v18 = vsel %vm142_vm7, %v3302_v13, %v333_v15 }
  0xdf   :  { %v338_v19 = vmul.f32 %v336_v18, %v318_v16 }
  0xe1   :  { %340 = vrot.lane.b32.xlu0 %v338_v19, %s3768_s3 }
 0x153   :  { %v341_v34 = vpop.permute.xlu0 %340 }
 0x154   :  { %v4016_v35 = vadd.f32 %v341_v34, %v337_v24 }
 0x156   :  { %3303 = vtanh.f32 %v4016_v35  ;;  %v447_v12 = vrot.slane %v4016_v35, 6 }
 0x15c   :  { %v3304_v37 = vpop.eup %3303 }
 0x15d   :  { %v345_v38 = vmul.f32 %v3304_v37, %v336_v18 }
 0x15f   :  { %347 = vrot.lane.b32.xlu0 %v345_v38, %s3768_s3 }
 0x1d1   :  { %v348_v43 = vpop.permute.xlu0 %347 }
 0x1d2   :  { %351 = vst.msk [vmem:[#allocation3] sm:$0x3] %vm350_vm11, %v348_v43  ;;  %3181 = vmatmul.msk.f32.vlgmr.msrb.gmra.mxu0 %vm249_vm12, %v348_v43  ;;  %3182 = vmatmul.msk.f32.vlgmr.msrb.gmra.mxu1 %vm249_vm12, %v348_v43 }
 0x1d3   :  { %814 = vmatpush.msrb.mxu0 %v3873_v1  ;;  %834 = vmatpush.msrb.mxu1 %v3907_v21 }
 0x1d5   :  { %815 = vmatpush.msrb.mxu0 %v3877_v3  ;;  %835 = vmatpush.msrb.mxu1 %v3911_v23 }
 0x1d7   :  { %816 = vmatpush.msrb.mxu0 %v3879_v5  ;;  %836 = vmatpush.msrb.mxu1 %v3916_v26 }
 0x1d9   :  { %817 = vmatpush.msrb.mxu0 %v3883_v7  ;;  %837 = vmatpush.msrb.mxu1 %v3920_v27 }
 0x1db   :  { %818 = vmatpush.msrb.mxu0 %v3887_v11  ;;  %838 = vmatpush.msrb.mxu1 %v3926_v28 }
 0x1dd   :  { %819 = vmatpush.msrb.mxu0 %v3892_v14  ;;  %839 = vmatpush.msrb.mxu1 %v3932_v29 }
 0x1df   :  { %820 = vmatpush.msrb.mxu0 %v3896_v17  ;;  %840 = vmatpush.msrb.mxu1 %v3938_v30 }
 0x1e1   :  { %821 = vmatpush.msrb.mxu0 %v3903_v20  ;;  %841 = vmatpush.msrb.mxu1 %v3944_v31 }
 0x24f   :  { %v373_v32 = vpop.f32.mrf.mxu0  ;;  %v393_v33 = vpop.f32.mrf.mxu1 }
 0x250   :  { %v398_v36 = vrot.slane %v373_v32, 6  ;;  %v399_v44 = vrot.slane %v393_v33, 6 }
 0x252   :  { %v402_v47 = vadd.f32 %v398_v36, %v352_v45  ;;  %v403_v48 = vadd.f32 %v399_v44, %v353_v46  ;;  %v464_v44 = vld [vmem:[#allocation2 + $0x10] sm:$0x30]  ;;  %v465_v45 = vld [vmem:[#allocation2] sm:$0x30] }
 0x254   :  { %v3183_v49 = vmul.f32 -1.442695, %v402_v47  ;;  %v3184_v50 = vmul.f32 -1.442695, %v403_v48 }
 0x256   :  { %3305 = vpow2.f32 %v3183_v49 }
 0x257   :  { %3307 = vpow2.f32 %v3184_v50 }
 0x25c   :  { %v3306_v51 = vpop.eup %3305 }
 0x25d   :  { %v3308_v52 = vpop.eup %3307  ;;  %v412_v53 = vadd.f32 1.0, %v3306_v51 }
 0x25e   :  { %v413_v54 = vadd.f32 1.0, %v3308_v52 }
 0x25f   :  { %3309 = vrcp.f32 %v412_v53  ;;  %v425_v61 = vand.u32 2147483648, %v412_v53  ;;  %v423_v0 = vand.u32 2147483647, %v412_v53  ;;  %vm419_vm15 = vweird.f32 %v412_v53 }
 0x260   :  { %3311 = vrcp.f32 %v413_v54  ;;  %v440_v2 = vand.u32 2147483648, %v413_v54  ;;  %v438_v6 = vand.u32 2147483647, %v413_v54  ;;  %vm434_vm1 = vweird.f32 %v413_v54 }
 0x261   :  { %3313 = vtanh.f32 %v403_v48  ;;  %v426_v9 = vor.u32 1.1754944e-38, %v425_v61  ;;  %vm424_vm2 = vcmp.eq.f32.partialorder %v423_v0, 8.507059e+37 }
 0x262   :  { %v441_v15 = vor.u32 1.1754944e-38, %v440_v2  ;;  %vm439_vm4 = vcmp.eq.f32.partialorder %v438_v6, 8.507059e+37 }
 0x265   :  { %v3310_v55 = vpop.eup %3309 }
 0x266   :  { %v3312_v56 = vpop.eup %3311  ;;  %v415_v57 = vmul.f32 %v3310_v55, %v412_v53  ;;  %vm420_vm13 = vweird.f32 %v3310_v55 }
 0x267   :  { %v430_v58 = vmul.f32 %v3312_v56, %v413_v54  ;;  %vm435_vm14 = vweird.f32 %v3312_v56  ;;  %vm421_vm0 = vmor %vm419_vm15, %vm420_vm13  ;;  %v3314_v16 = vpop.eup %3313 }
 0x268   :  { %v416_v60 = vsub.f32 1.0, %v415_v57  ;;  %vm436_vm3 = vmor %vm434_vm1, %vm435_vm14 }
 0x269   :  { %v431_v62 = vsub.f32 1.0, %v430_v58 }
 0x26a   :  { %v417_v63 = vmul.f32 %v3310_v55, %v416_v60 }
 0x26b   :  { %v432_v4 = vmul.f32 %v3312_v56, %v431_v62 }
 0x26c   :  { %v418_v8 = vadd.f32 %v3310_v55, %v417_v63 }
 0x26d   :  { %v433_v10 = vadd.f32 %v3312_v56, %v432_v4 }
 0x26e   :  { %v422_v13 = vsel %vm421_vm0, %v3310_v55, %v418_v8 }
 0x26f   :  { %v427_v18 = vsel %vm424_vm2, %v426_v9, %v422_v13  ;;  %v437_v19 = vsel %vm436_vm3, %v3312_v56, %v433_v10 }
 0x270   :  { %v442_v22 = vsel %vm439_vm4, %v441_v15, %v437_v19  ;;  %v449_v24 = vmul.f32 %v447_v12, %v427_v18 }
 0x271   :  { %v445_v34 = vsel %vm142_vm7, %v3314_v16, %v442_v22 }
 0x272   :  { %v450_v37 = vmul.f32 %v445_v34, %v427_v18 }
 0x274   :  { %452 = vrot.lane.b32.xlu1 %v450_v37, %s3768_s3 }
 0x2e6   :  { %v453_v38 = vpop.permute.xlu1 %452 }
 0x2e7   :  { %v4047_v39 = vadd.f32 %v453_v38, %v449_v24 }
 0x2e9   :  { %3315 = vtanh.f32 %v4047_v39  ;;  %v562_v10 = vrot.slane %v4047_v39, 6 }
 0x2ef   :  { %v3316_v35 = vpop.eup %3315 }
 0x2f0   :  { %v4050_v40 = vmul.f32 %v3316_v35, %v445_v34 }
 0x2f2   :  { %v466_v41 = vrot.slane %v4050_v40, 2 }
 0x2f4   :  { %467 = vrot.lane.b32.xlu1 %v466_v41, %s3768_s3 }
 0x366   :  { %v468_v42 = vpop.permute.xlu1 %467 }
 0x367   :  { %3185 = vmatmul.msk.f32.vlgmr.msra.gmra.mxu2 %vm249_vm12, %v468_v42  ;;  %3186 = vmatmul.msk.f32.vlgmr.msra.gmra.mxu3 %vm249_vm12, %v468_v42 }
 0x368   :  { %928 = vmatpush.msra.mxu2 %v3873_v1  ;;  %948 = vmatpush.msra.mxu3 %v3907_v21 }
 0x36a   :  { %929 = vmatpush.msra.mxu2 %v3877_v3  ;;  %949 = vmatpush.msra.mxu3 %v3911_v23 }
 0x36c   :  { %930 = vmatpush.msra.mxu2 %v3879_v5  ;;  %950 = vmatpush.msra.mxu3 %v3916_v26 }
 0x36e   :  { %931 = vmatpush.msra.mxu2 %v3883_v7  ;;  %951 = vmatpush.msra.mxu3 %v3920_v27 }
 0x370   :  { %932 = vmatpush.msra.mxu2 %v3887_v11  ;;  %952 = vmatpush.msra.mxu3 %v3926_v28 }
 0x372   :  { %933 = vmatpush.msra.mxu2 %v3892_v14  ;;  %953 = vmatpush.msra.mxu3 %v3932_v29 }
 0x374   :  { %934 = vmatpush.msra.mxu2 %v3896_v17  ;;  %954 = vmatpush.msra.mxu3 %v3938_v30 }
 0x376   :  { %935 = vmatpush.msra.mxu2 %v3903_v20  ;;  %955 = vmatpush.msra.mxu3 %v3944_v31 }
 0x3ea   :  { %v488_v43 = vpop.f32.mrf.mxu2  ;;  %v508_v32 = vpop.f32.mrf.mxu3 }
 0x3eb   :  { %v513_v33 = vrot.slane %v488_v43, 4  ;;  %v514_v36 = vrot.slane %v508_v32, 4 }
 0x3ed   :  { %v517_v46 = vadd.f32 %v513_v33, %v464_v44  ;;  %v518_v47 = vadd.f32 %v514_v36, %v465_v45 }
 0x3ef   :  { %v3187_v48 = vmul.f32 -1.442695, %v517_v46  ;;  %v3188_v49 = vmul.f32 -1.442695, %v518_v47 }
 0x3f1   :  { %3317 = vpow2.f32 %v3187_v48 }
 0x3f2   :  { %3319 = vpow2.f32 %v3188_v49 }
 0x3f7   :  { %v3318_v50 = vpop.eup %3317 }
 0x3f8   :  { %v3320_v51 = vpop.eup %3319  ;;  %v527_v52 = vadd.f32 1.0, %v3318_v50 }
 0x3f9   :  { %v528_v53 = vadd.f32 1.0, %v3320_v51 }
 0x3fa   :  { %3321 = vrcp.f32 %v527_v52  ;;  %v540_v60 = vand.u32 2147483648, %v527_v52  ;;  %v538_v63 = vand.u32 2147483647, %v527_v52  ;;  %vm534_vm8 = vweird.f32 %v527_v52 }
 0x3fb   :  { %3323 = vrcp.f32 %v528_v53  ;;  %v555_v0 = vand.u32 2147483648, %v528_v53  ;;  %v553_v4 = vand.u32 2147483647, %v528_v53  ;;  %vm549_vm10 = vweird.f32 %v528_v53 }
 0x3fc   :  { %3325 = vtanh.f32 %v518_v47  ;;  %v541_v8 = vor.u32 1.1754944e-38, %v540_v60  ;;  %vm539_vm13 = vcmp.eq.f32.partialorder %v538_v63, 8.507059e+37 }
 0x3fd   :  { %v556_v13 = vor.u32 1.1754944e-38, %v555_v0  ;;  %vm554_vm15 = vcmp.eq.f32.partialorder %v553_v4, 8.507059e+37 }
 0x400   :  { %v3322_v54 = vpop.eup %3321 }
 0x401   :  { %v3324_v55 = vpop.eup %3323  ;;  %v530_v56 = vmul.f32 %v3322_v54, %v527_v52  ;;  %vm535_vm5 = vweird.f32 %v3322_v54 }
 0x402   :  { %v545_v57 = vmul.f32 %v3324_v55, %v528_v53  ;;  %vm550_vm6 = vweird.f32 %v3324_v55  ;;  %vm536_vm9 = vmor %vm534_vm8, %vm535_vm5  ;;  %v3326_v15 = vpop.eup %3325 }
 0x403   :  { %v531_v58 = vsub.f32 1.0, %v530_v56  ;;  %vm551_vm14 = vmor %vm549_vm10, %vm550_vm6 }
 0x404   :  { %v546_v61 = vsub.f32 1.0, %v545_v57 }
 0x405   :  { %v532_v62 = vmul.f32 %v3322_v54, %v531_v58 }
 0x406   :  { %v547_v2 = vmul.f32 %v3324_v55, %v546_v61 }
 0x407   :  { %v533_v6 = vadd.f32 %v3322_v54, %v532_v62 }
 0x408   :  { %v548_v9 = vadd.f32 %v3324_v55, %v547_v2 }
 0x409   :  { %v537_v12 = vsel %vm536_vm9, %v3322_v54, %v533_v6 }
 0x40a   :  { %v542_v16 = vsel %vm539_vm13, %v541_v8, %v537_v12  ;;  %v552_v18 = vsel %vm551_vm14, %v3324_v55, %v548_v9 }
 0x40b   :  { %v557_v19 = vsel %vm554_vm15, %v556_v13, %v552_v18  ;;  %v564_v22 = vmul.f32 %v562_v10, %v542_v16  ;;  %v694_v10 = vld [vmem:[#allocation2 + $0x18] sm:$0x3]  ;;  %v695_v13 = vld [vmem:[#allocation2 + $0x8] sm:$0x3] }
 0x40c   :  { %v560_v24 = vsel %vm142_vm7, %v3326_v15, %v557_v19 }
 0x40d   :  { %v565_v34 = vmul.f32 %v560_v24, %v542_v16 }
 0x40f   :  { %567 = vrot.lane.b32.xlu2 %v565_v34, %s3768_s3 }
 0x469   :  { %v568_v37 = vpop.permute.xlu2 %567 }
 0x46a   :  { %v4076_v38 = vadd.f32 %v568_v37, %v564_v22 }
 0x46c   :  { %3327 = vtanh.f32 %v4076_v38  ;;  %v677_v53 = vrot.slane %v4076_v38, 6 }
 0x472   :  { %v3328_v39 = vpop.eup %3327 }
 0x473   :  { %v4079_v35 = vmul.f32 %v3328_v39, %v560_v24 }
 0x475   :  { %v581_v41 = vrot.slane %v4079_v35, 4 }
 0x477   :  { %582 = vrot.lane.b32.xlu2 %v581_v41, %s3768_s3 }
 0x4d1   :  { %v583_v42 = vpop.permute.xlu2 %582 }
 0x4d2   :  { %3189 = vmatmul.msk.f32.vlgmr.msra.gmra.mxu0 %vm249_vm12, %v583_v42  ;;  %3190 = vmatmul.msk.f32.vlgmr.msra.gmra.mxu1 %vm249_vm12, %v583_v42 }
 0x4d3   :  { %1042 = vmatpush.msra.mxu0 %v3873_v1  ;;  %1062 = vmatpush.msra.mxu1 %v3907_v21  ;;  %v579_v21 = vld [vmem:[#allocation2 + $0x10] sm:$0xc0] }
 0x4d5   :  { %1043 = vmatpush.msra.mxu0 %v3877_v3  ;;  %1063 = vmatpush.msra.mxu1 %v3911_v23 }
 0x4d7   :  { %1044 = vmatpush.msra.mxu0 %v3879_v5  ;;  %1064 = vmatpush.msra.mxu1 %v3916_v26 }
 0x4d9   :  { %1045 = vmatpush.msra.mxu0 %v3883_v7  ;;  %1065 = vmatpush.msra.mxu1 %v3920_v27 }
 0x4db   :  { %1046 = vmatpush.msra.mxu0 %v3887_v11  ;;  %1066 = vmatpush.msra.mxu1 %v3926_v28  ;;  %v580_v11 = vld [vmem:[#allocation2] sm:$0xc0] }
 0x4dd   :  { %1047 = vmatpush.msra.mxu0 %v3892_v14  ;;  %1067 = vmatpush.msra.mxu1 %v3932_v29 }
 0x4df   :  { %1048 = vmatpush.msra.mxu0 %v3896_v17  ;;  %1068 = vmatpush.msra.mxu1 %v3938_v30 }
 0x4e1   :  { %1049 = vmatpush.msra.mxu0 %v3903_v20  ;;  %1069 = vmatpush.msra.mxu1 %v3944_v31 }
 0x54f   :  { %v603_v1 = vpop.f32.mrf.mxu0  ;;  %v623_v3 = vpop.f32.mrf.mxu1 }
 0x550   :  { %v628_v5 = vrot.slane %v603_v1, 2  ;;  %v629_v7 = vrot.slane %v623_v3, 2 }
 0x552   :  { %v632_v23 = vadd.f32 %v628_v5, %v579_v21  ;;  %v633_v26 = vadd.f32 %v629_v7, %v580_v11 }
 0x554   :  { %v3191_v27 = vmul.f32 -1.442695, %v632_v23  ;;  %v3192_v14 = vmul.f32 -1.442695, %v633_v26 }
 0x556   :  { %3329 = vpow2.f32 %v3191_v27 }
 0x557   :  { %3331 = vpow2.f32 %v3192_v14 }
 0x55c   :  { %v3330_v28 = vpop.eup %3329 }
 0x55d   :  { %v3332_v17 = vpop.eup %3331  ;;  %v642_v29 = vadd.f32 1.0, %v3330_v28 }
 0x55e   :  { %v643_v30 = vadd.f32 1.0, %v3332_v17 }
 0x55f   :  { %3333 = vrcp.f32 %v642_v29  ;;  %v655_v36 = vand.u32 2147483648, %v642_v29  ;;  %v653_v46 = vand.u32 2147483647, %v642_v29  ;;  %vm649_vm2 = vweird.f32 %v642_v29 }
 0x560   :  { %3335 = vrcp.f32 %v643_v30  ;;  %v670_v47 = vand.u32 2147483648, %v643_v30  ;;  %v668_v49 = vand.u32 2147483647, %v643_v30  ;;  %vm664_vm4 = vweird.f32 %v643_v30 }
 0x561   :  { %3337 = vtanh.f32 %v633_v26  ;;  %v656_v51 = vor.u32 1.1754944e-38, %v655_v36  ;;  %vm654_vm5 = vcmp.eq.f32.partialorder %v653_v46, 8.507059e+37 }
 0x562   :  { %v671_v55 = vor.u32 1.1754944e-38, %v670_v47  ;;  %vm669_vm8 = vcmp.eq.f32.partialorder %v668_v49, 8.507059e+37 }
 0x565   :  { %v3334_v20 = vpop.eup %3333 }
 0x566   :  { %v3336_v31 = vpop.eup %3335  ;;  %v645_v43 = vmul.f32 %v3334_v20, %v642_v29  ;;  %vm650_vm0 = vweird.f32 %v3334_v20 }
 0x567   :  { %v660_v32 = vmul.f32 %v3336_v31, %v643_v30  ;;  %vm665_vm1 = vweird.f32 %v3336_v31  ;;  %vm651_vm3 = vmor %vm649_vm2, %vm650_vm0  ;;  %v3338_v56 = vpop.eup %3337 }
 0x568   :  { %v646_v33 = vsub.f32 1.0, %v645_v43  ;;  %vm666_vm6 = vmor %vm664_vm4, %vm665_vm1 }
 0x569   :  { %v661_v44 = vsub.f32 1.0, %v660_v32 }
 0x56a   :  { %v647_v45 = vmul.f32 %v3334_v20, %v646_v33 }
 0x56b   :  { %v662_v48 = vmul.f32 %v3336_v31, %v661_v44 }
 0x56c   :  { %v648_v50 = vadd.f32 %v3334_v20, %v647_v45 }
 0x56d   :  { %v663_v52 = vadd.f32 %v3336_v31, %v662_v48 }
 0x56e   :  { %v652_v54 = vsel %vm651_vm3, %v3334_v20, %v648_v50 }
 0x56f   :  { %v657_v57 = vsel %vm654_vm5, %v656_v51, %v652_v54  ;;  %v667_v58 = vsel %vm666_vm6, %v3336_v31, %v663_v52 }
 0x570   :  { %v672_v60 = vsel %vm669_vm8, %v671_v55, %v667_v58  ;;  %v679_v61 = vmul.f32 %v677_v53, %v657_v57  ;;  %v802_v55 = vld [vmem:[#allocation2 + $0x18] sm:$0xc] }
 0x571   :  { %v675_v62 = vsel %vm142_vm7, %v3338_v56, %v672_v60  ;;  %v803_v56 = vld [vmem:[#allocation2 + $0x8] sm:$0xc] }
 0x572   :  { %v680_v63 = vmul.f32 %v675_v62, %v657_v57 }
 0x574   :  { %682 = vrot.lane.b32.xlu0 %v680_v63, %s3768_s3 }
 0x5e6   :  { %v683_v0 = vpop.permute.xlu0 %682 }
 0x5e7   :  { %v685_v2 = vadd.f32 %v683_v0, %v679_v61 }
 0x5e9   :  { %3339 = vtanh.f32 %v685_v2  ;;  %v786_v29 = vrot.slane %v685_v2, 6 }
 0x5ef   :  { %v3340_v4 = vpop.eup %3339 }
 0x5f0   :  { %v4105_v6 = vmul.f32 %v3340_v4, %v675_v62 }
 0x5f2   :  { %v696_v8 = vrot.slane %v4105_v6, 6 }
 0x5f4   :  { %697 = vrot.lane.b32.xlu1 %v696_v8, %s3768_s3 }
 0x666   :  { %v698_v9 = vpop.permute.xlu1 %697 }
 0x667   :  { %3193 = vmatmul.msk.f32.vlgmr.msrb.gmra.mxu2 %vm249_vm12, %v698_v9  ;;  %3194 = vmatmul.msk.f32.vlgmr.msrb.gmra.mxu3 %vm249_vm12, %v698_v9 }
 0x6ea   :  { %v718_v12 = vpop.f32.mrf.mxu2  ;;  %v738_v15 = vpop.f32.mrf.mxu3 }
 0x6eb   :  { %v741_v16 = vadd.f32 %v718_v12, %v694_v10  ;;  %v742_v18 = vadd.f32 %v738_v15, %v695_v13 }
 0x6ed   :  { %v3195_v19 = vmul.f32 -1.442695, %v741_v16  ;;  %v3196_v22 = vmul.f32 -1.442695, %v742_v18 }
 0x6ef   :  { %3341 = vpow2.f32 %v3195_v19 }
 0x6f0   :  { %3343 = vpow2.f32 %v3196_v22 }
 0x6f5   :  { %v3342_v24 = vpop.eup %3341 }
 0x6f6   :  { %v3344_v34 = vpop.eup %3343  ;;  %v751_v37 = vadd.f32 1.0, %v3342_v24 }
 0x6f7   :  { %v752_v38 = vadd.f32 1.0, %v3344_v34 }
 0x6f8   :  { %3345 = vrcp.f32 %v751_v37  ;;  %v764_v7 = vand.u32 2147483648, %v751_v37  ;;  %v762_v11 = vand.u32 2147483647, %v751_v37  ;;  %vm758_vm13 = vweird.f32 %v751_v37 }
 0x6f9   :  { %3347 = vrcp.f32 %v752_v38  ;;  %v779_v23 = vand.u32 2147483648, %v752_v38  ;;  %v777_v27 = vand.u32 2147483647, %v752_v38  ;;  %vm773_vm15 = vweird.f32 %v752_v38 }
 0x6fa   :  { %3349 = vtanh.f32 %v742_v18  ;;  %v765_v28 = vor.u32 1.1754944e-38, %v764_v7  ;;  %vm763_vm0 = vcmp.eq.f32.partialorder %v762_v11, 8.507059e+37 }
 0x6fb   :  { %v780_v20 = vor.u32 1.1754944e-38, %v779_v23  ;;  %vm778_vm2 = vcmp.eq.f32.partialorder %v777_v27, 8.507059e+37 }
 0x6fe   :  { %v3346_v39 = vpop.eup %3345 }
 0x6ff   :  { %v3348_v41 = vpop.eup %3347  ;;  %v754_v42 = vmul.f32 %v3346_v39, %v751_v37  ;;  %vm759_vm9 = vweird.f32 %v3346_v39 }
 0x700   :  { %v769_v1 = vmul.f32 %v3348_v41, %v752_v38  ;;  %vm774_vm10 = vweird.f32 %v3348_v41  ;;  %vm760_vm14 = vmor %vm758_vm13, %vm759_vm9  ;;  %v3350_v31 = vpop.eup %3349 }
 0x701   :  { %v755_v3 = vsub.f32 1.0, %v754_v42  ;;  %vm775_vm1 = vmor %vm773_vm15, %vm774_vm10  ;;  %vm577_vm15 = vcmask 521220  }
 0x702   :  { %v770_v5 = vsub.f32 1.0, %v769_v1 }
 0x703   :  { %v756_v21 = vmul.f32 %v3346_v39, %v755_v3 }
 0x704   :  { %v771_v26 = vmul.f32 %v3348_v41, %v770_v5 }
 0x705   :  { %v757_v14 = vadd.f32 %v3346_v39, %v756_v21 }
 0x706   :  { %v772_v17 = vadd.f32 %v3348_v41, %v771_v26 }
 0x707   :  { %v761_v30 = vsel %vm760_vm14, %v3346_v39, %v757_v14  ;;  %vm462_vm14 = vcmask 519170  }
 0x708   :  { %v766_v43 = vsel %vm763_vm0, %v765_v28, %v761_v30  ;;  %v776_v32 = vsel %vm775_vm1, %v3348_v41, %v772_v17 }
 0x709   :  { %v781_v33 = vsel %vm778_vm2, %v780_v20, %v776_v32  ;;  %v788_v36 = vmul.f32 %v786_v29, %v766_v43 }
 0x70a   :  { %v784_v44 = vsel %vm142_vm7, %v3350_v31, %v781_v33  ;;  %v913_v33 = vld [vmem:[#allocation2 + $0x18] sm:$0x30] }
 0x70b   :  { %v789_v45 = vmul.f32 %v784_v44, %v766_v43 }
 0x70d   :  { %791 = vrot.lane.b32.xlu2 %v789_v45, %s3768_s3 }
 0x767   :  { %v792_v46 = vpop.permute.xlu2 %791 }
 0x768   :  { %v794_v47 = vadd.f32 %v792_v46, %v788_v36  ;;  %v914_v36 = vld [vmem:[#allocation2 + $0x8] sm:$0x30] }
 0x76a   :  { %3351 = vtanh.f32 %v794_v47  ;;  %v897_v39 = vrot.slane %v794_v47, 6 }
 0x770   :  { %v3352_v48 = vpop.eup %3351 }
 0x771   :  { %v796_v49 = vmul.f32 %v3352_v48, %v784_v44 }
 0x773   :  { %798 = vrot.lane.b32.xlu0 %v796_v49, %s3768_s3 }
 0x7e5   :  { %v799_v50 = vpop.permute.xlu0 %798 }
 0x7e6   :  { %801 = vst.msk [vmem:[#allocation3 + $0x8] sm:$0x3] %vm350_vm11, %v799_v50  ;;  %3197 = vmatmul.msk.f32.vlgmr.msrb.gmra.mxu0 %vm249_vm12, %v799_v50  ;;  %3198 = vmatmul.msk.f32.vlgmr.msrb.gmra.mxu1 %vm249_vm12, %v799_v50 }
 0x863   :  { %v823_v51 = vpop.f32.mrf.mxu0  ;;  %v843_v52 = vpop.f32.mrf.mxu1 }
 0x864   :  { %v848_v53 = vrot.slane %v823_v51, 6  ;;  %v849_v54 = vrot.slane %v843_v52, 6 }
 0x866   :  { %v852_v57 = vadd.f32 %v848_v53, %v802_v55  ;;  %v853_v58 = vadd.f32 %v849_v54, %v803_v56 }
 0x868   :  { %v3199_v60 = vmul.f32 -1.442695, %v852_v57  ;;  %v3200_v61 = vmul.f32 -1.442695, %v853_v58 }
 0x86a   :  { %3353 = vpow2.f32 %v3199_v60 }
 0x86b   :  { %3355 = vpow2.f32 %v3200_v61 }
 0x870   :  { %v3354_v62 = vpop.eup %3353 }
 0x871   :  { %v3356_v63 = vpop.eup %3355  ;;  %v862_v0 = vadd.f32 1.0, %v3354_v62 }
 0x872   :  { %v863_v2 = vadd.f32 1.0, %v3356_v63 }
 0x873   :  { %3357 = vrcp.f32 %v862_v0  ;;  %v875_v13 = vand.u32 2147483648, %v862_v0  ;;  %v873_v18 = vand.u32 2147483647, %v862_v0  ;;  %vm869_vm5 = vweird.f32 %v862_v0 }
 0x874   :  { %3359 = vrcp.f32 %v863_v2  ;;  %v890_v19 = vand.u32 2147483648, %v863_v2  ;;  %v888_v24 = vand.u32 2147483647, %v863_v2  ;;  %vm884_vm8 = vweird.f32 %v863_v2 }
 0x875   :  { %3361 = vtanh.f32 %v853_v58  ;;  %v876_v37 = vor.u32 1.1754944e-38, %v875_v13  ;;  %vm874_vm9 = vcmp.eq.f32.partialorder %v873_v18, 8.507059e+37 }
 0x876   :  { %v891_v42 = vor.u32 1.1754944e-38, %v890_v19  ;;  %vm889_vm13 = vcmp.eq.f32.partialorder %v888_v24, 8.507059e+37  ;;  %v1157_v24 = vld [vmem:[#allocation9 + $0x70] sm:$0xff] }
 0x877   :  { %1179 = vmatpush.msrb.mxu2 %v1157_v24 }
 0x879   :  { %v3358_v4 = vpop.eup %3357 }
 0x87a   :  { %v3360_v8 = vpop.eup %3359  ;;  %v865_v9 = vmul.f32 %v3358_v4, %v862_v0  ;;  %vm870_vm3 = vweird.f32 %v3358_v4 }
 0x87b   :  { %v880_v10 = vmul.f32 %v3360_v8, %v863_v2  ;;  %vm885_vm4 = vweird.f32 %v3360_v8  ;;  %vm871_vm6 = vmor %vm869_vm5, %vm870_vm3  ;;  %v3362_v1 = vpop.eup %3361 }
 0x87c   :  { %v866_v12 = vsub.f32 1.0, %v865_v9  ;;  %vm886_vm10 = vmor %vm884_vm8, %vm885_vm4 }
 0x87d   :  { %v881_v15 = vsub.f32 1.0, %v880_v10 }
 0x87e   :  { %v867_v16 = vmul.f32 %v3358_v4, %v866_v12 }
 0x87f   :  { %v882_v22 = vmul.f32 %v3360_v8, %v881_v15 }
 0x880   :  { %v868_v34 = vadd.f32 %v3358_v4, %v867_v16 }
 0x881   :  { %v883_v38 = vadd.f32 %v3360_v8, %v882_v22 }
 0x882   :  { %v872_v41 = vsel %vm871_vm6, %v3358_v4, %v868_v34  ;;  %v1158_v34 = vld [vmem:[#allocation9 + $0x78] sm:$0xff] }
 0x883   :  { %v877_v3 = vsel %vm874_vm9, %v876_v37, %v872_v41  ;;  %v887_v5 = vsel %vm886_vm10, %v3360_v8, %v883_v38  ;;  %1202 = vmatpush.msrb.mxu3 %v1158_v34  ;;  %v1155_v37 = vld [vmem:[#allocation9 + $0x60] sm:$0xff]  ;;  %v1156_v38 = vld [vmem:[#allocation9 + $0x68] sm:$0xff]  ;;  %v1154_v41 = vld [vmem:[#allocation9 + $0x58] sm:$0xff]  ;;  %vm692_vm9 = vcmask 523270  }
 0x884   :  { %v892_v7 = vsel %vm889_vm13, %v891_v42, %v887_v5  ;;  %v899_v21 = vmul.f32 %v897_v39, %v877_v3  ;;  %v1153_v39 = vld [vmem:[#allocation9 + $0x50] sm:$0xff]  ;;  %1180 = vmatpush.msrb.mxu2 %v1155_v37  ;;  %v1151_v42 = vld [vmem:[#allocation9 + $0x40] sm:$0xff]  ;;  %v1150_v5 = vld [vmem:[#allocation9 + $0x38] sm:$0xff] }
 0x885   :  { %v895_v11 = vsel %vm142_vm7, %v3362_v1, %v892_v7  ;;  %1203 = vmatpush.msrb.mxu3 %v1156_v38  ;;  %v1152_v1 = vld [vmem:[#allocation9 + $0x48] sm:$0xff]  ;;  %v1147_v7 = vld [vmem:[#allocation9 + $0x20] sm:$0xff] }
 0x886   :  { %v900_v23 = vmul.f32 %v895_v11, %v877_v3  ;;  %1181 = vmatpush.msrb.mxu2 %v1153_v39  ;;  %v1149_v3 = vld [vmem:[#allocation9 + $0x30] sm:$0xff] }
 0x887   :  { %1204 = vmatpush.msrb.mxu3 %v1154_v41 }
 0x888   :  { %902 = vrot.lane.b32.xlu1 %v900_v23, %s3768_s3  ;;  %1182 = vmatpush.msrb.mxu2 %v1151_v42  ;;  %v1143_v23 = vld [vmem:[#allocation9] sm:$0xff] }
 0x889   :  { %1205 = vmatpush.msrb.mxu3 %v1152_v1 }
 0x88a   :  { %1183 = vmatpush.msrb.mxu2 %v1149_v3 }
 0x88b   :  { %1206 = vmatpush.msrb.mxu3 %v1150_v5 }
 0x88c   :  { %1184 = vmatpush.msrb.mxu2 %v1147_v7 }
 0x890   :  { %459 = vrot.lane.b32.xlu1 %v4050_v40, %s3768_s3 }
 0x8fa   :  { %v903_v26 = vpop.permute.xlu1 %902 }
 0x8fb   :  { %v4123_v27 = vadd.f32 %v903_v26, %v899_v21  ;;  %v1145_v21 = vld [vmem:[#allocation9 + $0x10] sm:$0xff]  ;;  %v1144_v26 = vld [vmem:[#allocation9 + $0x8] sm:$0xff] }
 0x8fc   :  { %1185 = vmatpush.msrb.mxu2 %v1145_v21 }
 0x8fd   :  { %3363 = vtanh.f32 %v4123_v27  ;;  %v1011_v8 = vrot.slane %v4123_v27, 6  ;;  %v4145_v27 = vld [vmem:[#allocation10 + $0x70] sm:$0xff] }
 0x8fe   :  { %1186 = vmatpush.msrb.mxu2 %v1143_v23  ;;  %1247 = vmatpush.msrb.mxu0 %v4145_v27 }
 0x902   :  { %v460_v14 = vpop.permute.xlu1 %459 }
 0x903   :  { %v3364_v28 = vpop.eup %3363  ;;  %463 = vst.msk [vmem:[#allocation3] sm:$0xc] %vm462_vm14, %v460_v14  ;;  %v4147_v14 = vld [vmem:[#allocation10 + $0x78] sm:$0xff] }
 0x904   :  { %v4127_v17 = vmul.f32 %v3364_v28, %v895_v11  ;;  %v1146_v11 = vld [vmem:[#allocation9 + $0x18] sm:$0xff]  ;;  %v4149_v28 = vld [vmem:[#allocation10 + $0x60] sm:$0xff]  ;;  %1267 = vmatpush.msrb.mxu1 %v4147_v14 }
 0x905   :  { %1248 = vmatpush.msrb.mxu0 %v4149_v28 }
 0x906   :  { %v915_v29 = vrot.slane %v4127_v17, 2 }
 0x908   :  { %916 = vrot.lane.b32.xlu2 %v915_v29, %s3768_s3  ;;  %v4153_v29 = vld [vmem:[#allocation10 + $0x68] sm:$0xff] }
 0x909   :  { %1268 = vmatpush.msrb.mxu1 %v4153_v29 }
 0x910   :  { %574 = vrot.lane.b32.xlu2 %v4079_v35, %s3768_s3 }
 0x962   :  { %v917_v40 = vpop.permute.xlu2 %916 }
 0x963   :  { %3201 = vmatmul.msk.f32.vlgmr.msra.gmra.mxu2 %vm249_vm12, %v917_v40  ;;  %3202 = vmatmul.msk.f32.vlgmr.msra.gmra.mxu3 %vm249_vm12, %v917_v40  ;;  %v4155_v40 = vld [vmem:[#allocation10 + $0x50] sm:$0xff] }
 0x964   :  { %1349 = vmatpush.msra.mxu2 %v4145_v27  ;;  %1249 = vmatpush.msrb.mxu0 %v4155_v40 }
 0x966   :  { %1350 = vmatpush.msra.mxu2 %v4149_v28 }
 0x968   :  { %1351 = vmatpush.msra.mxu2 %v4155_v40 }
 0x96a   :  { %v575_v30 = vpop.permute.xlu2 %574 }
 0x96b   :  { %578 = vst.msk [vmem:[#allocation3] sm:$0x30] %vm577_vm15, %v575_v30  ;;  %v4157_v30 = vld [vmem:[#allocation10 + $0x58] sm:$0xff] }
 0x96c   :  { %1269 = vmatpush.msrb.mxu1 %v4157_v30 }
 0x9e6   :  { %v937_v20 = vpop.f32.mrf.mxu2  ;;  %v957_v31 = vpop.f32.mrf.mxu3 }
 0x9e7   :  { %v962_v43 = vrot.slane %v937_v20, 4  ;;  %v963_v32 = vrot.slane %v957_v31, 4  ;;  %v4163_v20 = vld [vmem:[#allocation10 + $0x40] sm:$0xff]  ;;  %v4165_v31 = vld [vmem:[#allocation10 + $0x48] sm:$0xff] }
 0x9e8   :  { %1250 = vmatpush.msrb.mxu0 %v4163_v20  ;;  %1270 = vmatpush.msrb.mxu1 %v4165_v31 }
 0x9e9   :  { %v966_v44 = vadd.f32 %v962_v43, %v913_v33  ;;  %v967_v45 = vadd.f32 %v963_v32, %v914_v36  ;;  %1352 = vmatpush.msra.mxu2 %v4163_v20 }
 0x9eb   :  { %v3203_v46 = vmul.f32 -1.442695, %v966_v44  ;;  %v3204_v47 = vmul.f32 -1.442695, %v967_v45 }
 0x9ed   :  { %3365 = vpow2.f32 %v3203_v46 }
 0x9ee   :  { %3367 = vpow2.f32 %v3204_v47  ;;  %v4190_v47 = vld [vmem:[#allocation10 + $0x30] sm:$0xff] }
 0x9ef   :  { %1251 = vmatpush.msrb.mxu0 %v4190_v47  ;;  %1353 = vmatpush.msra.mxu2 %v4190_v47 }
 0x9f3   :  { %v3366_v35 = vpop.eup %3365 }
 0x9f4   :  { %v3368_v48 = vpop.eup %3367  ;;  %v976_v49 = vadd.f32 1.0, %v3366_v35  ;;  %v4192_v35 = vld [vmem:[#allocation10 + $0x38] sm:$0xff] }
 0x9f5   :  { %v977_v50 = vadd.f32 1.0, %v3368_v48  ;;  %v4194_v48 = vld [vmem:[#allocation10 + $0x20] sm:$0xff]  ;;  %1271 = vmatpush.msrb.mxu1 %v4192_v35 }
 0x9f6   :  { %3369 = vrcp.f32 %v976_v49  ;;  %v989_v56 = vand.u32 2147483648, %v976_v49  ;;  %v987_v60 = vand.u32 2147483647, %v976_v49  ;;  %vm983_vm2 = vweird.f32 %v976_v49  ;;  %1252 = vmatpush.msrb.mxu0 %v4194_v48  ;;  %1354 = vmatpush.msra.mxu2 %v4194_v48 }
 0x9f7   :  { %3371 = vrcp.f32 %v977_v50  ;;  %v1004_v61 = vand.u32 2147483648, %v977_v50  ;;  %v1002_v63 = vand.u32 2147483647, %v977_v50  ;;  %vm998_vm4 = vweird.f32 %v977_v50 }
 0x9f8   :  { %3373 = vtanh.f32 %v967_v45  ;;  %v990_v2 = vor.u32 1.1754944e-38, %v989_v56  ;;  %vm988_vm5 = vcmp.eq.f32.partialorder %v987_v60, 8.507059e+37 }
 0x9f9   :  { %v1005_v10 = vor.u32 1.1754944e-38, %v1004_v61  ;;  %vm1003_vm8 = vcmp.eq.f32.partialorder %v1002_v63, 8.507059e+37 }
 0x9fc   :  { %v3370_v51 = vpop.eup %3369 }
 0x9fd   :  { %v3372_v52 = vpop.eup %3371  ;;  %v979_v53 = vmul.f32 %v3370_v51, %v976_v49  ;;  %vm984_vm0 = vweird.f32 %v3370_v51  ;;  %v4198_v49 = vld [vmem:[#allocation10 + $0x28] sm:$0xff] }
 0x9fe   :  { %v994_v54 = vmul.f32 %v3372_v52, %v977_v50  ;;  %vm999_vm1 = vweird.f32 %v3372_v52  ;;  %vm985_vm3 = vmor %vm983_vm2, %vm984_vm0  ;;  %v3374_v12 = vpop.eup %3373  ;;  %v4200_v50 = vld [vmem:[#allocation10 + $0x10] sm:$0xff]  ;;  %1272 = vmatpush.msrb.mxu1 %v4198_v49 }
 0x9ff   :  { %v980_v55 = vsub.f32 1.0, %v979_v53  ;;  %vm1000_vm6 = vmor %vm998_vm4, %vm999_vm1  ;;  %1253 = vmatpush.msrb.mxu0 %v4200_v50  ;;  %1355 = vmatpush.msra.mxu2 %v4200_v50 }
 0xa00   :  { %v995_v57 = vsub.f32 1.0, %v994_v54 }
 0xa01   :  { %v981_v58 = vmul.f32 %v3370_v51, %v980_v55  ;;  %v4258_v55 = vld [vmem:[%s4764_s6] sm:$0x3] }
 0xa02   :  { %v996_v62 = vmul.f32 %v3372_v52, %v995_v57  ;;  %v1161_v56 = vperm.slane %v4258_v55, 0  ;;  %v1162_v57 = vperm.slane %v4258_v55, 1 }
 0xa03   :  { %v982_v0 = vadd.f32 %v3370_v51, %v981_v58 }
 0xa04   :  { %v997_v4 = vadd.f32 %v3372_v52, %v996_v62 }
 0xa05   :  { %v986_v9 = vsel %vm985_vm3, %v3370_v51, %v982_v0  ;;  %v4202_v51 = vld [vmem:[#allocation10 + $0x18] sm:$0xff] }
 0xa06   :  { %v991_v13 = vsel %vm988_vm5, %v990_v2, %v986_v9  ;;  %v1001_v15 = vsel %vm1000_vm6, %v3372_v52, %v997_v4  ;;  %v4210_v52 = vld [vmem:[#allocation10 + $0x8] sm:$0xff]  ;;  %1273 = vmatpush.msrb.mxu1 %v4202_v51 }
 0xa07   :  { %v1006_v16 = vsel %vm1003_vm8, %v1005_v10, %v1001_v15  ;;  %v1013_v18 = vmul.f32 %v1011_v8, %v991_v13  ;;  %v1027_v8 = vld [vmem:[#allocation2 + $0x18] sm:$0xc0]  ;;  %v1028_v9 = vld [vmem:[#allocation2 + $0x8] sm:$0xc0] }
 0xa08   :  { %v4139_v19 = vsel %vm142_vm7, %v3374_v12, %v1006_v16  ;;  %1274 = vmatpush.msrb.mxu1 %v4210_v52 }
 0xa09   :  { %v1014_v22 = vmul.f32 %v4139_v19, %v991_v13 }
 0xa0b   :  { %1016 = vrot.lane.b32.xlu0 %v1014_v22, %s3768_s3 }
 0xa13   :  { %689 = vrot.lane.b32.xlu0 %v4105_v6, %s3768_s3  ;;  %v1148_v6 = vld [vmem:[#allocation9 + $0x28] sm:$0xff] }
 0xa14   :  { %1207 = vmatpush.msrb.mxu3 %v1148_v6 }
 0xa16   :  { %1208 = vmatpush.msrb.mxu3 %v1146_v11 }
 0xa18   :  { %1209 = vmatpush.msrb.mxu3 %v1144_v26 }
 0xa1a   :  { %1369 = vmatpush.msra.mxu3 %v4147_v14 }
 0xa1c   :  { %1370 = vmatpush.msra.mxu3 %v4153_v29 }
 0xa1e   :  { %1371 = vmatpush.msra.mxu3 %v4157_v30 }
 0xa20   :  { %1372 = vmatpush.msra.mxu3 %v4165_v31 }
 0xa22   :  { %1373 = vmatpush.msra.mxu3 %v4192_v35 }
 0xa24   :  { %1374 = vmatpush.msra.mxu3 %v4198_v49 }
 0xa26   :  { %1375 = vmatpush.msra.mxu3 %v4202_v51 }
 0xa28   :  { %1376 = vmatpush.msra.mxu3 %v4210_v52 }
 0xa7d   :  { %v1017_v43 = vpop.permute.xlu0 %1016 }
 0xa7e   :  { %v4177_v32 = vadd.f32 %v1017_v43, %v1013_v18 }
 0xa80   :  { %3375 = vtanh.f32 %v4177_v32 }
 0xa85   :  { %v690_v33 = vpop.permute.xlu0 %689 }
 0xa86   :  { %v3376_v36 = vpop.eup %3375  ;;  %693 = vst.msk [vmem:[#allocation3] sm:$0xc0] %vm692_vm9, %v690_v33 }
 0xa87   :  { %v4182_v44 = vmul.f32 %v3376_v36, %v4139_v19 }
 0xa89   :  { %v1029_v45 = vrot.slane %v4182_v44, 4 }
 0xa8b   :  { %1030 = vrot.lane.b32.xlu1 %v1029_v45, %s3768_s3 }
 0xa8d   :  { %v1141_v46 = vld [vmem:[#allocation3] sm:$0xff] }
 0xa8e   :  { %3209 = vmatmul.msk.f32.vlgmr.msrb.gmra.mxu2 %vm249_vm12, %v1141_v46  ;;  %3211 = vmatmul.msk.f32.vlgmr.msrb.gmra.mxu3 %vm249_vm12, %v1141_v46 }
 0xa8f   :  { %1597 = vmatpush.msrb.mxu3 %v4147_v14 }
 0xa91   :  { %1598 = vmatpush.msrb.mxu3 %v4153_v29 }
 0xa93   :  { %909 = vrot.lane.b32.xlu1 %v4127_v17, %s3768_s3  ;;  %v4208_v17 = vld [vmem:[#allocation10] sm:$0xff]  ;;  %1599 = vmatpush.msrb.mxu3 %v4157_v30 }
 0xa94   :  { %1254 = vmatpush.msrb.mxu0 %v4208_v17  ;;  %1356 = vmatpush.msra.mxu2 %v4208_v17 }
 0xa95   :  { %1600 = vmatpush.msrb.mxu3 %v4165_v31 }
 0xa96   :  { %1577 = vmatpush.msrb.mxu2 %v4145_v27 }
 0xa97   :  { %1601 = vmatpush.msrb.mxu3 %v4192_v35 }
 0xa98   :  { %1578 = vmatpush.msrb.mxu2 %v4149_v28 }
 0xa99   :  { %1602 = vmatpush.msrb.mxu3 %v4198_v49 }
 0xa9a   :  { %1579 = vmatpush.msrb.mxu2 %v4155_v40 }
 0xa9b   :  { %1603 = vmatpush.msrb.mxu3 %v4202_v51 }
 0xa9c   :  { %1580 = vmatpush.msrb.mxu2 %v4163_v20 }
 0xa9d   :  { %1604 = vmatpush.msrb.mxu3 %v4210_v52 }
 0xa9e   :  { %1581 = vmatpush.msrb.mxu2 %v4190_v47 }
 0xaa0   :  { %1582 = vmatpush.msrb.mxu2 %v4194_v48 }
 0xaa2   :  { %1583 = vmatpush.msrb.mxu2 %v4200_v50 }
 0xaa4   :  { %1584 = vmatpush.msrb.mxu2 %v4208_v17 }
 0xafd   :  { %v1031_v53 = vpop.permute.xlu1 %1030 }
 0xafe   :  { %3205 = vmatmul.msk.f32.vlgmr.msra.gmra.mxu0 %vm249_vm12, %v1031_v53  ;;  %3206 = vmatmul.msk.f32.vlgmr.msra.gmra.mxu1 %vm249_vm12, %v1031_v53 }
 0xaff   :  { %1463 = vmatpush.msra.mxu0 %v4145_v27  ;;  %1483 = vmatpush.msra.mxu1 %v4147_v14 }
 0xb01   :  { %1464 = vmatpush.msra.mxu0 %v4149_v28  ;;  %1484 = vmatpush.msra.mxu1 %v4153_v29 }
 0xb03   :  { %1465 = vmatpush.msra.mxu0 %v4155_v40  ;;  %1485 = vmatpush.msra.mxu1 %v4157_v30 }
 0xb05   :  { %v910_v54 = vpop.permute.xlu1 %909  ;;  %1466 = vmatpush.msra.mxu0 %v4163_v20  ;;  %1486 = vmatpush.msra.mxu1 %v4165_v31 }
 0xb06   :  { %912 = vst.msk [vmem:[#allocation3 + $0x8] sm:$0xc] %vm462_vm14, %v910_v54  ;;  %1255 = vmatmul.f32.vlgmr.msrb.gmra.mxu0 %v3767_v25  ;;  %1275 = vmatmul.f32.vlgmr.msrb.gmra.mxu1 %v3767_v25  ;;  %v1125_v54 = vrot.slane %v4177_v32, 6 }
 0xb07   :  { %1467 = vmatpush.msra.mxu0 %v4190_v47  ;;  %1487 = vmatpush.msra.mxu1 %v4192_v35 }
 0xb09   :  { %1468 = vmatpush.msra.mxu0 %v4194_v48  ;;  %1488 = vmatpush.msra.mxu1 %v4198_v49 }
 0xb0b   :  { %1469 = vmatpush.msra.mxu0 %v4200_v50  ;;  %1489 = vmatpush.msra.mxu1 %v4202_v51 }
 0xb0d   :  { %1470 = vmatpush.msra.mxu0 %v4208_v17  ;;  %1490 = vmatpush.msra.mxu1 %v4210_v52 }
 0xb0f   :  { %1691 = vmatpush.msrb.mxu0 %v4145_v27  ;;  %1711 = vmatpush.msrb.mxu1 %v4147_v14 }
 0xb11   :  { %1692 = vmatpush.msrb.mxu0 %v4149_v28  ;;  %1712 = vmatpush.msrb.mxu1 %v4153_v29  ;;  %v1188_v58 = vpop.f32.mrf.mxu2  ;;  %v1211_v60 = vpop.f32.mrf.mxu3 }
 0xb12   :  { %v1189_v61 = vadd.f32 %v1188_v58, %v1161_v56  ;;  %v1212_v62 = vadd.f32 %v1211_v60, %v1162_v57 }
 0xb13   :  { %1693 = vmatpush.msrb.mxu0 %v4155_v40  ;;  %1713 = vmatpush.msrb.mxu1 %v4157_v30 }
 0xb14   :  { %1217 = vst [vmem:[#allocation2 + $0x10] sm:$0xff] %v1189_v61 }
 0xb15   :  { %1694 = vmatpush.msrb.mxu0 %v4163_v20  ;;  %1714 = vmatpush.msrb.mxu1 %v4165_v31  ;;  %1218 = vst [vmem:[#allocation2] sm:$0xff] %v1212_v62 }
 0xb17   :  { %1695 = vmatpush.msrb.mxu0 %v4190_v47  ;;  %1715 = vmatpush.msrb.mxu1 %v4192_v35 }
 0xb19   :  { %1696 = vmatpush.msrb.mxu0 %v4194_v48  ;;  %1716 = vmatpush.msrb.mxu1 %v4198_v49 }
 0xb1b   :  { %1697 = vmatpush.msrb.mxu0 %v4200_v50  ;;  %1717 = vmatpush.msrb.mxu1 %v4202_v51  ;;  %v1237_v16 = vld [vmem:[#allocation2 + $0x10] sm:$0x3] }
 0xb1c   :  { %v1238_v19 = vld [vmem:[#allocation2] sm:$0x3] }
 0xb1d   :  { %1698 = vmatpush.msrb.mxu0 %v4208_v17  ;;  %1718 = vmatpush.msrb.mxu1 %v4210_v52 }
 0xb7b   :  { %v1051_v63 = vpop.f32.mrf.mxu0  ;;  %v1071_v0 = vpop.f32.mrf.mxu1 }
 0xb7c   :  { %v1076_v2 = vrot.slane %v1051_v63, 2  ;;  %v1077_v4 = vrot.slane %v1071_v0, 2 }
 0xb7e   :  { %v1080_v10 = vadd.f32 %v1076_v2, %v1027_v8  ;;  %v1081_v12 = vadd.f32 %v1077_v4, %v1028_v9 }
 0xb80   :  { %v3207_v13 = vmul.f32 -1.442695, %v1080_v10  ;;  %v3208_v15 = vmul.f32 -1.442695, %v1081_v12 }
 0xb82   :  { %3377 = vpow2.f32 %v3207_v13 }
 0xb83   :  { %3379 = vpow2.f32 %v3208_v15  ;;  %v1256_v18 = vpop.f32.mrf.mxu0  ;;  %v1276_v22 = vpop.f32.mrf.mxu1 }
 0xb84   :  { %v1279_v24 = vadd.f32 %v1256_v18, %v1237_v16  ;;  %v1280_v34 = vadd.f32 %v1276_v22, %v1238_v19 }
 0xb86   :  { %v3213_v37 = vmul.f32 -1.442695, %v1279_v24  ;;  %v3214_v38 = vmul.f32 -1.442695, %v1280_v34 }
 0xb88   :  { %v3378_v39 = vpop.eup %3377  ;;  %3381 = vpow2.f32 %v3213_v37 }
 0xb89   :  { %v3380_v41 = vpop.eup %3379  ;;  %v1090_v42 = vadd.f32 1.0, %v3378_v39  ;;  %3383 = vpow2.f32 %v3214_v38 }
 0xb8a   :  { %v1091_v1 = vadd.f32 1.0, %v3380_v41 }
 0xb8b   :  { %3385 = vrcp.f32 %v1090_v42  ;;  %v1101_v33 = vand.u32 2147483647, %v1090_v42  ;;  %v1103_v36 = vand.u32 2147483648, %v1090_v42  ;;  %vm1097_vm13 = vweird.f32 %v1090_v42 }
 0xb8c   :  { %3387 = vrcp.f32 %v1091_v1  ;;  %v1116_v46 = vand.u32 2147483647, %v1091_v1  ;;  %v1118_v53 = vand.u32 2147483648, %v1091_v1  ;;  %vm1112_vm0 = vweird.f32 %v1091_v1 }
 0xb8d   :  { %vm1102_vm2 = vcmp.eq.f32.partialorder %v1101_v33, 8.507059e+37  ;;  %v1104_v2 = vor.u32 1.1754944e-38, %v1103_v36 }
 0xb8e   :  { %v3382_v3 = vpop.eup %3381  ;;  %vm1117_vm4 = vcmp.eq.f32.partialorder %v1116_v46, 8.507059e+37  ;;  %v1119_v32 = vor.u32 1.1754944e-38, %v1118_v53 }
 0xb8f   :  { %v3384_v5 = vpop.eup %3383  ;;  %v4286_v7 = vadd.f32 1.0, %v3382_v3 }
 0xb90   :  { %v4288_v6 = vadd.f32 1.0, %v3384_v5 }
 0xb91   :  { %v3386_v21 = vpop.eup %3385  ;;  %3389 = vrcp.f32 %v4286_v7  ;;  %v1302_v13 = vand.u32 2147483648, %v4286_v7 }
 0xb92   :  { %v3388_v11 = vpop.eup %3387  ;;  %3391 = vrcp.f32 %v4288_v6  ;;  %v1093_v23 = vmul.f32 %v3386_v21, %v1090_v42  ;;  %vm1098_vm10 = vweird.f32 %v3386_v21  ;;  %v1317_v22 = vand.u32 2147483648, %v4288_v6 }
 0xb93   :  { %v1108_v26 = vmul.f32 %v3388_v11, %v1091_v1  ;;  %3393 = vtanh.f32 %v1081_v12  ;;  %vm1113_vm1 = vweird.f32 %v3388_v11  ;;  %vm1099_vm3 = vmor %vm1097_vm13, %vm1098_vm10  ;;  %v1300_v12 = vand.u32 2147483647, %v4286_v7 }
 0xb94   :  { %v1094_v43 = vsub.f32 1.0, %v1093_v23  ;;  %3395 = vtanh.f32 %v1280_v34  ;;  %vm1114_vm5 = vmor %vm1112_vm0, %vm1113_vm1  ;;  %v1315_v42 = vand.u32 2147483647, %v4288_v6  ;;  %vm1296_vm10 = vweird.f32 %v4286_v7 }
 0xb95   :  { %v1109_v45 = vsub.f32 1.0, %v1108_v26  ;;  %v1303_v5 = vor.u32 1.1754944e-38, %v1302_v13  ;;  %vm1311_vm0 = vweird.f32 %v4288_v6  ;;  %vm1301_vm1 = vcmp.eq.f32.partialorder %v1300_v12, 8.507059e+37 }
 0xb96   :  { %v1095_v58 = vmul.f32 %v3386_v21, %v1094_v43  ;;  %v1318_v23 = vor.u32 1.1754944e-38, %v1317_v22 }
 0xb97   :  { %v3390_v60 = vpop.eup %3389  ;;  %v1110_v61 = vmul.f32 %v3388_v11, %v1109_v45 }
 0xb98   :  { %v3392_v62 = vpop.eup %3391  ;;  %v1292_v63 = vmul.f32 %v3390_v60, %v4286_v7  ;;  %v1096_v0 = vadd.f32 %v3386_v21, %v1095_v58  ;;  %vm1297_vm6 = vweird.f32 %v3390_v60 }
 0xb99   :  { %v1307_v4 = vmul.f32 %v3392_v62, %v4288_v6  ;;  %v1111_v8 = vadd.f32 %v3388_v11, %v1110_v61  ;;  %v3394_v15 = vpop.eup %3393  ;;  %vm1312_vm8 = vweird.f32 %v3392_v62  ;;  %vm1298_vm13 = vmor %vm1296_vm10, %vm1297_vm6 }
 0xb9a   :  { %v1100_v9 = vsel %vm1099_vm3, %v3386_v21, %v1096_v0  ;;  %v1293_v10 = vsub.f32 1.0, %v1292_v63  ;;  %v3396_v24 = vpop.eup %3395  ;;  %vm1316_vm3 = vcmp.eq.f32.partialorder %v1315_v42, 8.507059e+37 }
 0xb9b   :  { %v1308_v16 = vsub.f32 1.0, %v1307_v4  ;;  %v1105_v18 = vsel %vm1102_vm2, %v1104_v2, %v1100_v9  ;;  %v1115_v19 = vsel %vm1114_vm5, %v3388_v11, %v1111_v8  ;;  %vm1313_vm2 = vmor %vm1311_vm0, %vm1312_vm8 }
 0xb9c   :  { %v1120_v34 = vsel %vm1117_vm4, %v1119_v32, %v1115_v19  ;;  %v1294_v37 = vmul.f32 %v3390_v60, %v1293_v10  ;;  %v1127_v38 = vmul.f32 %v1125_v54, %v1105_v18 }
 0xb9d   :  { %v1123_v39 = vsel %vm142_vm7, %v3394_v15, %v1120_v34  ;;  %v1309_v41 = vmul.f32 %v3392_v62, %v1308_v16  ;;  %v1337_v16 = vld [vmem:[#allocation2 + $0x10] sm:$0xc] }
 0xb9e   :  { %v1128_v1 = vmul.f32 %v1123_v39, %v1105_v18  ;;  %v1295_v3 = vadd.f32 %v3390_v60, %v1294_v37  ;;  %v1338_v18 = vld [vmem:[#allocation2] sm:$0xc] }
 0xb9f   :  { %v1310_v21 = vadd.f32 %v3392_v62, %v1309_v41 }
 0xba0   :  { %1130 = vrot.lane.b32.xlu2 %v1128_v1, %s3768_s3  ;;  %v1299_v11 = vsel %vm1298_vm13, %v3390_v60, %v1295_v3 }
 0xba1   :  { %v1304_v26 = vsel %vm1301_vm1, %v1303_v5, %v1299_v11  ;;  %v1314_v43 = vsel %vm1313_vm2, %v3392_v62, %v1310_v21 }
 0xba2   :  { %v1319_v33 = vsel %vm1316_vm3, %v1318_v23, %v1314_v43  ;;  %v1323_v58 = vmul.f32 0.0, %v1304_v26 }
 0xba3   :  { %v1322_v36 = vsel %vm142_vm7, %v3396_v24, %v1319_v33 }
 0xba4   :  { %v1324_v45 = vmul.f32 %v1322_v36, %v1304_v26 }
 0xba6   :  { %1326 = vrot.lane.b32.xlu0 %v1324_v45, %s3768_s3 }
 0xba8   :  { %1023 = vrot.lane.b32.xlu2 %v4182_v44, %s3768_s3 }
 0xbfa   :  { %v1131_v7 = vpop.permute.xlu2 %1130 }
 0xbfb   :  { %v1133_v6 = vadd.f32 %v1131_v7, %v1127_v38 }
 0xbfd   :  { %3397 = vtanh.f32 %v1133_v6 }
 0xc02   :  { %v1024_v46 = vpop.permute.xlu2 %1023 }
 0xc03   :  { %v3398_v53 = vpop.eup %3397  ;;  %1026 = vst.msk [vmem:[#allocation3 + $0x8] sm:$0x30] %vm577_vm15, %v1024_v46 }
 0xc04   :  { %v1135_v54 = vmul.f32 %v3398_v53, %v1123_v39 }
 0xc06   :  { %1137 = vrot.lane.b32.xlu0 %v1135_v54, %s3768_s3 }
 0xc18   :  { %v1327_v60 = vpop.permute.xlu0 %1326 }
 0xc19   :  { %v4311_v61 = vadd.f32 %v1327_v60, %v1323_v58 }
 0xc1b   :  { %3399 = vtanh.f32 %v4311_v61  ;;  %v1432_v7 = vrot.slane %v4311_v61, 6 }
 0xc21   :  { %v3400_v62 = vpop.eup %3399 }
 0xc22   :  { %v1331_v63 = vmul.f32 %v3400_v62, %v1322_v36 }
 0xc24   :  { %1333 = vrot.lane.b32.xlu1 %v1331_v63, %s3768_s3 }
 0xc78   :  { %v1138_v44 = vpop.permute.xlu0 %1137 }
 0xc79   :  { %1140 = vst.msk [vmem:[#allocation3 + $0x8] sm:$0xc0] %vm692_vm9, %v1138_v44 }
 0xc80   :  { %v1142_v0 = vld [vmem:[#allocation3 + $0x8] sm:$0xff] }
 0xc81   :  { %3210 = vmatmul.msk.f32.gmra.mxu2 %vm249_vm12, %v1142_v0  ;;  %3212 = vmatmul.msk.f32.gmra.mxu3 %vm249_vm12, %v1142_v0 }
 0xc96   :  { %v1334_v2 = vpop.permute.xlu1 %1333 }
 0xc97   :  { %1336 = vst.msk [vmem:[#allocation3] sm:$0x3] %vm350_vm11, %v1334_v2  ;;  %3215 = vmatmul.msk.f32.vlgmr.msra.gmra.mxu2 %vm249_vm12, %v1334_v2  ;;  %3216 = vmatmul.msk.f32.vlgmr.msra.gmra.mxu3 %vm249_vm12, %v1334_v2 }
 0xc98   :  { %1796 = vmatpush.msra.mxu2 %v4145_v27  ;;  %1816 = vmatpush.msra.mxu3 %v4147_v14 }
 0xc9a   :  { %1797 = vmatpush.msra.mxu2 %v4149_v28  ;;  %1817 = vmatpush.msra.mxu3 %v4153_v29 }
 0xc9c   :  { %1798 = vmatpush.msra.mxu2 %v4155_v40  ;;  %1818 = vmatpush.msra.mxu3 %v4157_v30 }
 0xc9e   :  { %1799 = vmatpush.msra.mxu2 %v4163_v20  ;;  %1819 = vmatpush.msra.mxu3 %v4165_v31 }
 0xca0   :  { %1800 = vmatpush.msra.mxu2 %v4190_v47  ;;  %1820 = vmatpush.msra.mxu3 %v4192_v35 }
 0xca2   :  { %1801 = vmatpush.msra.mxu2 %v4194_v48  ;;  %1821 = vmatpush.msra.mxu3 %v4198_v49 }
 0xca4   :  { %1802 = vmatpush.msra.mxu2 %v4200_v50  ;;  %1822 = vmatpush.msra.mxu3 %v4202_v51 }
 0xca6   :  { %1803 = vmatpush.msra.mxu2 %v4208_v17  ;;  %1823 = vmatpush.msra.mxu3 %v4210_v52 }
 0xd04   :  { %v1191_v4 = vpop.f32.mrf.mxu2  ;;  %v1214_v8 = vpop.f32.mrf.mxu3 }
 0xd05   :  { %v1192_v32 = vadd.f32 %v1191_v4, %v1161_v56  ;;  %v1215_v9 = vadd.f32 %v1214_v8, %v1162_v57 }
 0xd07   :  { %1219 = vst [vmem:[#allocation2 + $0x18] sm:$0xff] %v1192_v32 }
 0xd08   :  { %1220 = vst [vmem:[#allocation2 + $0x8] sm:$0xff] %v1215_v9 }
 0xd1a   :  { %v1358_v10 = vpop.f32.mrf.mxu2  ;;  %v1378_v12 = vpop.f32.mrf.mxu3 }
 0xd1b   :  { %v1383_v13 = vrot.slane %v1358_v10, 6  ;;  %v1384_v15 = vrot.slane %v1378_v12, 6 }
 0xd1d   :  { %v1387_v19 = vadd.f32 %v1383_v13, %v1337_v16  ;;  %v1388_v22 = vadd.f32 %v1384_v15, %v1338_v18  ;;  %v1448_v15 = vld [vmem:[#allocation2 + $0x10] sm:$0x30]  ;;  %v1449_v16 = vld [vmem:[#allocation2] sm:$0x30] }
 0xd1f   :  { %v3217_v24 = vmul.f32 -1.442695, %v1387_v19  ;;  %v3218_v34 = vmul.f32 -1.442695, %v1388_v22 }
 0xd21   :  { %3401 = vpow2.f32 %v3217_v24 }
 0xd22   :  { %3403 = vpow2.f32 %v3218_v34 }
 0xd27   :  { %v3402_v37 = vpop.eup %3401 }
 0xd28   :  { %v3404_v38 = vpop.eup %3403  ;;  %v1397_v56 = vadd.f32 1.0, %v3402_v37 }
 0xd29   :  { %v1398_v39 = vadd.f32 1.0, %v3404_v38 }
 0xd2a   :  { %3405 = vrcp.f32 %v1397_v56  ;;  %v1410_v3 = vand.u32 2147483648, %v1397_v56  ;;  %v1408_v11 = vand.u32 2147483647, %v1397_v56  ;;  %vm1404_vm6 = vweird.f32 %v1397_v56 }
 0xd2b   :  { %3407 = vrcp.f32 %v1398_v39  ;;  %v1425_v23 = vand.u32 2147483648, %v1398_v39  ;;  %v1423_v43 = vand.u32 2147483647, %v1398_v39  ;;  %vm1419_vm10 = vweird.f32 %v1398_v39 }
 0xd2c   :  { %3409 = vtanh.f32 %v1388_v22  ;;  %v1411_v36 = vor.u32 1.1754944e-38, %v1410_v3  ;;  %vm1409_vm13 = vcmp.eq.f32.partialorder %v1408_v11, 8.507059e+37 }
 0xd2d   :  { %v1426_v46 = vor.u32 1.1754944e-38, %v1425_v23  ;;  %vm1424_vm1 = vcmp.eq.f32.partialorder %v1423_v43, 8.507059e+37 }
 0xd30   :  { %v3406_v55 = vpop.eup %3405 }
 0xd31   :  { %v3408_v57 = vpop.eup %3407  ;;  %v1400_v41 = vmul.f32 %v3406_v55, %v1397_v56  ;;  %vm1405_vm4 = vweird.f32 %v3406_v55 }
 0xd32   :  { %v1415_v42 = vmul.f32 %v3408_v57, %v1398_v39  ;;  %vm1420_vm5 = vweird.f32 %v3408_v57  ;;  %vm1406_vm8 = vmor %vm1404_vm6, %vm1405_vm4  ;;  %v3410_v53 = vpop.eup %3409 }
 0xd33   :  { %v1401_v1 = vsub.f32 1.0, %v1400_v41  ;;  %vm1421_vm0 = vmor %vm1419_vm10, %vm1420_vm5 }
 0xd34   :  { %v1416_v5 = vsub.f32 1.0, %v1415_v42 }
 0xd35   :  { %v1402_v21 = vmul.f32 %v3406_v55, %v1401_v1 }
 0xd36   :  { %v1417_v26 = vmul.f32 %v3408_v57, %v1416_v5 }
 0xd37   :  { %v1403_v33 = vadd.f32 %v3406_v55, %v1402_v21 }
 0xd38   :  { %v1418_v45 = vadd.f32 %v3408_v57, %v1417_v26 }
 0xd39   :  { %v1407_v6 = vsel %vm1406_vm8, %v3406_v55, %v1403_v33 }
 0xd3a   :  { %v1412_v54 = vsel %vm1409_vm13, %v1411_v36, %v1407_v6  ;;  %v1422_v58 = vsel %vm1421_vm0, %v3408_v57, %v1418_v45 }
 0xd3b   :  { %v1427_v60 = vsel %vm1424_vm1, %v1426_v46, %v1422_v58  ;;  %v1434_v62 = vmul.f32 %v1432_v7, %v1412_v54 }
 0xd3c   :  { %v1430_v63 = vsel %vm142_vm7, %v3410_v53, %v1427_v60 }
 0xd3d   :  { %v1435_v44 = vmul.f32 %v1430_v63, %v1412_v54 }
 0xd3f   :  { %1437 = vrot.lane.b32.xlu2 %v1435_v44, %s3768_s3 }
 0xd99   :  { %v1438_v0 = vpop.permute.xlu2 %1437 }
 0xd9a   :  { %v4345_v2 = vadd.f32 %v1438_v0, %v1434_v62 }
 0xd9c   :  { %3411 = vtanh.f32 %v4345_v2  ;;  %v1546_v45 = vrot.slane %v4345_v2, 6 }
 0xda2   :  { %v3412_v61 = vpop.eup %3411 }
 0xda3   :  { %v4348_v4 = vmul.f32 %v3412_v61, %v1430_v63 }
 0xda5   :  { %v1450_v8 = vrot.slane %v4348_v4, 2 }
 0xda7   :  { %1451 = vrot.lane.b32.xlu0 %v1450_v8, %s3768_s3 }
 0xe19   :  { %v1452_v32 = vpop.permute.xlu0 %1451 }
 0xe1a   :  { %3219 = vmatmul.msk.f32.vlgmr.msra.gmra.mxu0 %vm249_vm12, %v1452_v32  ;;  %3220 = vmatmul.msk.f32.vlgmr.msra.gmra.mxu1 %vm249_vm12, %v1452_v32 }
 0xe1b   :  { %1910 = vmatpush.msra.mxu0 %v4145_v27  ;;  %1930 = vmatpush.msra.mxu1 %v4147_v14 }
 0xe1d   :  { %1911 = vmatpush.msra.mxu0 %v4149_v28  ;;  %1931 = vmatpush.msra.mxu1 %v4153_v29 }
 0xe1f   :  { %1912 = vmatpush.msra.mxu0 %v4155_v40  ;;  %1932 = vmatpush.msra.mxu1 %v4157_v30 }
 0xe21   :  { %1913 = vmatpush.msra.mxu0 %v4163_v20  ;;  %1933 = vmatpush.msra.mxu1 %v4165_v31 }
 0xe23   :  { %1914 = vmatpush.msra.mxu0 %v4190_v47  ;;  %1934 = vmatpush.msra.mxu1 %v4192_v35 }
 0xe25   :  { %1915 = vmatpush.msra.mxu0 %v4194_v48  ;;  %1935 = vmatpush.msra.mxu1 %v4198_v49 }
 0xe27   :  { %1916 = vmatpush.msra.mxu0 %v4200_v50  ;;  %1936 = vmatpush.msra.mxu1 %v4202_v51 }
 0xe29   :  { %1917 = vmatpush.msra.mxu0 %v4208_v17  ;;  %1937 = vmatpush.msra.mxu1 %v4210_v52 }
 0xe97   :  { %v1472_v9 = vpop.f32.mrf.mxu0  ;;  %v1492_v10 = vpop.f32.mrf.mxu1 }
 0xe98   :  { %v1497_v12 = vrot.slane %v1472_v9, 4  ;;  %v1498_v13 = vrot.slane %v1492_v10, 4 }
 0xe9a   :  { %v1501_v18 = vadd.f32 %v1497_v12, %v1448_v15  ;;  %v1502_v19 = vadd.f32 %v1498_v13, %v1449_v16 }
 0xe9c   :  { %v3221_v22 = vmul.f32 -1.442695, %v1501_v18  ;;  %v3222_v24 = vmul.f32 -1.442695, %v1502_v19 }
 0xe9e   :  { %3413 = vpow2.f32 %v3221_v22 }
 0xe9f   :  { %3415 = vpow2.f32 %v3222_v24 }
 0xea4   :  { %v3414_v34 = vpop.eup %3413 }
 0xea5   :  { %v3416_v37 = vpop.eup %3415  ;;  %v1511_v38 = vadd.f32 1.0, %v3414_v34 }
 0xea6   :  { %v1512_v56 = vadd.f32 1.0, %v3416_v37 }
 0xea7   :  { %3417 = vrcp.f32 %v1511_v38  ;;  %v1524_v1 = vand.u32 2147483648, %v1511_v38  ;;  %v1522_v21 = vand.u32 2147483647, %v1511_v38  ;;  %vm1518_vm4 = vweird.f32 %v1511_v38 }
 0xea8   :  { %3419 = vrcp.f32 %v1512_v56  ;;  %v1539_v11 = vand.u32 2147483648, %v1512_v56  ;;  %v1537_v26 = vand.u32 2147483647, %v1512_v56  ;;  %vm1533_vm6 = vweird.f32 %v1512_v56 }
 0xea9   :  { %3421 = vtanh.f32 %v1502_v19  ;;  %v1525_v33 = vor.u32 1.1754944e-38, %v1524_v1  ;;  %vm1523_vm8 = vcmp.eq.f32.partialorder %v1522_v21, 8.507059e+37 }
 0xeaa   :  { %v1540_v6 = vor.u32 1.1754944e-38, %v1539_v11  ;;  %vm1538_vm13 = vcmp.eq.f32.partialorder %v1537_v26, 8.507059e+37 }
 0xead   :  { %v3418_v39 = vpop.eup %3417 }
 0xeae   :  { %v3420_v55 = vpop.eup %3419  ;;  %v1514_v57 = vmul.f32 %v3418_v39, %v1511_v38  ;;  %vm1519_vm2 = vweird.f32 %v3418_v39 }
 0xeaf   :  { %v1529_v41 = vmul.f32 %v3420_v55, %v1512_v56  ;;  %vm1534_vm3 = vweird.f32 %v3420_v55  ;;  %vm1520_vm5 = vmor %vm1518_vm4, %vm1519_vm2  ;;  %v3422_v46 = vpop.eup %3421 }
 0xeb0   :  { %v1515_v42 = vsub.f32 1.0, %v1514_v57  ;;  %vm1535_vm10 = vmor %vm1533_vm6, %vm1534_vm3 }
 0xeb1   :  { %v1530_v3 = vsub.f32 1.0, %v1529_v41 }
 0xeb2   :  { %v1516_v5 = vmul.f32 %v3418_v39, %v1515_v42 }
 0xeb3   :  { %v1531_v23 = vmul.f32 %v3420_v55, %v1530_v3 }
 0xeb4   :  { %v1517_v43 = vadd.f32 %v3418_v39, %v1516_v5 }
 0xeb5   :  { %v1532_v36 = vadd.f32 %v3420_v55, %v1531_v23 }
 0xeb6   :  { %v1521_v7 = vsel %vm1520_vm5, %v3418_v39, %v1517_v43 }
 0xeb7   :  { %v1526_v53 = vsel %vm1523_vm8, %v1525_v33, %v1521_v7  ;;  %v1536_v54 = vsel %vm1535_vm10, %v3420_v55, %v1532_v36 }
 0xeb8   :  { %v1541_v58 = vsel %vm1538_vm13, %v1540_v6, %v1536_v54  ;;  %v1548_v60 = vmul.f32 %v1546_v45, %v1526_v53  ;;  %v1676_v45 = vld [vmem:[#allocation2 + $0x18] sm:$0x3]  ;;  %v1677_v6 = vld [vmem:[#allocation2 + $0x8] sm:$0x3] }
 0xeb9   :  { %v1544_v62 = vsel %vm142_vm7, %v3422_v46, %v1541_v58 }
 0xeba   :  { %v1549_v63 = vmul.f32 %v1544_v62, %v1526_v53 }
 0xebc   :  { %1551 = vrot.lane.b32.xlu1 %v1549_v63, %s3768_s3 }
 0xf2e   :  { %v1552_v44 = vpop.permute.xlu1 %1551 }
 0xf2f   :  { %v4374_v0 = vadd.f32 %v1552_v44, %v1548_v60 }
 0xf31   :  { %3423 = vtanh.f32 %v4374_v0  ;;  %v1660_v56 = vrot.slane %v4374_v0, 6 }
 0xf37   :  { %v3424_v2 = vpop.eup %3423 }
 0xf38   :  { %v4377_v61 = vmul.f32 %v3424_v2, %v1544_v62 }
 0xf3a   :  { %v1564_v8 = vrot.slane %v4377_v61, 4 }
 0xf3c   :  { %1565 = vrot.lane.b32.xlu2 %v1564_v8, %s3768_s3 }
 0xf96   :  { %v1566_v32 = vpop.permute.xlu2 %1565 }
 0xf97   :  { %3223 = vmatmul.msk.f32.vlgmr.msrb.gmra.mxu2 %vm249_vm12, %v1566_v32  ;;  %3224 = vmatmul.msk.f32.vlgmr.msrb.gmra.mxu3 %vm249_vm12, %v1566_v32 }
 0xf98   :  { %2024 = vmatpush.msrb.mxu2 %v4145_v27  ;;  %2044 = vmatpush.msrb.mxu3 %v4147_v14 }
 0xf9a   :  { %2025 = vmatpush.msrb.mxu2 %v4149_v28  ;;  %2045 = vmatpush.msrb.mxu3 %v4153_v29 }
 0xf9c   :  { %2026 = vmatpush.msrb.mxu2 %v4155_v40  ;;  %2046 = vmatpush.msrb.mxu3 %v4157_v30  ;;  %v1562_v40 = vld [vmem:[#allocation2 + $0x10] sm:$0xc0]  ;;  %v1563_v30 = vld [vmem:[#allocation2] sm:$0xc0] }
 0xf9e   :  { %2027 = vmatpush.msrb.mxu2 %v4163_v20  ;;  %2047 = vmatpush.msrb.mxu3 %v4165_v31 }
 0xfa0   :  { %2028 = vmatpush.msrb.mxu2 %v4190_v47  ;;  %2048 = vmatpush.msrb.mxu3 %v4192_v35 }
 0xfa2   :  { %2029 = vmatpush.msrb.mxu2 %v4194_v48  ;;  %2049 = vmatpush.msrb.mxu3 %v4198_v49 }
 0xfa4   :  { %2030 = vmatpush.msrb.mxu2 %v4200_v50  ;;  %2050 = vmatpush.msrb.mxu3 %v4202_v51 }
 0xfa6   :  { %2031 = vmatpush.msrb.mxu2 %v4208_v17  ;;  %2051 = vmatpush.msrb.mxu3 %v4210_v52 }
0x101a   :  { %v1586_v27 = vpop.f32.mrf.mxu2  ;;  %v1606_v14 = vpop.f32.mrf.mxu3 }
0x101b   :  { %v1611_v28 = vrot.slane %v1586_v27, 2  ;;  %v1612_v29 = vrot.slane %v1606_v14, 2 }
0x101d   :  { %v1615_v20 = vadd.f32 %v1611_v28, %v1562_v40  ;;  %v1616_v31 = vadd.f32 %v1612_v29, %v1563_v30 }
0x101f   :  { %v3225_v47 = vmul.f32 -1.442695, %v1615_v20  ;;  %v3226_v35 = vmul.f32 -1.442695, %v1616_v31 }
0x1021   :  { %3425 = vpow2.f32 %v3225_v47 }
0x1022   :  { %3427 = vpow2.f32 %v3226_v35 }
0x1027   :  { %v3426_v48 = vpop.eup %3425 }
0x1028   :  { %v3428_v49 = vpop.eup %3427  ;;  %v1625_v50 = vadd.f32 1.0, %v3426_v48 }
0x1029   :  { %v1626_v51 = vadd.f32 1.0, %v3428_v49 }
0x102a   :  { %3429 = vrcp.f32 %v1625_v50  ;;  %v1638_v13 = vand.u32 2147483648, %v1625_v50  ;;  %v1636_v18 = vand.u32 2147483647, %v1625_v50  ;;  %vm1632_vm2 = vweird.f32 %v1625_v50 }
0x102b   :  { %3431 = vrcp.f32 %v1626_v51  ;;  %v1653_v19 = vand.u32 2147483648, %v1626_v51  ;;  %v1651_v24 = vand.u32 2147483647, %v1626_v51  ;;  %vm1647_vm4 = vweird.f32 %v1626_v51 }
0x102c   :  { %3433 = vtanh.f32 %v1616_v31  ;;  %v1639_v37 = vor.u32 1.1754944e-38, %v1638_v13  ;;  %vm1637_vm5 = vcmp.eq.f32.partialorder %v1636_v18, 8.507059e+37 }
0x102d   :  { %v1654_v55 = vor.u32 1.1754944e-38, %v1653_v19  ;;  %vm1652_vm8 = vcmp.eq.f32.partialorder %v1651_v24, 8.507059e+37 }
0x1030   :  { %v3430_v17 = vpop.eup %3429 }
0x1031   :  { %v3432_v52 = vpop.eup %3431  ;;  %v1628_v9 = vmul.f32 %v3430_v17, %v1625_v50  ;;  %vm1633_vm0 = vweird.f32 %v3430_v17 }
0x1032   :  { %v1643_v10 = vmul.f32 %v3432_v52, %v1626_v51  ;;  %vm1648_vm1 = vweird.f32 %v3432_v52  ;;  %vm1634_vm3 = vmor %vm1632_vm2, %vm1633_vm0  ;;  %v3434_v57 = vpop.eup %3433 }
0x1033   :  { %v1629_v12 = vsub.f32 1.0, %v1628_v9  ;;  %vm1649_vm6 = vmor %vm1647_vm4, %vm1648_vm1 }
0x1034   :  { %v1644_v15 = vsub.f32 1.0, %v1643_v10 }
0x1035   :  { %v1630_v16 = vmul.f32 %v3430_v17, %v1629_v12 }
0x1036   :  { %v1645_v22 = vmul.f32 %v3432_v52, %v1644_v15 }
0x1037   :  { %v1631_v34 = vadd.f32 %v3430_v17, %v1630_v16 }
0x1038   :  { %v1646_v38 = vadd.f32 %v3432_v52, %v1645_v22 }
0x1039   :  { %v1635_v39 = vsel %vm1634_vm3, %v3430_v17, %v1631_v34 }
0x103a   :  { %v1640_v41 = vsel %vm1637_vm5, %v1639_v37, %v1635_v39  ;;  %v1650_v42 = vsel %vm1649_vm6, %v3432_v52, %v1646_v38 }
0x103b   :  { %v1655_v1 = vsel %vm1652_vm8, %v1654_v55, %v1650_v42  ;;  %v1662_v3 = vmul.f32 %v1660_v56, %v1640_v41  ;;  %v1784_v55 = vld [vmem:[#allocation2 + $0x18] sm:$0xc] }
0x103c   :  { %v1658_v5 = vsel %vm142_vm7, %v3434_v57, %v1655_v1  ;;  %v1785_v57 = vld [vmem:[#allocation2 + $0x8] sm:$0xc] }
0x103d   :  { %v1663_v21 = vmul.f32 %v1658_v5, %v1640_v41 }
0x103f   :  { %1665 = vrot.lane.b32.xlu0 %v1663_v21, %s3768_s3 }
0x10b1   :  { %v1666_v11 = vpop.permute.xlu0 %1665 }
0x10b2   :  { %v1668_v23 = vadd.f32 %v1666_v11, %v1662_v3 }
0x10b4   :  { %3435 = vtanh.f32 %v1668_v23  ;;  %v1768_v50 = vrot.slane %v1668_v23, 6 }
0x10ba   :  { %v3436_v26 = vpop.eup %3435 }
0x10bb   :  { %v4403_v43 = vmul.f32 %v3436_v26, %v1658_v5 }
0x10bd   :  { %v1678_v33 = vrot.slane %v4403_v43, 6 }
0x10bf   :  { %1679 = vrot.lane.b32.xlu1 %v1678_v33, %s3768_s3 }
0x1131   :  { %v1680_v36 = vpop.permute.xlu1 %1679 }
0x1132   :  { %3227 = vmatmul.msk.f32.vlgmr.msrb.gmra.mxu0 %vm249_vm12, %v1680_v36  ;;  %3228 = vmatmul.msk.f32.vlgmr.msrb.gmra.mxu1 %vm249_vm12, %v1680_v36 }
0x11af   :  { %v1700_v7 = vpop.f32.mrf.mxu0  ;;  %v1720_v46 = vpop.f32.mrf.mxu1 }
0x11b0   :  { %v1723_v53 = vadd.f32 %v1700_v7, %v1676_v45  ;;  %v1724_v54 = vadd.f32 %v1720_v46, %v1677_v6 }
0x11b2   :  { %v3229_v58 = vmul.f32 -1.442695, %v1723_v53  ;;  %v3230_v60 = vmul.f32 -1.442695, %v1724_v54 }
0x11b4   :  { %3437 = vpow2.f32 %v3229_v58 }
0x11b5   :  { %3439 = vpow2.f32 %v3230_v60 }
0x11ba   :  { %v3438_v62 = vpop.eup %3437 }
0x11bb   :  { %v3440_v63 = vpop.eup %3439  ;;  %v1733_v44 = vadd.f32 1.0, %v3438_v62 }
0x11bc   :  { %v1734_v0 = vadd.f32 1.0, %v3440_v63 }
0x11bd   :  { %3441 = vrcp.f32 %v1733_v44  ;;  %v1746_v29 = vand.u32 2147483648, %v1733_v44  ;;  %v1744_v30 = vand.u32 2147483647, %v1733_v44  ;;  %vm1740_vm0 = vweird.f32 %v1733_v44 }
0x11be   :  { %3443 = vrcp.f32 %v1734_v0  ;;  %v1761_v20 = vand.u32 2147483648, %v1734_v0  ;;  %v1759_v47 = vand.u32 2147483647, %v1734_v0  ;;  %vm1755_vm2 = vweird.f32 %v1734_v0 }
0x11bf   :  { %3445 = vtanh.f32 %v1724_v54  ;;  %v1747_v48 = vor.u32 1.1754944e-38, %v1746_v29  ;;  %vm1745_vm3 = vcmp.eq.f32.partialorder %v1744_v30, 8.507059e+37 }
0x11c0   :  { %v1762_v17 = vor.u32 1.1754944e-38, %v1761_v20  ;;  %vm1760_vm5 = vcmp.eq.f32.partialorder %v1759_v47, 8.507059e+37 }
0x11c3   :  { %v3442_v2 = vpop.eup %3441 }
0x11c4   :  { %v3444_v8 = vpop.eup %3443  ;;  %v1736_v32 = vmul.f32 %v3442_v2, %v1733_v44  ;;  %vm1741_vm10 = vweird.f32 %v3442_v2 }
0x11c5   :  { %v1751_v27 = vmul.f32 %v3444_v8, %v1734_v0  ;;  %vm1756_vm13 = vweird.f32 %v3444_v8  ;;  %vm1742_vm1 = vmor %vm1740_vm0, %vm1741_vm10  ;;  %v3446_v52 = vpop.eup %3445 }
0x11c6   :  { %v1737_v14 = vsub.f32 1.0, %v1736_v32  ;;  %vm1757_vm4 = vmor %vm1755_vm2, %vm1756_vm13 }
0x11c7   :  { %v1752_v28 = vsub.f32 1.0, %v1751_v27 }
0x11c8   :  { %v1738_v40 = vmul.f32 %v3442_v2, %v1737_v14 }
0x11c9   :  { %v1753_v31 = vmul.f32 %v3444_v8, %v1752_v28 }
0x11ca   :  { %v1739_v35 = vadd.f32 %v3442_v2, %v1738_v40 }
0x11cb   :  { %v1754_v49 = vadd.f32 %v3444_v8, %v1753_v31 }
0x11cc   :  { %v1743_v51 = vsel %vm1742_vm1, %v3442_v2, %v1739_v35 }
0x11cd   :  { %v1748_v9 = vsel %vm1745_vm3, %v1747_v48, %v1743_v51  ;;  %v1758_v10 = vsel %vm1757_vm4, %v3444_v8, %v1754_v49 }
0x11ce   :  { %v1763_v12 = vsel %vm1760_vm5, %v1762_v17, %v1758_v10  ;;  %v1770_v13 = vmul.f32 %v1768_v50, %v1748_v9 }
0x11cf   :  { %v1766_v15 = vsel %vm142_vm7, %v3446_v52, %v1763_v12  ;;  %v1895_v12 = vld [vmem:[#allocation2 + $0x18] sm:$0x30] }
0x11d0   :  { %v1771_v16 = vmul.f32 %v1766_v15, %v1748_v9 }
0x11d2   :  { %1773 = vrot.lane.b32.xlu2 %v1771_v16, %s3768_s3 }
0x122c   :  { %v1774_v18 = vpop.permute.xlu2 %1773 }
0x122d   :  { %v1776_v19 = vadd.f32 %v1774_v18, %v1770_v13  ;;  %v1896_v13 = vld [vmem:[#allocation2 + $0x8] sm:$0x30] }
0x122f   :  { %3447 = vtanh.f32 %v1776_v19  ;;  %v1879_v2 = vrot.slane %v1776_v19, 6 }
0x1235   :  { %v3448_v22 = vpop.eup %3447 }
0x1236   :  { %v1778_v24 = vmul.f32 %v3448_v22, %v1766_v15 }
0x1238   :  { %1780 = vrot.lane.b32.xlu0 %v1778_v24, %s3768_s3 }
0x12aa   :  { %v1781_v34 = vpop.permute.xlu0 %1780 }
0x12ab   :  { %1783 = vst.msk [vmem:[#allocation3 + $0x8] sm:$0x3] %vm350_vm11, %v1781_v34  ;;  %3231 = vmatmul.msk.f32.vlgmr.msra.gmra.mxu2 %vm249_vm12, %v1781_v34  ;;  %3232 = vmatmul.msk.f32.vlgmr.msra.gmra.mxu3 %vm249_vm12, %v1781_v34 }
0x132e   :  { %v1805_v37 = vpop.f32.mrf.mxu2  ;;  %v1825_v38 = vpop.f32.mrf.mxu3 }
0x132f   :  { %v1830_v56 = vrot.slane %v1805_v37, 6  ;;  %v1831_v39 = vrot.slane %v1825_v38, 6 }
0x1331   :  { %v1834_v41 = vadd.f32 %v1830_v56, %v1784_v55  ;;  %v1835_v42 = vadd.f32 %v1831_v39, %v1785_v57 }
0x1333   :  { %v3233_v1 = vmul.f32 -1.442695, %v1834_v41  ;;  %v3234_v3 = vmul.f32 -1.442695, %v1835_v42 }
0x1335   :  { %3449 = vpow2.f32 %v3233_v1 }
0x1336   :  { %3451 = vpow2.f32 %v3234_v3 }
0x133b   :  { %v3450_v5 = vpop.eup %3449 }
0x133c   :  { %v3452_v21 = vpop.eup %3451  ;;  %v1844_v11 = vadd.f32 1.0, %v3450_v5 }
0x133d   :  { %v1845_v23 = vadd.f32 1.0, %v3452_v21 }
0x133e   :  { %3453 = vrcp.f32 %v1844_v11  ;;  %v1857_v6 = vand.u32 2147483648, %v1844_v11  ;;  %v1855_v54 = vand.u32 2147483647, %v1844_v11  ;;  %vm1851_vm10 = vweird.f32 %v1844_v11 }
0x133f   :  { %3455 = vrcp.f32 %v1845_v23  ;;  %v1872_v58 = vand.u32 2147483648, %v1845_v23  ;;  %v1870_v62 = vand.u32 2147483647, %v1845_v23  ;;  %vm1866_vm0 = vweird.f32 %v1845_v23 }
0x1340   :  { %3457 = vtanh.f32 %v1835_v42  ;;  %v1858_v44 = vor.u32 1.1754944e-38, %v1857_v6  ;;  %vm1856_vm1 = vcmp.eq.f32.partialorder %v1855_v54, 8.507059e+37 }
0x1341   :  { %v1873_v32 = vor.u32 1.1754944e-38, %v1872_v58  ;;  %vm1871_vm3 = vcmp.eq.f32.partialorder %v1870_v62, 8.507059e+37 }
0x1344   :  { %v3454_v26 = vpop.eup %3453 }
0x1345   :  { %v3456_v33 = vpop.eup %3455  ;;  %v1847_v36 = vmul.f32 %v3454_v26, %v1844_v11  ;;  %vm1852_vm6 = vweird.f32 %v3454_v26 }
0x1346   :  { %v1862_v45 = vmul.f32 %v3456_v33, %v1845_v23  ;;  %vm1867_vm8 = vweird.f32 %v3456_v33  ;;  %vm1853_vm13 = vmor %vm1851_vm10, %vm1852_vm6  ;;  %v3458_v27 = vpop.eup %3457 }
0x1347   :  { %v1848_v7 = vsub.f32 1.0, %v1847_v36  ;;  %vm1868_vm2 = vmor %vm1866_vm0, %vm1867_vm8 }
0x1348   :  { %v1863_v46 = vsub.f32 1.0, %v1862_v45 }
0x1349   :  { %v1849_v53 = vmul.f32 %v3454_v26, %v1848_v7 }
0x134a   :  { %v1864_v60 = vmul.f32 %v3456_v33, %v1863_v46 }
0x134b   :  { %v1850_v63 = vadd.f32 %v3454_v26, %v1849_v53 }
0x134c   :  { %v1865_v0 = vadd.f32 %v3456_v33, %v1864_v60 }
0x134d   :  { %v1854_v8 = vsel %vm1853_vm13, %v3454_v26, %v1850_v63 }
0x134e   :  { %v1859_v14 = vsel %vm1856_vm1, %v1858_v44, %v1854_v8  ;;  %v1869_v28 = vsel %vm1868_vm2, %v3456_v33, %v1865_v0 }
0x134f   :  { %v1874_v29 = vsel %vm1871_vm3, %v1873_v32, %v1869_v28  ;;  %v1881_v40 = vmul.f32 %v1879_v2, %v1859_v14  ;;  %v2140_v32 = vld [vmem:[#allocation12 + $0x78] sm:$0xff]  ;;  %v2135_v28 = vld [vmem:[#allocation12 + $0x50] sm:$0xff] }
0x1350   :  { %v1877_v30 = vsel %vm142_vm7, %v3458_v27, %v1874_v29  ;;  %v2137_v27 = vld [vmem:[#allocation12 + $0x60] sm:$0xff]  ;;  %2184 = vmatpush.msrb.mxu1 %v2140_v32  ;;  %v2136_v29 = vld [vmem:[#allocation12 + $0x58] sm:$0xff] }
0x1351   :  { %v1882_v20 = vmul.f32 %v1877_v30, %v1859_v14  ;;  %v2138_v14 = vld [vmem:[#allocation12 + $0x68] sm:$0xff] }
0x1352   :  { %2185 = vmatpush.msrb.mxu1 %v2138_v14 }
0x1353   :  { %1884 = vrot.lane.b32.xlu1 %v1882_v20, %s3768_s3  ;;  %v4449_v20 = vld [vmem:[#allocation13 + $0x60] sm:$0xff] }
0x1354   :  { %2186 = vmatpush.msrb.mxu1 %v2136_v29 }
0x13c5   :  { %v1885_v31 = vpop.permute.xlu1 %1884 }
0x13c6   :  { %v1887_v47 = vadd.f32 %v1885_v31, %v1881_v40  ;;  %v4445_v40 = vld [vmem:[#allocation13 + $0x70] sm:$0xff]  ;;  %v2133_v31 = vld [vmem:[#allocation12 + $0x40] sm:$0xff] }
0x13c7   :  { %2229 = vmatpush.msra.mxu2 %v4445_v40 }
0x13c8   :  { %3459 = vtanh.f32 %v1887_v47  ;;  %v1993_v33 = vrot.slane %v1887_v47, 6  ;;  %v2134_v47 = vld [vmem:[#allocation12 + $0x48] sm:$0xff] }
0x13c9   :  { %2230 = vmatpush.msra.mxu2 %v4449_v20  ;;  %2187 = vmatpush.msrb.mxu1 %v2134_v47 }
0x13ce   :  { %v3460_v35 = vpop.eup %3459 }
0x13cf   :  { %v4419_v48 = vmul.f32 %v3460_v35, %v1877_v30  ;;  %v4447_v30 = vld [vmem:[#allocation13 + $0x78] sm:$0xff]  ;;  %v2131_v35 = vld [vmem:[#allocation12 + $0x30] sm:$0xff] }
0x13d0   :  { %2249 = vmatpush.msra.mxu3 %v4447_v30 }
0x13d1   :  { %v1897_v49 = vrot.slane %v4419_v48, 2 }
0x13d3   :  { %1898 = vrot.lane.b32.xlu2 %v1897_v49, %s3768_s3  ;;  %v4457_v49 = vld [vmem:[#allocation13 + $0x50] sm:$0xff] }
0x13d4   :  { %2231 = vmatpush.msra.mxu2 %v4457_v49 }
0x13db   :  { %1444 = vrot.lane.b32.xlu2 %v4348_v4, %s3768_s3 }
0x142d   :  { %v1899_v50 = vpop.permute.xlu2 %1898 }
0x142e   :  { %3235 = vmatmul.msk.f32.vlgmr.msra.gmra.mxu0 %vm249_vm12, %v1899_v50  ;;  %3236 = vmatmul.msk.f32.vlgmr.msra.gmra.mxu1 %vm249_vm12, %v1899_v50  ;;  %v4459_v50 = vld [vmem:[#allocation13 + $0x58] sm:$0xff] }
0x1435   :  { %v1445_v51 = vpop.permute.xlu2 %1444 }
0x1436   :  { %1447 = vst.msk [vmem:[#allocation3] sm:$0xc] %vm462_vm14, %v1445_v51  ;;  %v2129_v51 = vld [vmem:[#allocation12 + $0x20] sm:$0xff] }
0x14ab   :  { %v1919_v17 = vpop.f32.mrf.mxu0  ;;  %v1939_v52 = vpop.f32.mrf.mxu1 }
0x14ac   :  { %v1944_v9 = vrot.slane %v1919_v17, 4  ;;  %v1945_v10 = vrot.slane %v1939_v52, 4  ;;  %v2130_v17 = vld [vmem:[#allocation12 + $0x28] sm:$0xff]  ;;  %v4463_v52 = vld [vmem:[#allocation13 + $0x40] sm:$0xff] }
0x14ad   :  { %2232 = vmatpush.msra.mxu2 %v4463_v52 }
0x14ae   :  { %v1948_v15 = vadd.f32 %v1944_v9, %v1895_v12  ;;  %v1949_v16 = vadd.f32 %v1945_v10, %v1896_v13  ;;  %v4465_v9 = vld [vmem:[#allocation13 + $0x48] sm:$0xff]  ;;  %v2127_v10 = vld [vmem:[#allocation12 + $0x10] sm:$0xff]  ;;  %v2128_v12 = vld [vmem:[#allocation12 + $0x18] sm:$0xff] }
0x14af   :  { %v4467_v13 = vld [vmem:[#allocation13 + $0x30] sm:$0xff] }
0x14b0   :  { %v3237_v18 = vmul.f32 -1.442695, %v1948_v15  ;;  %v3238_v19 = vmul.f32 -1.442695, %v1949_v16  ;;  %v4469_v15 = vld [vmem:[#allocation13 + $0x38] sm:$0xff]  ;;  %2233 = vmatpush.msra.mxu2 %v4467_v13 }
0x14b2   :  { %3461 = vpow2.f32 %v3237_v18  ;;  %v2126_v18 = vld [vmem:[#allocation12 + $0x8] sm:$0xff] }
0x14b3   :  { %3463 = vpow2.f32 %v3238_v19  ;;  %v4473_v19 = vld [vmem:[#allocation13 + $0x20] sm:$0xff] }
0x14b4   :  { %2234 = vmatpush.msra.mxu2 %v4473_v19 }
0x14b8   :  { %v3462_v4 = vpop.eup %3461 }
0x14b9   :  { %v3464_v22 = vpop.eup %3463  ;;  %v1958_v24 = vadd.f32 1.0, %v3462_v4  ;;  %v4475_v4 = vld [vmem:[#allocation13 + $0x28] sm:$0xff] }
0x14ba   :  { %v1959_v34 = vadd.f32 1.0, %v3464_v22  ;;  %v4481_v22 = vld [vmem:[#allocation13 + $0x10] sm:$0xff] }
0x14bb   :  { %3465 = vrcp.f32 %v1958_v24  ;;  %v1971_v57 = vand.u32 2147483648, %v1958_v24  ;;  %v1969_v1 = vand.u32 2147483647, %v1958_v24  ;;  %vm1965_vm6 = vweird.f32 %v1958_v24  ;;  %2235 = vmatpush.msra.mxu2 %v4481_v22 }
0x14bc   :  { %3467 = vrcp.f32 %v1959_v34  ;;  %v1986_v3 = vand.u32 2147483648, %v1959_v34  ;;  %v1984_v21 = vand.u32 2147483647, %v1959_v34  ;;  %vm1980_vm10 = vweird.f32 %v1959_v34 }
0x14bd   :  { %3469 = vtanh.f32 %v1949_v16  ;;  %v1972_v23 = vor.u32 1.1754944e-38, %v1971_v57  ;;  %vm1970_vm13 = vcmp.eq.f32.partialorder %v1969_v1, 8.507059e+37  ;;  %v2125_v16 = vld [vmem:[#allocation12] sm:$0xff]  ;;  %v2009_v1 = vld [vmem:[#allocation2 + $0x18] sm:$0xc0] }
0x14be   :  { %v1987_v45 = vor.u32 1.1754944e-38, %v1986_v3  ;;  %vm1985_vm1 = vcmp.eq.f32.partialorder %v1984_v21, 8.507059e+37  ;;  %v2010_v3 = vld [vmem:[#allocation2 + $0x8] sm:$0xc0] }
0x14c1   :  { %v3466_v37 = vpop.eup %3465 }
0x14c2   :  { %v3468_v38 = vpop.eup %3467  ;;  %v1961_v56 = vmul.f32 %v3466_v37, %v1958_v24  ;;  %vm1966_vm4 = vweird.f32 %v3466_v37  ;;  %v4483_v24 = vld [vmem:[#allocation13 + $0x18] sm:$0xff] }
0x14c3   :  { %v1976_v39 = vmul.f32 %v3468_v38, %v1959_v34  ;;  %vm1981_vm5 = vweird.f32 %v3468_v38  ;;  %vm1967_vm8 = vmor %vm1965_vm6, %vm1966_vm4  ;;  %v3470_v7 = vpop.eup %3469  ;;  %v4485_v34 = vld [vmem:[#allocation13] sm:$0xff] }
0x14c4   :  { %v1962_v55 = vsub.f32 1.0, %v1961_v56  ;;  %vm1982_vm0 = vmor %vm1980_vm10, %vm1981_vm5  ;;  %2236 = vmatpush.msra.mxu2 %v4485_v34 }
0x14c5   :  { %v1977_v41 = vsub.f32 1.0, %v1976_v39 }
0x14c6   :  { %v1963_v42 = vmul.f32 %v3466_v37, %v1962_v55 }
0x14c7   :  { %v1978_v5 = vmul.f32 %v3468_v38, %v1977_v41 }
0x14c8   :  { %v1964_v11 = vadd.f32 %v3466_v37, %v1963_v42 }
0x14c9   :  { %v1979_v26 = vadd.f32 %v3468_v38, %v1978_v5 }
0x14ca   :  { %v1968_v36 = vsel %vm1967_vm8, %v3466_v37, %v1964_v11  ;;  %v4487_v37 = vld [vmem:[#allocation13 + $0x8] sm:$0xff]  ;;  %v4568_v11 = vld [vmem:[%s4767_s9] sm:$0x3] }
0x14cb   :  { %v1973_v6 = vsel %vm1970_vm13, %v1972_v23, %v1968_v36  ;;  %v1983_v46 = vsel %vm1982_vm0, %v3468_v38, %v1979_v26  ;;  %v2144_v36 = vperm.slane %v4568_v11, 1 }
0x14cc   :  { %v1988_v53 = vsel %vm1985_vm1, %v1987_v45, %v1983_v46  ;;  %v1995_v54 = vmul.f32 %v1993_v33, %v1973_v6  ;;  %v2143_v33 = vperm.slane %v4568_v11, 0 }
0x14cd   :  { %v1991_v58 = vsel %vm142_vm7, %v3470_v7, %v1988_v53 }
0x14ce   :  { %v1996_v60 = vmul.f32 %v1991_v58, %v1973_v6 }
0x14d0   :  { %1998 = vrot.lane.b32.xlu0 %v1996_v60, %s3768_s3 }
0x14d8   :  { %1558 = vrot.lane.b32.xlu0 %v4377_v61, %s3768_s3  ;;  %v2139_v61 = vld [vmem:[#allocation12 + $0x70] sm:$0xff] }
0x14d9   :  { %2161 = vmatpush.msrb.mxu0 %v2139_v61 }
0x14db   :  { %2162 = vmatpush.msrb.mxu0 %v2137_v27 }
0x14dd   :  { %2163 = vmatpush.msrb.mxu0 %v2135_v28 }
0x14df   :  { %2164 = vmatpush.msrb.mxu0 %v2133_v31 }
0x14e1   :  { %2165 = vmatpush.msrb.mxu0 %v2131_v35 }
0x14e3   :  { %2166 = vmatpush.msrb.mxu0 %v2129_v51 }
0x14e5   :  { %2167 = vmatpush.msrb.mxu0 %v2127_v10 }
0x14e7   :  { %2168 = vmatpush.msrb.mxu0 %v2125_v16 }
0x14e9   :  { %2331 = vmatpush.msra.mxu0 %v4445_v40 }
0x14eb   :  { %2332 = vmatpush.msra.mxu0 %v4449_v20 }
0x14ed   :  { %2333 = vmatpush.msra.mxu0 %v4457_v49 }
0x14ef   :  { %2334 = vmatpush.msra.mxu0 %v4463_v52 }
0x14f1   :  { %2335 = vmatpush.msra.mxu0 %v4467_v13 }
0x14f3   :  { %2336 = vmatpush.msra.mxu0 %v4473_v19 }
0x14f5   :  { %2337 = vmatpush.msra.mxu0 %v4481_v22 }
0x14f7   :  { %2338 = vmatpush.msra.mxu0 %v4485_v34 }
0x1542   :  { %v1999_v62 = vpop.permute.xlu0 %1998 }
0x1543   :  { %v4433_v63 = vadd.f32 %v1999_v62, %v1995_v54 }
0x1545   :  { %3471 = vtanh.f32 %v4433_v63 }
0x154a   :  { %v1559_v44 = vpop.permute.xlu0 %1558 }
0x154b   :  { %v3472_v0 = vpop.eup %3471  ;;  %1561 = vst.msk [vmem:[#allocation3] sm:$0x30] %vm577_vm15, %v1559_v44 }
0x154c   :  { %v4437_v2 = vmul.f32 %v3472_v0, %v1991_v58 }
0x154e   :  { %v2011_v8 = vrot.slane %v4437_v2, 4 }
0x1550   :  { %2012 = vrot.lane.b32.xlu1 %v2011_v8, %s3768_s3 }
0x1558   :  { %1672 = vrot.lane.b32.xlu1 %v4403_v43, %s3768_s3  ;;  %v4451_v43 = vld [vmem:[#allocation13 + $0x68] sm:$0xff] }
0x1559   :  { %2250 = vmatpush.msra.mxu3 %v4451_v43 }
0x155b   :  { %2251 = vmatpush.msra.mxu3 %v4459_v50 }
0x155d   :  { %2252 = vmatpush.msra.mxu3 %v4465_v9 }
0x155f   :  { %2253 = vmatpush.msra.mxu3 %v4469_v15 }
0x1560   :  { %1891 = vrot.lane.b32.xlu1 %v4419_v48, %s3768_s3  ;;  %v2132_v48 = vld [vmem:[#allocation12 + $0x38] sm:$0xff] }
0x1561   :  { %2188 = vmatpush.msrb.mxu1 %v2132_v48  ;;  %2254 = vmatpush.msra.mxu3 %v4475_v4 }
0x1563   :  { %2189 = vmatpush.msrb.mxu1 %v2130_v17  ;;  %2255 = vmatpush.msra.mxu3 %v4483_v24 }
0x1565   :  { %2190 = vmatpush.msrb.mxu1 %v2128_v12  ;;  %2256 = vmatpush.msra.mxu3 %v4487_v37 }
0x1567   :  { %2191 = vmatpush.msrb.mxu1 %v2126_v18 }
0x1569   :  { %2351 = vmatpush.msra.mxu1 %v4447_v30 }
0x156b   :  { %2352 = vmatpush.msra.mxu1 %v4451_v43 }
0x156d   :  { %2353 = vmatpush.msra.mxu1 %v4459_v50 }
0x156f   :  { %2354 = vmatpush.msra.mxu1 %v4465_v9 }
0x1571   :  { %2355 = vmatpush.msra.mxu1 %v4469_v15 }
0x1573   :  { %2356 = vmatpush.msra.mxu1 %v4475_v4 }
0x1575   :  { %2357 = vmatpush.msra.mxu1 %v4483_v24 }
0x1577   :  { %2358 = vmatpush.msra.mxu1 %v4487_v37 }
0x15c2   :  { %v2013_v38 = vpop.permute.xlu1 %2012 }
0x15c3   :  { %3239 = vmatmul.msk.f32.vlgmr.msrb.gmra.mxu2 %vm249_vm12, %v2013_v38  ;;  %3240 = vmatmul.msk.f32.vlgmr.msrb.gmra.mxu3 %vm249_vm12, %v2013_v38 }
0x15c4   :  { %2445 = vmatpush.msrb.mxu2 %v4445_v40  ;;  %2465 = vmatpush.msrb.mxu3 %v4447_v30 }
0x15c6   :  { %2446 = vmatpush.msrb.mxu2 %v4449_v20  ;;  %2466 = vmatpush.msrb.mxu3 %v4451_v43 }
0x15c8   :  { %2447 = vmatpush.msrb.mxu2 %v4457_v49  ;;  %2467 = vmatpush.msrb.mxu3 %v4459_v50 }
0x15ca   :  { %v1673_v56 = vpop.permute.xlu1 %1672  ;;  %2448 = vmatpush.msrb.mxu2 %v4463_v52  ;;  %2468 = vmatpush.msrb.mxu3 %v4465_v9 }
0x15cb   :  { %1675 = vst.msk [vmem:[#allocation3] sm:$0xc0] %vm692_vm9, %v1673_v56  ;;  %2237 = vmatmul.f32.vlgmr.msra.gmra.mxu2 %v3767_v25  ;;  %2257 = vmatmul.f32.vlgmr.msra.gmra.mxu3 %v3767_v25 }
0x15cc   :  { %2449 = vmatpush.msrb.mxu2 %v4467_v13  ;;  %2469 = vmatpush.msrb.mxu3 %v4469_v15 }
0x15ce   :  { %2450 = vmatpush.msrb.mxu2 %v4473_v19  ;;  %2470 = vmatpush.msrb.mxu3 %v4475_v4 }
0x15d0   :  { %2451 = vmatpush.msrb.mxu2 %v4481_v22  ;;  %2471 = vmatpush.msrb.mxu3 %v4483_v24 }
0x15d2   :  { %v1892_v39 = vpop.permute.xlu1 %1891  ;;  %v2123_v55 = vld [vmem:[#allocation3] sm:$0xff]  ;;  %2452 = vmatpush.msrb.mxu2 %v4485_v34  ;;  %2472 = vmatpush.msrb.mxu3 %v4487_v37 }
0x15d3   :  { %1894 = vst.msk [vmem:[#allocation3 + $0x8] sm:$0xc] %vm462_vm14, %v1892_v39  ;;  %3243 = vmatmul.msk.f32.vlgmr.msrb.gmra.mxu0 %vm249_vm12, %v2123_v55  ;;  %3245 = vmatmul.msk.f32.vlgmr.msrb.gmra.mxu1 %vm249_vm12, %v2123_v55 }
0x15d4   :  { %2559 = vmatpush.msrb.mxu0 %v4445_v40  ;;  %2579 = vmatpush.msrb.mxu1 %v4447_v30 }
0x15d5   :  { %2673 = vmatpush.msra.mxu2 %v4445_v40  ;;  %2693 = vmatpush.msra.mxu3 %v4447_v30 }
0x15d6   :  { %2560 = vmatpush.msrb.mxu0 %v4449_v20  ;;  %2580 = vmatpush.msrb.mxu1 %v4451_v43 }
0x15d7   :  { %2674 = vmatpush.msra.mxu2 %v4449_v20  ;;  %2694 = vmatpush.msra.mxu3 %v4451_v43 }
0x15d8   :  { %2561 = vmatpush.msrb.mxu0 %v4457_v49  ;;  %2581 = vmatpush.msrb.mxu1 %v4459_v50 }
0x15d9   :  { %2675 = vmatpush.msra.mxu2 %v4457_v49  ;;  %2695 = vmatpush.msra.mxu3 %v4459_v50 }
0x15da   :  { %2562 = vmatpush.msrb.mxu0 %v4463_v52  ;;  %2582 = vmatpush.msrb.mxu1 %v4465_v9 }
0x15db   :  { %2676 = vmatpush.msra.mxu2 %v4463_v52  ;;  %2696 = vmatpush.msra.mxu3 %v4465_v9 }
0x15dc   :  { %2563 = vmatpush.msrb.mxu0 %v4467_v13  ;;  %2583 = vmatpush.msrb.mxu1 %v4469_v15 }
0x15dd   :  { %2677 = vmatpush.msra.mxu2 %v4467_v13  ;;  %2697 = vmatpush.msra.mxu3 %v4469_v15 }
0x15de   :  { %2564 = vmatpush.msrb.mxu0 %v4473_v19  ;;  %2584 = vmatpush.msrb.mxu1 %v4475_v4 }
0x15df   :  { %2678 = vmatpush.msra.mxu2 %v4473_v19  ;;  %2698 = vmatpush.msra.mxu3 %v4475_v4 }
0x15e0   :  { %2565 = vmatpush.msrb.mxu0 %v4481_v22  ;;  %2585 = vmatpush.msrb.mxu1 %v4483_v24 }
0x15e1   :  { %2679 = vmatpush.msra.mxu2 %v4481_v22  ;;  %2699 = vmatpush.msra.mxu3 %v4483_v24 }
0x15e2   :  { %2566 = vmatpush.msrb.mxu0 %v4485_v34  ;;  %2586 = vmatpush.msrb.mxu1 %v4487_v37 }
0x15e3   :  { %2680 = vmatpush.msra.mxu2 %v4485_v34  ;;  %2700 = vmatpush.msra.mxu3 %v4487_v37 }
0x1646   :  { %v2033_v25 = vpop.f32.mrf.mxu2  ;;  %v2053_v57 = vpop.f32.mrf.mxu3 }
0x1647   :  { %v2058_v41 = vrot.slane %v2033_v25, 2  ;;  %v2059_v42 = vrot.slane %v2053_v57, 2  ;;  %v2107_v57 = vrot.slane %v4433_v63, 6 }
0x1649   :  { %v2062_v5 = vadd.f32 %v2058_v41, %v2009_v1  ;;  %v2063_v21 = vadd.f32 %v2059_v42, %v2010_v3 }
0x164b   :  { %v3241_v23 = vmul.f32 -1.442695, %v2062_v5  ;;  %v3242_v26 = vmul.f32 -1.442695, %v2063_v21 }
0x164d   :  { %3473 = vpow2.f32 %v3241_v23 }
0x164e   :  { %3475 = vpow2.f32 %v3242_v26  ;;  %v2238_v62 = vpop.f32.mrf.mxu2  ;;  %v2258_v44 = vpop.f32.mrf.mxu3 }
0x1650   :  { %v2170_v45 = vpop.f32.mrf.mxu0  ;;  %v2193_v7 = vpop.f32.mrf.mxu1 }
0x1651   :  { %v2171_v6 = vadd.f32 %v2170_v45, %v2143_v33  ;;  %v2194_v46 = vadd.f32 %v2193_v7, %v2144_v36 }
0x1653   :  { %v3474_v53 = vpop.eup %3473  ;;  %2199 = vst [vmem:[#allocation2 + $0x10] sm:$0xff] %v2171_v6 }
0x1654   :  { %v3476_v54 = vpop.eup %3475  ;;  %v2072_v58 = vadd.f32 1.0, %v3474_v53  ;;  %2200 = vst [vmem:[#allocation2] sm:$0xff] %v2194_v46 }
0x1655   :  { %v2073_v60 = vadd.f32 1.0, %v3476_v54 }
0x1656   :  { %3477 = vrcp.f32 %v2072_v58  ;;  %v2085_v48 = vand.u32 2147483648, %v2072_v58  ;;  %v2083_v10 = vand.u32 2147483647, %v2072_v58  ;;  %vm2079_vm4 = vweird.f32 %v2072_v58 }
0x1657   :  { %3479 = vrcp.f32 %v2073_v60  ;;  %v2100_v12 = vand.u32 2147483648, %v2073_v60  ;;  %v2098_v18 = vand.u32 2147483647, %v2073_v60  ;;  %vm2094_vm6 = vweird.f32 %v2073_v60 }
0x1658   :  { %3481 = vtanh.f32 %v2063_v21  ;;  %v2086_v39 = vor.u32 1.1754944e-38, %v2085_v48  ;;  %vm2084_vm8 = vcmp.eq.f32.partialorder %v2083_v10, 8.507059e+37 }
0x1659   :  { %v2101_v42 = vor.u32 1.1754944e-38, %v2100_v12  ;;  %vm2099_vm13 = vcmp.eq.f32.partialorder %v2098_v18, 8.507059e+37 }
0x165a   :  { %v2219_v0 = vld [vmem:[#allocation2 + $0x10] sm:$0x3] }
0x165b   :  { %v2261_v8 = vadd.f32 %v2238_v62, %v2219_v0  ;;  %v2220_v61 = vld [vmem:[#allocation2] sm:$0x3] }
0x165c   :  { %v3478_v32 = vpop.eup %3477  ;;  %v2262_v27 = vadd.f32 %v2258_v44, %v2220_v61 }
0x165d   :  { %v3480_v14 = vpop.eup %3479  ;;  %v3247_v28 = vmul.f32 -1.442695, %v2261_v8  ;;  %v2075_v29 = vmul.f32 %v3478_v32, %v2072_v58  ;;  %vm2080_vm2 = vweird.f32 %v3478_v32 }
0x165e   :  { %v3248_v31 = vmul.f32 -1.442695, %v2262_v27  ;;  %v2090_v47 = vmul.f32 %v3480_v14, %v2073_v60  ;;  %vm2095_vm3 = vweird.f32 %v3480_v14  ;;  %v3482_v56 = vpop.eup %3481  ;;  %vm2081_vm5 = vmor %vm2079_vm4, %vm2080_vm2 }
0x165f   :  { %3483 = vpow2.f32 %v3247_v28  ;;  %v2076_v35 = vsub.f32 1.0, %v2075_v29  ;;  %vm2096_vm10 = vmor %vm2094_vm6, %vm2095_vm3 }
0x1660   :  { %3485 = vpow2.f32 %v3248_v31  ;;  %v2091_v51 = vsub.f32 1.0, %v2090_v47 }
0x1661   :  { %v2077_v17 = vmul.f32 %v3478_v32, %v2076_v35 }
0x1662   :  { %v2092_v16 = vmul.f32 %v3480_v14, %v2091_v51 }
0x1663   :  { %v2078_v38 = vadd.f32 %v3478_v32, %v2077_v17 }
0x1664   :  { %v2093_v55 = vadd.f32 %v3480_v14, %v2092_v16 }
0x1665   :  { %v3484_v25 = vpop.eup %3483  ;;  %v2082_v41 = vsel %vm2081_vm5, %v3478_v32, %v2078_v38 }
0x1666   :  { %v3486_v1 = vpop.eup %3485  ;;  %v2271_v3 = vadd.f32 1.0, %v3484_v25  ;;  %v2087_v5 = vsel %vm2084_vm8, %v2086_v39, %v2082_v41  ;;  %v2097_v21 = vsel %vm2096_vm10, %v3480_v14, %v2093_v55 }
0x1667   :  { %v2272_v23 = vadd.f32 1.0, %v3486_v1  ;;  %v2102_v26 = vsel %vm2099_vm13, %v2101_v42, %v2097_v21  ;;  %v2109_v45 = vmul.f32 %v2107_v57, %v2087_v5 }
0x1668   :  { %3487 = vrcp.f32 %v2271_v3  ;;  %v2105_v7 = vsel %vm142_vm7, %v3482_v56, %v2102_v26  ;;  %v2284_v62 = vand.u32 2147483648, %v2271_v3  ;;  %v2282_v0 = vand.u32 2147483647, %v2271_v3 }
0x1669   :  { %3489 = vrcp.f32 %v2272_v23  ;;  %v2110_v6 = vmul.f32 %v2105_v7, %v2087_v5  ;;  %v2299_v8 = vand.u32 2147483648, %v2272_v23  ;;  %v2297_v32 = vand.u32 2147483647, %v2272_v23 }
0x166a   :  { %3491 = vtanh.f32 %v2262_v27  ;;  %vm2278_vm2 = vweird.f32 %v2271_v3  ;;  %v2285_v28 = vor.u32 1.1754944e-38, %v2284_v62  ;;  %vm2293_vm4 = vweird.f32 %v2272_v23 }
0x166b   :  { %2112 = vrot.lane.b32.xlu2 %v2110_v6, %s3768_s3  ;;  %vm2283_vm5 = vcmp.eq.f32.partialorder %v2282_v0, 8.507059e+37  ;;  %v2300_v27 = vor.u32 1.1754944e-38, %v2299_v8  ;;  %vm2298_vm8 = vcmp.eq.f32.partialorder %v2297_v32, 8.507059e+37 }
0x166e   :  { %v3488_v63 = vpop.eup %3487 }
0x166f   :  { %v3490_v46 = vpop.eup %3489  ;;  %v2274_v53 = vmul.f32 %v3488_v63, %v2271_v3  ;;  %vm2279_vm0 = vweird.f32 %v3488_v63 }
0x1670   :  { %v2289_v54 = vmul.f32 %v3490_v46, %v2272_v23  ;;  %vm2294_vm1 = vweird.f32 %v3490_v46  ;;  %vm2280_vm3 = vmor %vm2278_vm2, %vm2279_vm0  ;;  %v3492_v47 = vpop.eup %3491 }
0x1671   :  { %v2275_v58 = vsub.f32 1.0, %v2274_v53  ;;  %vm2295_vm6 = vmor %vm2293_vm4, %vm2294_vm1 }
0x1672   :  { %v2290_v60 = vsub.f32 1.0, %v2289_v54 }
0x1673   :  { %2005 = vrot.lane.b32.xlu2 %v4437_v2, %s3768_s3  ;;  %v2276_v44 = vmul.f32 %v3488_v63, %v2275_v58 }
0x1674   :  { %v2291_v61 = vmul.f32 %v3490_v46, %v2290_v60 }
0x1675   :  { %v2277_v14 = vadd.f32 %v3488_v63, %v2276_v44 }
0x1676   :  { %v2292_v29 = vadd.f32 %v3490_v46, %v2291_v61 }
0x1677   :  { %v2281_v31 = vsel %vm2280_vm3, %v3488_v63, %v2277_v14  ;;  %v2319_v63 = vld [vmem:[#allocation2 + $0x10] sm:$0xc] }
0x1678   :  { %v2286_v35 = vsel %vm2283_vm5, %v2285_v28, %v2281_v31  ;;  %v2296_v2 = vsel %vm2295_vm6, %v3490_v46, %v2292_v29  ;;  %v2320_v46 = vld [vmem:[#allocation2] sm:$0xc] }
0x1679   :  { %v2301_v48 = vsel %vm2298_vm8, %v2300_v27, %v2296_v2  ;;  %v2305_v56 = vmul.f32 0.0, %v2286_v35 }
0x167a   :  { %v2304_v51 = vsel %vm142_vm7, %v3492_v47, %v2301_v48 }
0x167b   :  { %v2306_v17 = vmul.f32 %v2304_v51, %v2286_v35 }
0x167d   :  { %2308 = vrot.lane.b32.xlu0 %v2306_v17, %s3768_s3 }
0x16c5   :  { %v2113_v10 = vpop.permute.xlu2 %2112 }
0x16c6   :  { %v2115_v12 = vadd.f32 %v2113_v10, %v2109_v45 }
0x16c8   :  { %3493 = vtanh.f32 %v2115_v12 }
0x16cd   :  { %v2006_v16 = vpop.permute.xlu2 %2005 }
0x16ce   :  { %v3494_v18 = vpop.eup %3493  ;;  %2008 = vst.msk [vmem:[#allocation3 + $0x8] sm:$0x30] %vm577_vm15, %v2006_v16 }
0x16cf   :  { %v2117_v38 = vmul.f32 %v3494_v18, %v2105_v7 }
0x16d1   :  { %2119 = vrot.lane.b32.xlu0 %v2117_v38, %s3768_s3 }
0x16ef   :  { %v2309_v39 = vpop.permute.xlu0 %2308 }
0x16f0   :  { %v4587_v55 = vadd.f32 %v2309_v39, %v2305_v56 }
0x16f2   :  { %3495 = vtanh.f32 %v4587_v55  ;;  %v2414_v17 = vrot.slane %v4587_v55, 6 }
0x16f8   :  { %v3496_v25 = vpop.eup %3495 }
0x16f9   :  { %v2313_v57 = vmul.f32 %v3496_v25, %v2304_v51 }
0x16fb   :  { %2315 = vrot.lane.b32.xlu1 %v2313_v57, %s3768_s3 }
0x1743   :  { %v2120_v41 = vpop.permute.xlu0 %2119 }
0x1744   :  { %2122 = vst.msk [vmem:[#allocation3 + $0x8] sm:$0xc0] %vm692_vm9, %v2120_v41 }
0x174b   :  { %v2124_v42 = vld [vmem:[#allocation3 + $0x8] sm:$0xff] }
0x174c   :  { %3244 = vmatmul.msk.f32.gmra.mxu0 %vm249_vm12, %v2124_v42  ;;  %3246 = vmatmul.msk.f32.gmra.mxu1 %vm249_vm12, %v2124_v42 }
0x176d   :  { %v2316_v1 = vpop.permute.xlu1 %2315 }
0x176e   :  { %2318 = vst.msk [vmem:[#allocation3] sm:$0x3] %vm350_vm11, %v2316_v1  ;;  %3249 = vmatmul.msk.f32.vlgmr.msra.gmra.mxu0 %vm249_vm12, %v2316_v1  ;;  %3250 = vmatmul.msk.f32.vlgmr.msra.gmra.mxu1 %vm249_vm12, %v2316_v1 }
0x176f   :  { %2778 = vmatpush.msra.mxu0 %v4445_v40  ;;  %2798 = vmatpush.msra.mxu1 %v4447_v30 }
0x1771   :  { %2779 = vmatpush.msra.mxu0 %v4449_v20  ;;  %2799 = vmatpush.msra.mxu1 %v4451_v43 }
0x1773   :  { %2780 = vmatpush.msra.mxu0 %v4457_v49  ;;  %2800 = vmatpush.msra.mxu1 %v4459_v50 }
0x1775   :  { %2781 = vmatpush.msra.mxu0 %v4463_v52  ;;  %2801 = vmatpush.msra.mxu1 %v4465_v9 }
0x1777   :  { %2782 = vmatpush.msra.mxu0 %v4467_v13  ;;  %2802 = vmatpush.msra.mxu1 %v4469_v15 }
0x1779   :  { %2783 = vmatpush.msra.mxu0 %v4473_v19  ;;  %2803 = vmatpush.msra.mxu1 %v4475_v4 }
0x177b   :  { %2784 = vmatpush.msra.mxu0 %v4481_v22  ;;  %2804 = vmatpush.msra.mxu1 %v4483_v24 }
0x177d   :  { %2785 = vmatpush.msra.mxu0 %v4485_v34  ;;  %2805 = vmatpush.msra.mxu1 %v4487_v37 }
0x17c9   :  { %v2173_v3 = vpop.f32.mrf.mxu0  ;;  %v2196_v5 = vpop.f32.mrf.mxu1 }
0x17ca   :  { %v2174_v21 = vadd.f32 %v2173_v3, %v2143_v33  ;;  %v2197_v23 = vadd.f32 %v2196_v5, %v2144_v36 }
0x17cc   :  { %2201 = vst [vmem:[#allocation2 + $0x18] sm:$0xff] %v2174_v21 }
0x17cd   :  { %2202 = vst [vmem:[#allocation2 + $0x8] sm:$0xff] %v2197_v23 }
0x17eb   :  { %v2340_v26 = vpop.f32.mrf.mxu0  ;;  %v2360_v45 = vpop.f32.mrf.mxu1 }
0x17ec   :  { %v2365_v7 = vrot.slane %v2340_v26, 6  ;;  %v2366_v6 = vrot.slane %v2360_v45, 6 }
0x17ee   :  { %v2369_v53 = vadd.f32 %v2365_v7, %v2319_v63  ;;  %v2370_v54 = vadd.f32 %v2366_v6, %v2320_v46  ;;  %v2430_v7 = vld [vmem:[#allocation2 + $0x10] sm:$0x30]  ;;  %v2431_v6 = vld [vmem:[#allocation2] sm:$0x30] }
0x17f0   :  { %v3251_v58 = vmul.f32 -1.442695, %v2369_v53  ;;  %v3252_v60 = vmul.f32 -1.442695, %v2370_v54 }
0x17f2   :  { %3497 = vpow2.f32 %v3251_v58 }
0x17f3   :  { %3499 = vpow2.f32 %v3252_v60 }
0x17f8   :  { %v3498_v62 = vpop.eup %3497 }
0x17f9   :  { %v3500_v44 = vpop.eup %3499  ;;  %v2379_v33 = vadd.f32 1.0, %v3498_v62 }
0x17fa   :  { %v2380_v0 = vadd.f32 1.0, %v3500_v44 }
0x17fb   :  { %3501 = vrcp.f32 %v2379_v33  ;;  %v2392_v14 = vand.u32 2147483648, %v2379_v33  ;;  %v2390_v31 = vand.u32 2147483647, %v2379_v33  ;;  %vm2386_vm0 = vweird.f32 %v2379_v33 }
0x17fc   :  { %3503 = vrcp.f32 %v2380_v0  ;;  %v2407_v27 = vand.u32 2147483648, %v2380_v0  ;;  %v2405_v35 = vand.u32 2147483647, %v2380_v0  ;;  %vm2401_vm2 = vweird.f32 %v2380_v0 }
0x17fd   :  { %3505 = vtanh.f32 %v2370_v54  ;;  %v2393_v48 = vor.u32 1.1754944e-38, %v2392_v14  ;;  %vm2391_vm3 = vcmp.eq.f32.partialorder %v2390_v31, 8.507059e+37 }
0x17fe   :  { %v2408_v12 = vor.u32 1.1754944e-38, %v2407_v27  ;;  %vm2406_vm5 = vcmp.eq.f32.partialorder %v2405_v35, 8.507059e+37 }
0x1801   :  { %v3502_v11 = vpop.eup %3501 }
0x1802   :  { %v3504_v36 = vpop.eup %3503  ;;  %v2382_v8 = vmul.f32 %v3502_v11, %v2379_v33  ;;  %vm2387_vm10 = vweird.f32 %v3502_v11 }
0x1803   :  { %v2397_v61 = vmul.f32 %v3504_v36, %v2380_v0  ;;  %vm2402_vm13 = vweird.f32 %v3504_v36  ;;  %vm2388_vm1 = vmor %vm2386_vm0, %vm2387_vm10  ;;  %v3506_v16 = vpop.eup %3505 }
0x1804   :  { %v2383_v32 = vsub.f32 1.0, %v2382_v8  ;;  %vm2403_vm4 = vmor %vm2401_vm2, %vm2402_vm13 }
0x1805   :  { %v2398_v28 = vsub.f32 1.0, %v2397_v61 }
0x1806   :  { %v2384_v29 = vmul.f32 %v3502_v11, %v2383_v32 }
0x1807   :  { %v2399_v47 = vmul.f32 %v3504_v36, %v2398_v28 }
0x1808   :  { %v2385_v2 = vadd.f32 %v3502_v11, %v2384_v29 }
0x1809   :  { %v2400_v51 = vadd.f32 %v3504_v36, %v2399_v47 }
0x180a   :  { %v2389_v10 = vsel %vm2388_vm1, %v3502_v11, %v2385_v2 }
0x180b   :  { %v2394_v18 = vsel %vm2391_vm3, %v2393_v48, %v2389_v10  ;;  %v2404_v38 = vsel %vm2403_vm4, %v3504_v36, %v2400_v51 }
0x180c   :  { %v2409_v56 = vsel %vm2406_vm5, %v2408_v12, %v2404_v38  ;;  %v2416_v39 = vmul.f32 %v2414_v17, %v2394_v18 }
0x180d   :  { %v2412_v25 = vsel %vm142_vm7, %v3506_v16, %v2409_v56 }
0x180e   :  { %v2417_v57 = vmul.f32 %v2412_v25, %v2394_v18 }
0x1810   :  { %2419 = vrot.lane.b32.xlu2 %v2417_v57, %s3768_s3 }
0x186a   :  { %v2420_v41 = vpop.permute.xlu2 %2419 }
0x186b   :  { %v4621_v42 = vadd.f32 %v2420_v41, %v2416_v39 }
0x186d   :  { %3507 = vtanh.f32 %v4621_v42  ;;  %v2528_v48 = vrot.slane %v4621_v42, 6 }
0x1873   :  { %v3508_v55 = vpop.eup %3507 }
0x1874   :  { %v4624_v1 = vmul.f32 %v3508_v55, %v2412_v25 }
0x1876   :  { %v2432_v3 = vrot.slane %v4624_v1, 2 }
0x1878   :  { %2433 = vrot.lane.b32.xlu0 %v2432_v3, %s3768_s3 }
0x18ea   :  { %v2434_v5 = vpop.permute.xlu0 %2433 }
0x18eb   :  { %3253 = vmatmul.msk.f32.vlgmr.msrb.gmra.mxu2 %vm249_vm12, %v2434_v5  ;;  %3254 = vmatmul.msk.f32.vlgmr.msrb.gmra.mxu3 %vm249_vm12, %v2434_v5 }
0x18ec   :  { %2892 = vmatpush.msrb.mxu2 %v4445_v40  ;;  %2912 = vmatpush.msrb.mxu3 %v4447_v30 }
0x18ee   :  { %2893 = vmatpush.msrb.mxu2 %v4449_v20  ;;  %2913 = vmatpush.msrb.mxu3 %v4451_v43 }
0x18f0   :  { %2894 = vmatpush.msrb.mxu2 %v4457_v49  ;;  %2914 = vmatpush.msrb.mxu3 %v4459_v50 }
0x18f2   :  { %2895 = vmatpush.msrb.mxu2 %v4463_v52  ;;  %2915 = vmatpush.msrb.mxu3 %v4465_v9 }
0x18f4   :  { %2896 = vmatpush.msrb.mxu2 %v4467_v13  ;;  %2916 = vmatpush.msrb.mxu3 %v4469_v15 }
0x18f6   :  { %2897 = vmatpush.msrb.mxu2 %v4473_v19  ;;  %2917 = vmatpush.msrb.mxu3 %v4475_v4 }
0x18f8   :  { %2898 = vmatpush.msrb.mxu2 %v4481_v22  ;;  %2918 = vmatpush.msrb.mxu3 %v4483_v24 }
0x18fa   :  { %2899 = vmatpush.msrb.mxu2 %v4485_v34  ;;  %2919 = vmatpush.msrb.mxu3 %v4487_v37 }
0x196e   :  { %v2454_v21 = vpop.f32.mrf.mxu2  ;;  %v2474_v23 = vpop.f32.mrf.mxu3 }
0x196f   :  { %v2479_v26 = vrot.slane %v2454_v21, 4  ;;  %v2480_v45 = vrot.slane %v2474_v23, 4 }
0x1971   :  { %v2483_v63 = vadd.f32 %v2479_v26, %v2430_v7  ;;  %v2484_v46 = vadd.f32 %v2480_v45, %v2431_v6 }
0x1973   :  { %v3255_v53 = vmul.f32 -1.442695, %v2483_v63  ;;  %v3256_v54 = vmul.f32 -1.442695, %v2484_v46 }
0x1975   :  { %3509 = vpow2.f32 %v3255_v53 }
0x1976   :  { %3511 = vpow2.f32 %v3256_v54 }
0x197b   :  { %v3510_v58 = vpop.eup %3509 }
0x197c   :  { %v3512_v60 = vpop.eup %3511  ;;  %v2493_v62 = vadd.f32 1.0, %v3510_v58 }
0x197d   :  { %v2494_v44 = vadd.f32 1.0, %v3512_v60 }
0x197e   :  { %3513 = vrcp.f32 %v2493_v62  ;;  %v2506_v61 = vand.u32 2147483648, %v2493_v62  ;;  %v2504_v28 = vand.u32 2147483647, %v2493_v62  ;;  %vm2500_vm10 = vweird.f32 %v2493_v62 }
0x197f   :  { %3515 = vrcp.f32 %v2494_v44  ;;  %v2521_v29 = vand.u32 2147483648, %v2494_v44  ;;  %v2519_v27 = vand.u32 2147483647, %v2494_v44  ;;  %vm2515_vm0 = vweird.f32 %v2494_v44 }
0x1980   :  { %3517 = vtanh.f32 %v2484_v46  ;;  %v2507_v35 = vor.u32 1.1754944e-38, %v2506_v61  ;;  %vm2505_vm1 = vcmp.eq.f32.partialorder %v2504_v28, 8.507059e+37 }
0x1981   :  { %v2522_v17 = vor.u32 1.1754944e-38, %v2521_v29  ;;  %vm2520_vm3 = vcmp.eq.f32.partialorder %v2519_v27, 8.507059e+37 }
0x1984   :  { %v3514_v33 = vpop.eup %3513 }
0x1985   :  { %v3516_v0 = vpop.eup %3515  ;;  %v2496_v11 = vmul.f32 %v3514_v33, %v2493_v62  ;;  %vm2501_vm6 = vweird.f32 %v3514_v33 }
0x1986   :  { %v2511_v36 = vmul.f32 %v3516_v0, %v2494_v44  ;;  %vm2516_vm8 = vweird.f32 %v3516_v0  ;;  %vm2502_vm13 = vmor %vm2500_vm10, %vm2501_vm6  ;;  %v3518_v10 = vpop.eup %3517 }
0x1987   :  { %v2497_v8 = vsub.f32 1.0, %v2496_v11  ;;  %vm2517_vm2 = vmor %vm2515_vm0, %vm2516_vm8 }
0x1988   :  { %v2512_v32 = vsub.f32 1.0, %v2511_v36 }
0x1989   :  { %v2498_v14 = vmul.f32 %v3514_v33, %v2497_v8 }
0x198a   :  { %v2513_v31 = vmul.f32 %v3516_v0, %v2512_v32 }
0x198b   :  { %v2499_v47 = vadd.f32 %v3514_v33, %v2498_v14 }
0x198c   :  { %v2514_v2 = vadd.f32 %v3516_v0, %v2513_v31 }
0x198d   :  { %v2503_v51 = vsel %vm2502_vm13, %v3514_v33, %v2499_v47 }
0x198e   :  { %v2508_v12 = vsel %vm2505_vm1, %v2507_v35, %v2503_v51  ;;  %v2518_v16 = vsel %vm2517_vm2, %v3516_v0, %v2514_v2  ;;  %v2658_v2 = vld [vmem:[#allocation2 + $0x18] sm:$0x3]  ;;  %v2659_v51 = vld [vmem:[#allocation2 + $0x8] sm:$0x3] }
0x198f   :  { %v2523_v18 = vsel %vm2520_vm3, %v2522_v17, %v2518_v16  ;;  %v2530_v38 = vmul.f32 %v2528_v48, %v2508_v12 }
0x1990   :  { %v2526_v56 = vsel %vm142_vm7, %v3518_v10, %v2523_v18 }
0x1991   :  { %v2531_v39 = vmul.f32 %v2526_v56, %v2508_v12 }
0x1993   :  { %2533 = vrot.lane.b32.xlu1 %v2531_v39, %s3768_s3 }
0x1a05   :  { %v2534_v25 = vpop.permute.xlu1 %2533 }
0x1a06   :  { %v4650_v57 = vadd.f32 %v2534_v25, %v2530_v38 }
0x1a08   :  { %3519 = vtanh.f32 %v4650_v57  ;;  %v2642_v62 = vrot.slane %v4650_v57, 6 }
0x1a0e   :  { %v3520_v41 = vpop.eup %3519 }
0x1a0f   :  { %v4653_v42 = vmul.f32 %v3520_v41, %v2526_v56 }
0x1a11   :  { %v2546_v55 = vrot.slane %v4653_v42, 4 }
0x1a13   :  { %2547 = vrot.lane.b32.xlu2 %v2546_v55, %s3768_s3 }
0x1a6d   :  { %v2548_v3 = vpop.permute.xlu2 %2547 }
0x1a6e   :  { %3257 = vmatmul.msk.f32.vlgmr.msrb.gmra.mxu0 %vm249_vm12, %v2548_v3  ;;  %3258 = vmatmul.msk.f32.vlgmr.msrb.gmra.mxu1 %vm249_vm12, %v2548_v3 }
0x1a6f   :  { %3006 = vmatpush.msrb.mxu0 %v4445_v40  ;;  %3026 = vmatpush.msrb.mxu1 %v4447_v30 }
0x1a71   :  { %3007 = vmatpush.msrb.mxu0 %v4449_v20  ;;  %3027 = vmatpush.msrb.mxu1 %v4451_v43 }
0x1a73   :  { %3008 = vmatpush.msrb.mxu0 %v4457_v49  ;;  %3028 = vmatpush.msrb.mxu1 %v4459_v50  ;;  %v2544_v49 = vld [vmem:[#allocation2 + $0x10] sm:$0xc0]  ;;  %v2545_v50 = vld [vmem:[#allocation2] sm:$0xc0] }
0x1a75   :  { %3009 = vmatpush.msrb.mxu0 %v4463_v52  ;;  %3029 = vmatpush.msrb.mxu1 %v4465_v9 }
0x1a77   :  { %3010 = vmatpush.msrb.mxu0 %v4467_v13  ;;  %3030 = vmatpush.msrb.mxu1 %v4469_v15 }
0x1a79   :  { %3011 = vmatpush.msrb.mxu0 %v4473_v19  ;;  %3031 = vmatpush.msrb.mxu1 %v4475_v4 }
0x1a7b   :  { %3012 = vmatpush.msrb.mxu0 %v4481_v22  ;;  %3032 = vmatpush.msrb.mxu1 %v4483_v24 }
0x1a7d   :  { %3013 = vmatpush.msrb.mxu0 %v4485_v34  ;;  %3033 = vmatpush.msrb.mxu1 %v4487_v37 }
0x1aeb   :  { %v2568_v40 = vpop.f32.mrf.mxu0  ;;  %v2588_v30 = vpop.f32.mrf.mxu1 }
0x1aec   :  { %v2593_v20 = vrot.slane %v2568_v40, 2  ;;  %v2594_v43 = vrot.slane %v2588_v30, 2 }
0x1aee   :  { %v2597_v52 = vadd.f32 %v2593_v20, %v2544_v49  ;;  %v2598_v9 = vadd.f32 %v2594_v43, %v2545_v50 }
0x1af0   :  { %v3259_v13 = vmul.f32 -1.442695, %v2597_v52  ;;  %v3260_v15 = vmul.f32 -1.442695, %v2598_v9 }
0x1af2   :  { %3521 = vpow2.f32 %v3259_v13 }
0x1af3   :  { %3523 = vpow2.f32 %v3260_v15 }
0x1af8   :  { %v3522_v19 = vpop.eup %3521 }
0x1af9   :  { %v3524_v4 = vpop.eup %3523  ;;  %v2607_v22 = vadd.f32 1.0, %v3522_v19 }
0x1afa   :  { %v2608_v24 = vadd.f32 1.0, %v3524_v4 }
0x1afb   :  { %3525 = vrcp.f32 %v2607_v22  ;;  %v2620_v26 = vand.u32 2147483648, %v2607_v22  ;;  %v2618_v6 = vand.u32 2147483647, %v2607_v22  ;;  %vm2614_vm6 = vweird.f32 %v2607_v22 }
0x1afc   :  { %3527 = vrcp.f32 %v2608_v24  ;;  %v2635_v63 = vand.u32 2147483648, %v2608_v24  ;;  %v2633_v53 = vand.u32 2147483647, %v2608_v24  ;;  %vm2629_vm10 = vweird.f32 %v2608_v24 }
0x1afd   :  { %3529 = vtanh.f32 %v2598_v9  ;;  %v2621_v58 = vor.u32 1.1754944e-38, %v2620_v26  ;;  %vm2619_vm13 = vcmp.eq.f32.partialorder %v2618_v6, 8.507059e+37 }
0x1afe   :  { %v2636_v33 = vor.u32 1.1754944e-38, %v2635_v63  ;;  %vm2634_vm1 = vcmp.eq.f32.partialorder %v2633_v53, 8.507059e+37 }
0x1b01   :  { %v3526_v34 = vpop.eup %3525 }
0x1b02   :  { %v3528_v37 = vpop.eup %3527  ;;  %v2610_v5 = vmul.f32 %v3526_v34, %v2607_v22  ;;  %vm2615_vm4 = vweird.f32 %v3526_v34 }
0x1b03   :  { %v2625_v21 = vmul.f32 %v3528_v37, %v2608_v24  ;;  %vm2630_vm5 = vweird.f32 %v3528_v37  ;;  %vm2616_vm8 = vmor %vm2614_vm6, %vm2615_vm4  ;;  %v3530_v0 = vpop.eup %3529 }
0x1b04   :  { %v2611_v23 = vsub.f32 1.0, %v2610_v5  ;;  %vm2631_vm0 = vmor %vm2629_vm10, %vm2630_vm5 }
0x1b05   :  { %v2626_v45 = vsub.f32 1.0, %v2625_v21 }
0x1b06   :  { %v2612_v7 = vmul.f32 %v3526_v34, %v2611_v23 }
0x1b07   :  { %v2627_v46 = vmul.f32 %v3528_v37, %v2626_v45 }
0x1b08   :  { %v2613_v54 = vadd.f32 %v3526_v34, %v2612_v7 }
0x1b09   :  { %v2628_v60 = vadd.f32 %v3528_v37, %v2627_v46 }
0x1b0a   :  { %v2617_v44 = vsel %vm2616_vm8, %v3526_v34, %v2613_v54 }
0x1b0b   :  { %v2622_v11 = vsel %vm2619_vm13, %v2621_v58, %v2617_v44  ;;  %v2632_v36 = vsel %vm2631_vm0, %v3528_v37, %v2628_v60  ;;  %v2766_v44 = vld [vmem:[#allocation2 + $0x18] sm:$0xc] }
0x1b0c   :  { %v2637_v8 = vsel %vm2634_vm1, %v2636_v33, %v2632_v36  ;;  %v2644_v61 = vmul.f32 %v2642_v62, %v2622_v11  ;;  %v2767_v33 = vld [vmem:[#allocation2 + $0x8] sm:$0xc] }
0x1b0d   :  { %v2640_v32 = vsel %vm142_vm7, %v3530_v0, %v2637_v8 }
0x1b0e   :  { %v2645_v14 = vmul.f32 %v2640_v32, %v2622_v11 }
0x1b10   :  { %2647 = vrot.lane.b32.xlu0 %v2645_v14, %s3768_s3 }
0x1b82   :  { %v2648_v28 = vpop.permute.xlu0 %2647 }
0x1b83   :  { %v2650_v29 = vadd.f32 %v2648_v28, %v2644_v61 }
0x1b85   :  { %3531 = vtanh.f32 %v2650_v29  ;;  %v2750_v4 = vrot.slane %v2650_v29, 6 }
0x1b8b   :  { %v3532_v31 = vpop.eup %3531 }
0x1b8c   :  { %v4679_v27 = vmul.f32 %v3532_v31, %v2640_v32 }
0x1b8e   :  { %v2660_v47 = vrot.slane %v4679_v27, 6 }
0x1b90   :  { %2661 = vrot.lane.b32.xlu1 %v2660_v47, %s3768_s3 }
0x1c02   :  { %v2662_v35 = vpop.permute.xlu1 %2661 }
0x1c03   :  { %3261 = vmatmul.msk.f32.vlgmr.msra.gmra.mxu2 %vm249_vm12, %v2662_v35  ;;  %3262 = vmatmul.msk.f32.vlgmr.msra.gmra.mxu3 %vm249_vm12, %v2662_v35 }
0x1c86   :  { %v2682_v48 = vpop.f32.mrf.mxu2  ;;  %v2702_v17 = vpop.f32.mrf.mxu3 }
0x1c87   :  { %v2705_v10 = vadd.f32 %v2682_v48, %v2658_v2  ;;  %v2706_v12 = vadd.f32 %v2702_v17, %v2659_v51 }
0x1c89   :  { %v3263_v16 = vmul.f32 -1.442695, %v2705_v10  ;;  %v3264_v18 = vmul.f32 -1.442695, %v2706_v12 }
0x1c8b   :  { %3533 = vpow2.f32 %v3263_v16 }
0x1c8c   :  { %3535 = vpow2.f32 %v3264_v18 }
0x1c91   :  { %v3534_v38 = vpop.eup %3533 }
0x1c92   :  { %v3536_v56 = vpop.eup %3535  ;;  %v2715_v39 = vadd.f32 1.0, %v3534_v38 }
0x1c93   :  { %v2716_v25 = vadd.f32 1.0, %v3536_v56 }
0x1c94   :  { %3537 = vrcp.f32 %v2715_v39  ;;  %v2728_v20 = vand.u32 2147483648, %v2715_v39  ;;  %v2726_v49 = vand.u32 2147483647, %v2715_v39  ;;  %vm2722_vm4 = vweird.f32 %v2715_v39 }
0x1c95   :  { %3539 = vrcp.f32 %v2716_v25  ;;  %v2743_v50 = vand.u32 2147483648, %v2716_v25  ;;  %v2741_v9 = vand.u32 2147483647, %v2716_v25  ;;  %vm2737_vm6 = vweird.f32 %v2716_v25 }
0x1c96   :  { %3541 = vtanh.f32 %v2706_v12  ;;  %v2729_v15 = vor.u32 1.1754944e-38, %v2728_v20  ;;  %vm2727_vm8 = vcmp.eq.f32.partialorder %v2726_v49, 8.507059e+37 }
0x1c97   :  { %v2744_v24 = vor.u32 1.1754944e-38, %v2743_v50  ;;  %vm2742_vm13 = vcmp.eq.f32.partialorder %v2741_v9, 8.507059e+37 }
0x1c9a   :  { %v3538_v57 = vpop.eup %3537 }
0x1c9b   :  { %v3540_v41 = vpop.eup %3539  ;;  %v2718_v55 = vmul.f32 %v3538_v57, %v2715_v39  ;;  %vm2723_vm2 = vweird.f32 %v3538_v57 }
0x1c9c   :  { %v2733_v3 = vmul.f32 %v3540_v41, %v2716_v25  ;;  %vm2738_vm3 = vweird.f32 %v3540_v41  ;;  %vm2724_vm5 = vmor %vm2722_vm4, %vm2723_vm2  ;;  %v3542_v34 = vpop.eup %3541 }
0x1c9d   :  { %v2719_v40 = vsub.f32 1.0, %v2718_v55  ;;  %vm2739_vm10 = vmor %vm2737_vm6, %vm2738_vm3 }
0x1c9e   :  { %v2734_v30 = vsub.f32 1.0, %v2733_v3 }
0x1c9f   :  { %v2720_v43 = vmul.f32 %v3538_v57, %v2719_v40 }
0x1ca0   :  { %v2735_v52 = vmul.f32 %v3540_v41, %v2734_v30 }
0x1ca1   :  { %v2721_v13 = vadd.f32 %v3538_v57, %v2720_v43 }
0x1ca2   :  { %v2736_v19 = vadd.f32 %v3540_v41, %v2735_v52 }
0x1ca3   :  { %v2725_v22 = vsel %vm2724_vm5, %v3538_v57, %v2721_v13 }
0x1ca4   :  { %v2730_v37 = vsel %vm2727_vm8, %v2729_v15, %v2725_v22  ;;  %v2740_v5 = vsel %vm2739_vm10, %v3540_v41, %v2736_v19 }
0x1ca5   :  { %v2745_v21 = vsel %vm2742_vm13, %v2744_v24, %v2740_v5  ;;  %v2752_v23 = vmul.f32 %v2750_v4, %v2730_v37  ;;  %v2878_v5 = vld [vmem:[#allocation2 + $0x8] sm:$0x30] }
0x1ca6   :  { %v2748_v26 = vsel %vm142_vm7, %v3542_v34, %v2745_v21 }
0x1ca7   :  { %v2753_v45 = vmul.f32 %v2748_v26, %v2730_v37  ;;  %v2877_v37 = vld [vmem:[#allocation2 + $0x18] sm:$0x30] }
0x1ca9   :  { %2755 = vrot.lane.b32.xlu2 %v2753_v45, %s3768_s3 }
0x1d03   :  { %v2756_v7 = vpop.permute.xlu2 %2755 }
0x1d04   :  { %v2758_v6 = vadd.f32 %v2756_v7, %v2752_v23 }
0x1d06   :  { %3543 = vtanh.f32 %v2758_v6  ;;  %v2861_v25 = vrot.slane %v2758_v6, 6 }
0x1d0c   :  { %v3544_v63 = vpop.eup %3543 }
0x1d0d   :  { %v2760_v46 = vmul.f32 %v3544_v63, %v2748_v26 }
0x1d0f   :  { %2762 = vrot.lane.b32.xlu0 %v2760_v46, %s3768_s3 }
0x1d81   :  { %v2763_v53 = vpop.permute.xlu0 %2762 }
0x1d82   :  { %2765 = vst.msk [vmem:[#allocation3 + $0x8] sm:$0x3] %vm350_vm11, %v2763_v53  ;;  %3265 = vmatmul.msk.f32.vlgmr.msra.gmra.mxu0 %vm249_vm12, %v2763_v53  ;;  %3266 = vmatmul.msk.f32.vlgmr.msra.gmra.mxu1 %vm249_vm12, %v2763_v53 }
0x1dff   :  { %v2787_v54 = vpop.f32.mrf.mxu0  ;;  %v2807_v58 = vpop.f32.mrf.mxu1 }
0x1e00   :  { %v2812_v60 = vrot.slane %v2787_v54, 6  ;;  %v2813_v62 = vrot.slane %v2807_v58, 6 }
0x1e02   :  { %v2816_v0 = vadd.f32 %v2812_v60, %v2766_v44  ;;  %v2817_v11 = vadd.f32 %v2813_v62, %v2767_v33 }
0x1e04   :  { %v3267_v36 = vmul.f32 -1.442695, %v2816_v0  ;;  %v3268_v8 = vmul.f32 -1.442695, %v2817_v11 }
0x1e06   :  { %3545 = vpow2.f32 %v3267_v36 }
0x1e07   :  { %3547 = vpow2.f32 %v3268_v8 }
0x1e0c   :  { %v3546_v61 = vpop.eup %3545 }
0x1e0d   :  { %v3548_v32 = vpop.eup %3547  ;;  %v2826_v14 = vadd.f32 1.0, %v3546_v61 }
0x1e0e   :  { %v2827_v28 = vadd.f32 1.0, %v3548_v32 }
0x1e0f   :  { %3549 = vrcp.f32 %v2826_v14  ;;  %v2839_v48 = vand.u32 2147483648, %v2826_v14  ;;  %v2837_v10 = vand.u32 2147483647, %v2826_v14  ;;  %vm2833_vm1 = vweird.f32 %v2826_v14 }
0x1e10   :  { %3551 = vrcp.f32 %v2827_v28  ;;  %v2854_v12 = vand.u32 2147483648, %v2827_v28  ;;  %v2852_v18 = vand.u32 2147483647, %v2827_v28  ;;  %vm2848_vm3 = vweird.f32 %v2827_v28 }
0x1e11   :  { %3553 = vtanh.f32 %v2817_v11  ;;  %v2840_v56 = vor.u32 1.1754944e-38, %v2839_v48  ;;  %vm2838_vm4 = vcmp.eq.f32.partialorder %v2837_v10, 8.507059e+37 }
0x1e12   :  { %v2855_v41 = vor.u32 1.1754944e-38, %v2854_v12  ;;  %vm2853_vm6 = vcmp.eq.f32.partialorder %v2852_v18, 8.507059e+37 }
0x1e15   :  { %v3550_v29 = vpop.eup %3549 }
0x1e16   :  { %v3552_v31 = vpop.eup %3551  ;;  %v2829_v47 = vmul.f32 %v3550_v29, %v2826_v14  ;;  %vm2834_vm11 = vweird.f32 %v3550_v29 }
0x1e17   :  { %v2844_v35 = vmul.f32 %v3552_v31, %v2827_v28  ;;  %vm2849_vm0 = vweird.f32 %v3552_v31  ;;  %vm2835_vm2 = vmor %vm2833_vm1, %vm2834_vm11  ;;  %v3554_v55 = vpop.eup %3553 }
0x1e18   :  { %v2830_v2 = vsub.f32 1.0, %v2829_v47  ;;  %vm2850_vm5 = vmor %vm2848_vm3, %vm2849_vm0 }
0x1e19   :  { %v2845_v51 = vsub.f32 1.0, %v2844_v35 }
0x1e1a   :  { %v2831_v17 = vmul.f32 %v3550_v29, %v2830_v2 }
0x1e1b   :  { %v2846_v16 = vmul.f32 %v3552_v31, %v2845_v51 }
0x1e1c   :  { %v2832_v38 = vadd.f32 %v3550_v29, %v2831_v17 }
0x1e1d   :  { %v2847_v39 = vadd.f32 %v3552_v31, %v2846_v16 }
0x1e1e   :  { %v2836_v57 = vsel %vm2835_vm2, %v3550_v29, %v2832_v38 }
0x1e1f   :  { %v2841_v3 = vsel %vm2838_vm4, %v2840_v56, %v2836_v57  ;;  %v2851_v40 = vsel %vm2850_vm5, %v3552_v31, %v2847_v39 }
0x1e20   :  { %v2856_v30 = vsel %vm2853_vm6, %v2855_v41, %v2851_v40  ;;  %v2863_v20 = vmul.f32 %v2861_v25, %v2841_v3 }
0x1e21   :  { %v2859_v43 = vsel %vm142_vm7, %v3554_v55, %v2856_v30 }
0x1e22   :  { %v2864_v49 = vmul.f32 %v2859_v43, %v2841_v3 }
0x1e24   :  { %2866 = vrot.lane.b32.xlu1 %v2864_v49, %s3768_s3  ;;  %v2992_v49 = vld [vmem:[#allocation2 + $0x8] sm:$0xc0] }
0x1e96   :  { %v2867_v50 = vpop.permute.xlu1 %2866 }
0x1e97   :  { %v2869_v52 = vadd.f32 %v2867_v50, %v2863_v20 }
0x1e99   :  { %3555 = vtanh.f32 %v2869_v52  ;;  %v2975_v29 = vrot.slane %v2869_v52, 6 }
0x1e9f   :  { %v3556_v9 = vpop.eup %3555 }
0x1ea0   :  { %v2871_v13 = vmul.f32 %v3556_v9, %v2859_v43  ;;  %v2991_v43 = vld [vmem:[#allocation2 + $0x18] sm:$0xc0] }
0x1ea2   :  { %v2879_v15 = vrot.slane %v2871_v13, 2 }
0x1ea4   :  { %2880 = vrot.lane.b32.xlu2 %v2879_v15, %s3768_s3 }
0x1efe   :  { %v2881_v19 = vpop.permute.xlu2 %2880 }
0x1eff   :  { %3269 = vmatmul.msk.f32.vlgmr.msrb.gmra.mxu2 %vm249_vm12, %v2881_v19  ;;  %3270 = vmatmul.msk.f32.vlgmr.msrb.gmra.mxu3 %vm249_vm12, %v2881_v19 }
0x1f82   :  { %v2901_v4 = vpop.f32.mrf.mxu2  ;;  %v2921_v22 = vpop.f32.mrf.mxu3 }
0x1f83   :  { %v2926_v24 = vrot.slane %v2901_v4, 4  ;;  %v2927_v34 = vrot.slane %v2921_v22, 4 }
0x1f85   :  { %v2930_v21 = vadd.f32 %v2926_v24, %v2877_v37  ;;  %v2931_v23 = vadd.f32 %v2927_v34, %v2878_v5 }
0x1f87   :  { %v3271_v26 = vmul.f32 -1.442695, %v2930_v21  ;;  %v3272_v45 = vmul.f32 -1.442695, %v2931_v23 }
0x1f89   :  { %3557 = vpow2.f32 %v3271_v26 }
0x1f8a   :  { %3559 = vpow2.f32 %v3272_v45 }
0x1f8f   :  { %v3558_v7 = vpop.eup %3557 }
0x1f90   :  { %v3560_v6 = vpop.eup %3559  ;;  %v2940_v63 = vadd.f32 1.0, %v3558_v7 }
0x1f91   :  { %v2941_v46 = vadd.f32 1.0, %v3560_v6 }
0x1f92   :  { %3561 = vrcp.f32 %v2940_v63  ;;  %v2953_v44 = vand.u32 2147483648, %v2940_v63  ;;  %v2951_v11 = vand.u32 2147483647, %v2940_v63  ;;  %vm2947_vm13 = vweird.f32 %v2940_v63 }
0x1f93   :  { %3563 = vrcp.f32 %v2941_v46  ;;  %v2968_v36 = vand.u32 2147483648, %v2941_v46  ;;  %v2966_v61 = vand.u32 2147483647, %v2941_v46  ;;  %vm2962_vm0 = vweird.f32 %v2941_v46 }
0x1f94   :  { %3565 = vtanh.f32 %v2931_v23  ;;  %v2954_v14 = vor.u32 1.1754944e-38, %v2953_v44  ;;  %vm2952_vm1 = vcmp.eq.f32.partialorder %v2951_v11, 8.507059e+37 }
0x1f95   :  { %v2969_v47 = vor.u32 1.1754944e-38, %v2968_v36  ;;  %vm2967_vm3 = vcmp.eq.f32.partialorder %v2966_v61, 8.507059e+37 }
0x1f98   :  { %v3562_v53 = vpop.eup %3561 }
0x1f99   :  { %v3564_v54 = vpop.eup %3563  ;;  %v2943_v58 = vmul.f32 %v3562_v53, %v2940_v63  ;;  %vm2948_vm8 = vweird.f32 %v3562_v53 }
0x1f9a   :  { %v2958_v60 = vmul.f32 %v3564_v54, %v2941_v46  ;;  %vm2963_vm10 = vweird.f32 %v3564_v54  ;;  %vm2949_vm11 = vmor %vm2947_vm13, %vm2948_vm8  ;;  %v3566_v35 = vpop.eup %3565 }
0x1f9b   :  { %v2944_v62 = vsub.f32 1.0, %v2943_v58  ;;  %vm2964_vm2 = vmor %vm2962_vm0, %vm2963_vm10 }
0x1f9c   :  { %v2959_v33 = vsub.f32 1.0, %v2958_v60 }
0x1f9d   :  { %v2945_v0 = vmul.f32 %v3562_v53, %v2944_v62 }
0x1f9e   :  { %v2960_v8 = vmul.f32 %v3564_v54, %v2959_v33 }
0x1f9f   :  { %v2946_v32 = vadd.f32 %v3562_v53, %v2945_v0 }
0x1fa0   :  { %v2961_v28 = vadd.f32 %v3564_v54, %v2960_v8 }
0x1fa1   :  { %v2950_v31 = vsel %vm2949_vm11, %v3562_v53, %v2946_v32  ;;  %v3114_v32 = vld [vmem:[%s4768_s10 + $0x38] sm:$0xff] }
0x1fa2   :  { %v2955_v2 = vsel %vm2952_vm1, %v2954_v14, %v2950_v31  ;;  %v2965_v48 = vsel %vm2964_vm2, %v3564_v54, %v2961_v28  ;;  %3133 = vmatpush.msra.mxu2 %v3114_v32  ;;  %v3113_v14 = vld [vmem:[%s4768_s10 + $0x30] sm:$0xff]  ;;  %v3111_v28 = vld [vmem:[%s4768_s10 + $0x20] sm:$0xff]  ;;  %v3108_v31 = vld [vmem:[%s4768_s10 + $0x8] sm:$0xff] }
0x1fa3   :  { %v2970_v51 = vsel %vm2967_vm3, %v2969_v47, %v2965_v48  ;;  %v2977_v17 = vmul.f32 %v2975_v29, %v2955_v2  ;;  %v3109_v29 = vld [vmem:[%s4768_s10 + $0x10] sm:$0xff]  ;;  %v3107_v47 = vld [vmem:[%s4768_s10] sm:$0xff] }
0x1fa4   :  { %v2973_v10 = vsel %vm142_vm7, %v3566_v35, %v2970_v51  ;;  %3134 = vmatpush.msra.mxu2 %v3113_v14 }
0x1fa5   :  { %v2978_v12 = vmul.f32 %v2973_v10, %v2955_v2 }
0x1fa6   :  { %3135 = vmatpush.msra.mxu2 %v3112_v59 }
0x1fa7   :  { %2980 = vrot.lane.b32.xlu0 %v2978_v12, %s3768_s3 }
0x1fa8   :  { %3136 = vmatpush.msra.mxu2 %v3111_v28 }
0x1faf   :  { %2426 = vrot.lane.b32.xlu0 %v4624_v1, %s3768_s3 }
0x1fb7   :  { %2873 = vrot.lane.b32.xlu0 %v2871_v13, %s3768_s3 }
0x2019   :  { %v2981_v16 = vpop.permute.xlu0 %2980 }
0x201a   :  { %v4704_v18 = vadd.f32 %v2981_v16, %v2977_v17 }
0x201c   :  { %3567 = vtanh.f32 %v4704_v18  ;;  %v3089_v58 = vrot.slane %v4704_v18, 6  ;;  %v3292_v18 = vld [vmem:[%s4769_s11] ss:$0 sm:$0xff] }
0x2021   :  { %v2427_v38 = vpop.permute.xlu0 %2426 }
0x2022   :  { %v3568_v56 = vpop.eup %3567  ;;  %2429 = vst.msk [vmem:[#allocation3] sm:$0xc] %vm462_vm14, %v2427_v38 }
0x2023   :  { %v2985_v39 = vmul.f32 %v3568_v56, %v2973_v10 }
0x2025   :  { %v2993_v25 = vrot.slane %v2985_v39, 4 }
0x2027   :  { %2994 = vrot.lane.b32.xlu1 %v2993_v25, %s3768_s3 }
0x2029   :  { %v2874_v57 = vpop.permute.xlu0 %2873 }
0x202a   :  { %2876 = vst.msk [vmem:[#allocation3 + $0x8] sm:$0xc] %vm462_vm14, %v2874_v57 }
0x202f   :  { %2540 = vrot.lane.b32.xlu1 %v4653_v42, %s3768_s3 }
0x2037   :  { %2987 = vrot.lane.b32.xlu1 %v2985_v39, %s3768_s3 }
0x2099   :  { %v2995_v1 = vpop.permute.xlu1 %2994 }
0x209a   :  { %3273 = vmatmul.msk.f32.vlgmr.msrb.gmra.mxu0 %vm249_vm12, %v2995_v1  ;;  %3274 = vmatmul.msk.f32.vlgmr.msrb.gmra.mxu1 %vm249_vm12, %v2995_v1 }
0x20a1   :  { %v2541_v41 = vpop.permute.xlu1 %2540 }
0x20a2   :  { %2543 = vst.msk [vmem:[#allocation3] sm:$0x30] %vm577_vm15, %v2541_v41 }
0x20a9   :  { %v2988_v55 = vpop.permute.xlu1 %2987 }
0x20aa   :  { %2990 = vst.msk [vmem:[#allocation3 + $0x8] sm:$0x30] %vm577_vm15, %v2988_v55 }
0x2117   :  { %v3015_v3 = vpop.f32.mrf.mxu0  ;;  %v3035_v40 = vpop.f32.mrf.mxu1 }
0x2118   :  { %v3040_v30 = vrot.slane %v3015_v3, 2  ;;  %v3041_v20 = vrot.slane %v3035_v40, 2 }
0x211a   :  { %v3044_v42 = vadd.f32 %v3040_v30, %v2991_v43  ;;  %v3045_v50 = vadd.f32 %v3041_v20, %v2992_v49 }
0x211c   :  { %v3275_v52 = vmul.f32 -1.442695, %v3044_v42  ;;  %v3276_v9 = vmul.f32 -1.442695, %v3045_v50 }
0x211e   :  { %3569 = vpow2.f32 %v3275_v52 }
0x211f   :  { %3571 = vpow2.f32 %v3276_v9 }
0x2124   :  { %v3570_v13 = vpop.eup %3569 }
0x2125   :  { %v3572_v15 = vpop.eup %3571  ;;  %v3054_v19 = vadd.f32 1.0, %v3570_v13 }
0x2126   :  { %v3055_v4 = vadd.f32 1.0, %v3572_v15 }
0x2127   :  { %3573 = vrcp.f32 %v3054_v19  ;;  %v3067_v21 = vand.u32 2147483648, %v3054_v19  ;;  %v3065_v45 = vand.u32 2147483647, %v3054_v19  ;;  %vm3061_vm4 = vweird.f32 %v3054_v19 }
0x2128   :  { %3575 = vrcp.f32 %v3055_v4  ;;  %v3082_v7 = vand.u32 2147483648, %v3055_v4  ;;  %v3080_v63 = vand.u32 2147483647, %v3055_v4  ;;  %vm3076_vm6 = vweird.f32 %v3055_v4 }
0x2129   :  { %3577 = vtanh.f32 %v3045_v50  ;;  %v3068_v53 = vor.u32 1.1754944e-38, %v3067_v21  ;;  %vm3066_vm8 = vcmp.eq.f32.partialorder %v3065_v45, 8.507059e+37 }
0x212a   :  { %v3083_v62 = vor.u32 1.1754944e-38, %v3082_v7  ;;  %vm3081_vm13 = vcmp.eq.f32.partialorder %v3080_v63, 8.507059e+37 }
0x212d   :  { %v3574_v22 = vpop.eup %3573 }
0x212e   :  { %v3576_v24 = vpop.eup %3575  ;;  %v3057_v34 = vmul.f32 %v3574_v22, %v3054_v19  ;;  %vm3062_vm14 = vweird.f32 %v3574_v22 }
0x212f   :  { %v3072_v37 = vmul.f32 %v3576_v24, %v3055_v4  ;;  %vm3077_vm15 = vweird.f32 %v3576_v24  ;;  %vm3063_vm5 = vmor %vm3061_vm4, %vm3062_vm14  ;;  %v3578_v44 = vpop.eup %3577 }
0x2130   :  { %v3058_v5 = vsub.f32 1.0, %v3057_v34  ;;  %vm3078_vm10 = vmor %vm3076_vm6, %vm3077_vm15 }
0x2131   :  { %v3073_v23 = vsub.f32 1.0, %v3072_v37 }
0x2132   :  { %v3059_v26 = vmul.f32 %v3574_v22, %v3058_v5 }
0x2133   :  { %v3074_v6 = vmul.f32 %v3576_v24, %v3073_v23 }
0x2134   :  { %v3060_v46 = vadd.f32 %v3574_v22, %v3059_v26 }
0x2135   :  { %v3075_v54 = vadd.f32 %v3576_v24, %v3074_v6 }
0x2136   :  { %v3064_v60 = vsel %vm3063_vm5, %v3574_v22, %v3060_v46 }
0x2137   :  { %v3069_v33 = vsel %vm3066_vm8, %v3068_v53, %v3064_v60  ;;  %v3079_v0 = vsel %vm3078_vm10, %v3576_v24, %v3075_v54 }
0x2138   :  { %v3084_v11 = vsel %vm3081_vm13, %v3083_v62, %v3079_v0  ;;  %v3091_v36 = vmul.f32 %v3089_v58, %v3069_v33 }
0x2139   :  { %v3087_v8 = vsel %vm142_vm7, %v3578_v44, %v3084_v11  ;;  %vm3148_vm7 = vcmask 64512  }
0x213a   :  { %v3092_v61 = vmul.f32 %v3087_v8, %v3069_v33 }
0x213c   :  { %3094 = vrot.lane.b32.xlu2 %v3092_v61, %s3768_s3 }
0x2144   :  { %2654 = vrot.lane.b32.xlu2 %v4679_v27, %s3768_s3  ;;  %v3110_v27 = vld [vmem:[%s4768_s10 + $0x18] sm:$0xff] }
0x2145   :  { %3137 = vmatpush.msra.mxu2 %v3110_v27 }
0x2147   :  { %3138 = vmatpush.msra.mxu2 %v3109_v29 }
0x2149   :  { %3139 = vmatpush.msra.mxu2 %v3108_v31 }
0x214b   :  { %3140 = vmatpush.msra.mxu2 %v3107_v47 }
0x2196   :  { %v3095_v35 = vpop.permute.xlu2 %3094 }
0x2197   :  { %v3097_v2 = vadd.f32 %v3095_v35, %v3091_v36 }
0x2199   :  { %3579 = vtanh.f32 %v3097_v2 }
0x219e   :  { %v2655_v48 = vpop.permute.xlu2 %2654 }
0x219f   :  { %v3580_v51 = vpop.eup %3579  ;;  %2657 = vst.msk [vmem:[#allocation3] sm:$0xc0] %vm692_vm9, %v2655_v48 }
0x21a0   :  { %v3099_v17 = vmul.f32 %v3580_v51, %v3087_v8 }
0x21a2   :  { %3101 = vrot.lane.b32.xlu2 %v3099_v17, %s3768_s3  ;;  %s3157_s3 = sshll.u32 %s4770_s12, 4  ;;  %s3158_s3 = int_to_ptr.hbm [resolvable:$true] %s3157_s3 }
0x21a6   :  { %v3105_v10 = vld [vmem:[#allocation3] sm:$0xff] }
0x21a7   :  { %3277 = vmatmul.msk.f32.vlgmr.msra.gmra.mxu2 %vm249_vm12, %v3105_v10 }
0x21fc   :  { %v3102_v12 = vpop.permute.xlu2 %3101 }
0x21fd   :  { %3104 = vst.msk [vmem:[#allocation3 + $0x8] sm:$0xc0] %vm692_vm9, %v3102_v12 }
0x2204   :  { %v3106_v16 = vld [vmem:[#allocation3 + $0x8] sm:$0xff] }
0x2205   :  { %3278 = vmatmul.msk.f32.gmra.mxu2 %vm249_vm12, %v3106_v16 }
0x222a   :  { %v3142_v38 = vpop.f32.mrf.mxu2 }
0x222b   :  { %v3143_v56 = vadd.f32 %v3292_v18, %v3142_v38 }
0x222d   :  { %3149 = vst.msk [vmem:[#allocation15] sm:$0xff] %vm3148_vm7, %v3143_v56 }
0x2288   :  { %v3145_v39 = vpop.f32.mrf.mxu2 }
0x2289   :  { %v3146_v25 = vadd.f32 %v3292_v18, %v3145_v39 }
0x228b   :  { %3150 = vst.msk [vmem:[#allocation15 + $0x8] sm:$0xff] %vm3148_vm7, %v3146_v25 }
0x228c   :  { %3163 = dma.vmem_to_hbm [thread:$0]  %s3156_s29, 256, %s3158_s3, [#allocation6], %s3770_s15, %s3770_s15, %s3771_s16  }
0x228d   :  { %3757 = dma.done.wait [#allocation6], 256  }
0x228e   :  { %3758 = vsyncadd [#allocation6], 4294967040 }
0x228f   :  { %3168 = vsyncpa [#allocation5], 1 }
0x2290   :  { %3169 = vsyncpa [#allocation8], 1 }
0x2291   :  { %3170 = vsyncpa [#allocation11], 1 }
0x2292   :  { %3171 = vsyncpa [#allocation14], 1 }
0x2293   :  { %3172 = vsyncpa [#allocation6], 1 }

</bundles_post_ra>
